<compile_context>
chip_gen: v6e
topology: v6e:2x2x1
jax: 0.10.0
libtpu: 0.0.40
codegen_flags: <defaults>
</compile_context>

<pallas_src>
import math

import jax
import jax.numpy as jnp
from jax.experimental import pallas as pl
from jax.experimental.pallas import tpu as pltpu


# ----------------------------- synthetic module config -----------------------------
INP_SHAPE = (9, 16)       # (nlat_in,  nlon_in)   low-res decoder input grid
OUT_SHAPE = (13, 32)      # (nlat_out, nlon_out)  high-res grid (upsample target & conv grid)
INP_CHANS = 4
OUT_CHANS = 4
KERNEL_SHAPE = (3, 3)
BASIS_TYPE = "morlet"
BATCH = 2

LANE = 128                # TPU lane width; contraction dim is padded to a multiple of this


def _compute_cutoff_radius(nlat, kernel_shape, basis_type):
    theta_cutoff_factor = {"piecewise linear": 0.5, "morlet": 0.5, "zernike": math.sqrt(2.0)}
    return (kernel_shape[0] + 1) * theta_cutoff_factor[basis_type] * math.pi / float(nlat - 1)


def _precompute_psi(inp_shape, out_shape, kernel_shape, theta_cutoff):
    """Deterministic precompute of the DISCO basis tensor psi[k, ho, hi*W_in + wi] (fp32, dense).

    # TODO(synk): approximates torch_harmonics' exact morlet filter basis + 'mean' basis
    # normalization; cutoff support, quadrature weighting and the contraction semantics of
    # DiscreteContinuousConvS2 are preserved. Host-side buffer (built in __init__), not part
    # of the forward hot path.
    """
    H_in, W_in = inp_shape
    H_out, _ = out_shape
    kt, kp = kernel_shape

    theta_in = jnp.linspace(0.0, math.pi, H_in)          # colatitude, equiangular
    theta_out = jnp.linspace(0.0, math.pi, H_out)
    phi_in = jnp.linspace(0.0, 2.0 * math.pi, W_in, endpoint=False)

    ct_i = jnp.cos(theta_in)[None, :, None]
    st_i = jnp.sin(theta_in)[None, :, None]
    ct_o = jnp.cos(theta_out)[:, None, None]
    st_o = jnp.sin(theta_out)[:, None, None]
    cp = jnp.cos(phi_in)[None, None, :]
    sp = jnp.sin(phi_in)[None, None, :]

    cos_d = ct_o * ct_i + st_o * st_i * cp
    d = jnp.arccos(jnp.clip(cos_d, -1.0, 1.0))                       # (H_out, H_in, W_in)
    alpha = jnp.arctan2(st_i * sp, ct_i * st_o - st_i * ct_o * cp)   # local azimuth
    r = d / theta_cutoff
    support = (r <= 1.0).astype(jnp.float32)

    # equiangular quadrature weights
    dtheta = math.pi / (H_in - 1)
    dphi = 2.0 * math.pi / W_in
    quad = jnp.sin(theta_in)[None, :, None] * dtheta * dphi

    fns = []
    for ik in range(kt):
        for il in range(kp):
            env = jnp.exp(-4.0 * r * r)
            radial = jnp.cos(ik * math.pi * r)
            azim = jnp.cos(il * alpha)
            fns.append(env * radial * azim * support)
    psi = jnp.stack(fns, axis=0) * quad[None]                        # (K, H_out, H_in, W_in)
    norm = jnp.sum(jnp.abs(psi), axis=(-2, -1), keepdims=True)       # 'mean'-style row normalization
    psi = psi / jnp.maximum(norm, 1e-8)
    K = kt * kp
    return psi.reshape(K, H_out, H_in * W_in).astype(jnp.float32)


def _precompute_bilinear_resample(inp_shape, out_shape):
    """Dense bilinear ResampleS2 matrix U[ho*W_out + wo, hi*W_in + wi] (fp32).

    # TODO(synk): approximates torch_harmonics ResampleS2(mode='bilinear') on equiangular
    # grids: linear interpolation in colatitude (poles included) and periodic linear
    # interpolation in longitude. Host-side buffer (built in __init__), not in the hot path.
    """
    H_in, W_in = inp_shape
    H_out, W_out = out_shape

    # latitude: theta = linspace(0, pi, H) on both grids; non-periodic linear interpolation
    pos = jnp.linspace(0.0, math.pi, H_out) / (math.pi / (H_in - 1))
    i0 = jnp.clip(jnp.floor(pos).astype(jnp.int32), 0, H_in - 2)
    fr = jnp.clip(pos - i0.astype(jnp.float32), 0.0, 1.0)
    lat = jnp.zeros((H_out, H_in), jnp.float32)
    lat = lat.at[jnp.arange(H_out), i0].add(1.0 - fr)
    lat = lat.at[jnp.arange(H_out), i0 + 1].add(fr)

    # longitude: phi = 2*pi*j/W; periodic linear interpolation
    posw = jnp.arange(W_out) * (W_in / W_out)
    j0f = jnp.floor(posw)
    frw = (posw - j0f).astype(jnp.float32)
    j0 = j0f.astype(jnp.int32) % W_in
    j1 = (j0 + 1) % W_in
    lon = jnp.zeros((W_out, W_in), jnp.float32)
    lon = lon.at[jnp.arange(W_out), j0].add(1.0 - frw)
    lon = lon.at[jnp.arange(W_out), j1].add(frw)

    U = jnp.einsum("ab,cd->acbd", lat, lon)              # [ho, wo, hi, wi]
    return U.reshape(H_out * W_out, H_in * W_in)


def build_decoder_operator(weight, psi, U, out_shape, inp_shape,
                           operator_dtype=jnp.bfloat16, pad_contract_to=LANE):
    """Init-time fold of (bilinear upsample ∘ rolled DISCO basis ∘ conv weight) into one matrix.

    Data-independent (weight / psi / U are module parameters & buffers):
      out[b, o, ho, wo] = sum_{c, pin} x[b, c, pin] * T[c*Pin + pin, o*H*W + ho*W + wo]

    Perf-review items applied here (all hoisted out of the forward hot path):
      * the operator is stored permanently in `operator_dtype` (default bf16 -- MXU-native
        operands on v5e/v6e/v7x; accumulation in the kernel stays fp32), so the forward never
        re-casts T and never pays that extra HBM round trip;
      * the contraction dim C*Pin is zero-padded to a multiple of 128 so the MXU K dimension
        and the LHS row loads are fully dense (no ragged tail vreg).
    """
    K, H, P = psi.shape                                  # P = H*W (conv is out_shape -> out_shape)
    Hh, W = out_shape
    assert H == Hh and P == H * W
    O, C, Kw = weight.shape
    assert Kw == K
    Pin = inp_shape[0] * inp_shape[1]
    assert U.shape == (P, Pin)

    psi4 = psi.reshape(K, H, H, W).astype(jnp.float32)   # [k, ho, h', w']
    # pre-roll over output longitude wo (pscale = W // W = 1):
    #   psi_roll[k, ho, wo, h', w'] = psi4[k, ho, h', (w' - wo) % W]
    psi_roll = jnp.stack([jnp.roll(psi4, wo, axis=-1) for wo in range(W)], axis=2)
    psi_roll = psi_roll.reshape(K, H, W, P)              # p = h'*W + w'
    # fold conv weight: Tc[c, p, o, ho, wo] = sum_k weight[o, c, k] * psi_roll[k, ho, wo, p]
    Tc = jnp.einsum("ock,khwp->cpohw", weight.astype(jnp.float32), psi_roll)
    Tc = Tc.reshape(C, P, O * H * W)
    # fold bilinear upsample: T[c, pin, m] = sum_p U[p, pin] * Tc[c, p, m]
    T = jnp.einsum("pq,cpm->cqm", U.astype(jnp.float32), Tc)
    T = T.reshape(C * Pin, O * H * W)

    # zero-pad contraction dim to a lane multiple (free at init; x columns padded to match)
    CP = C * Pin
    CPp = ((CP + pad_contract_to - 1) // pad_contract_to) * pad_contract_to
    if CPp > CP:
        T = jnp.pad(T, ((0, CPp - CP), (0, 0)))

    return T.astype(operator_dtype)                      # cast hoisted out of the forward path


# ---------------------------------- Pallas kernel ----------------------------------
def _decoder_matmul_kernel(x_ref, t_ref, o_ref):
    # x_ref: (B, CPp)      whole flattened batch (contraction dim padded to 128-multiple)
    # t_ref: (CPp, TN)     folded decoder operator (full, or one column tile)
    # o_ref: (B, TN)       lane-dense output block (TN a multiple of 128)
    o_ref[...] = jnp.dot(x_ref[...], t_ref[...],
                         preferred_element_type=jnp.float32).astype(o_ref.dtype)


def disco_decoder_forward(x, T, out_shape, out_chans, n_tiles=1):
    """Pallas TPU DiscreteContinuousDecoder.forward (use_mlp=False, bias=False, bilinear upsample).

    # layout: public API matches PyTorch NCHW: x (B, C_in, H_in, W_in) -> (B, C_out, H_out, W_out).
    #         Kernel-internal layouts: x flattened/padded to (B, CPp); folded operator
    #         T (CPp, C_out*H_out*W_out); output (B, C_out*H_out*W_out) -> NCHW reshape.
    # Compute dtype is taken from T.dtype (set once at init); MXU accumulation is fp32 and the
    # kernel writes the public (input) dtype directly -- no wrapper-side double casts.
    #
    # n_tiles = 1  : single grid step; x and T fetched exactly once; T single-buffered
    #                (pl.Buffered(1)) since its block never changes -> minimal VMEM, and on
    #                v7x the T DMA is NOT duplicated across the two TensorCores.
    # n_tiles > 1  : grid over column tiles of T (each a 128-multiple), marked "parallel" --
    #                for larger configs this keeps each block under v7x's 64 MiB VMEM, lets the
    #                T DMA pipeline against the matmul, and lets the two v7x TCs each read half
    #                of T instead of duplicating it.
    #
    # TODO(synk): use_mlp=True (GELU + EncoderDecoder), upsample_sht=True and the distributed
    #             (comm/thd) spatial-parallel branches are not exercised by the defaults.
    """
    in_dtype = x.dtype
    B, C, H_in, W_in = x.shape
    H, W = out_shape
    O = out_chans
    M = O * H * W
    CP = C * H_in * W_in
    CPp, Mt = T.shape
    assert Mt == M and CPp >= CP and CPp % 8 == 0
    assert M % n_tiles == 0
    TN = M // n_tiles
    assert TN % LANE == 0, "column tile must stay lane-dense"

    # amp.autocast(enabled=False) in the module: conv-path accumulation is fp32 (done on the MXU
    # via preferred_element_type); operands use T's storage dtype. Single cast of the tiny x.
    xf = x.reshape(B, CP).astype(T.dtype)
    if CPp > CP:
        xf = jnp.pad(xf, ((0, 0), (0, CPp - CP)))

    # Resident operator (n_tiles == 1) never changes block -> single buffer; tiled operator
    # keeps default double-buffering so its DMA pipelines against the matmul.
    t_spec = pl.BlockSpec((CPp, TN), lambda j: (0, j),
                          pipeline_mode=pl.Buffered(1 if n_tiles == 1 else 2))

    out = pl.pallas_call(
        _decoder_matmul_kernel,
        out_shape=jax.ShapeDtypeStruct((B, M), in_dtype),
        grid_spec=pltpu.PrefetchScalarGridSpec(
            num_scalar_prefetch=0,
            grid=(n_tiles,),
            in_specs=[
                pl.BlockSpec((B, CPp), lambda j: (0, 0)),   # whole batch, fetched once
                t_spec,                                     # folded operator (full or tiled)
            ],
            out_specs=pl.BlockSpec((B, TN), lambda j: (0, j)),  # lane-dense output blocks
        ),
        compiler_params=pltpu.CompilerParams(
            dimension_semantics=("parallel",),              # independent column tiles
            vmem_limit_bytes=32 * 1024 * 1024,
        ),
    )(xf, T)

    return out.reshape(B, O, H, W)


# -------------------------------- pure-JAX reference --------------------------------
def _reference_forward(x, weight, psi, U, out_shape):
    """Unfolded reference: bilinear upsample, then DISCO conv (explicit roll / basis / weight)."""
    in_dtype = x.dtype
    xf = x.astype(jnp.float32)
    B, C, H_in, W_in = xf.shape
    H, W = out_shape
    # bilinear upsample (ResampleS2, mode='bilinear')
    xu = jnp.einsum("qp,bcp->bcq", U, xf.reshape(B, C, H_in * W_in)).reshape(B, C, H, W)
    # DISCO conv on S2 at out_shape -> out_shape (pscale = 1)
    ys = []
    for wo in range(W):
        xr = jnp.roll(xu, -wo, axis=-1).reshape(B, C, H * W)
        ys.append(jnp.einsum("kop,bcp->bcko", psi, xr))
    y = jnp.stack(ys, axis=-1)                            # (B, C, K, H, W)
    out = jnp.einsum("ock,bckhw->bohw", weight, y)
    return out.astype(in_dtype)


if __name__ == "__main__":
    key = jax.random.PRNGKey(0)
    kx, kw = jax.random.split(key)

    K = KERNEL_SHAPE[0] * KERNEL_SHAPE[1]
    # decoder: the conv lives on the high-res grid, cutoff derived from out_shape[0]
    theta_cutoff = _compute_cutoff_radius(OUT_SHAPE[0], KERNEL_SHAPE, BASIS_TYPE)
    psi = _precompute_psi(OUT_SHAPE, OUT_SHAPE, KERNEL_SHAPE, theta_cutoff)   # (K, H, H*W)
    U = _precompute_bilinear_resample(INP_SHAPE, OUT_SHAPE)                   # (H*W, Hin*Win)

    # conv weight: (out_chans, in_chans // groups, kernel_size), torch_harmonics-style init
    scale = math.sqrt(1.0 / (INP_CHANS * K))
    weight = scale * jax.random.normal(kw, (OUT_CHANS, INP_CHANS, K), dtype=jnp.float32)

    x = jax.random.normal(kx, (BATCH, INP_CHANS) + INP_SHAPE, dtype=jnp.float32)

    # init-time operator folds (independent of x; analogous to __init__ buffer construction).
    # Dtype cast + contraction-dim padding are hoisted here -- nothing is re-cast per forward.
    T_f32 = jax.block_until_ready(
        build_decoder_operator(weight, psi, U, OUT_SHAPE, INP_SHAPE, operator_dtype=jnp.float32))
    T_bf16 = jax.block_until_ready(
        build_decoder_operator(weight, psi, U, OUT_SHAPE, INP_SHAPE, operator_dtype=jnp.bfloat16))

    ref = _reference_forward(x, weight, psi, U, OUT_SHAPE)

    # exactness check: fp32 operator, single grid step (resident, single-buffered operator)
    out = jax.block_until_ready(disco_decoder_forward(x, T_f32, OUT_SHAPE, OUT_CHANS))
    assert out.shape == (BATCH, OUT_CHANS) + OUT_SHAPE
    assert out.dtype == x.dtype
    max_err = float(jnp.max(jnp.abs(out - ref)))
    assert jnp.allclose(out, ref, rtol=1e-4, atol=2e-4), f"max abs err = {max_err}"

    # default fast path: bf16-operand operator (halves the dominant HBM traffic on T),
    # fp32 MXU accumulation -- looser tolerance
    out_bf16 = jax.block_until_ready(disco_decoder_forward(x, T_bf16, OUT_SHAPE, OUT_CHANS))
    rel = float(jnp.linalg.norm(out_bf16 - ref) / jnp.linalg.norm(ref))
    assert rel < 3e-2, f"bf16 rel-l2 err = {rel}"

    # N-tiled variant (v7x / large-config path: 128-wide column tiles of T, "parallel" axis);
    # must agree with the single-step result.
    out_tiled = jax.block_until_ready(
        disco_decoder_forward(x, T_bf16, OUT_SHAPE, OUT_CHANS, n_tiles=13))
    tile_err = float(jnp.max(jnp.abs(out_tiled - out_bf16)))
    assert jnp.allclose(out_tiled, out_bf16, rtol=0.0, atol=1e-5), f"tiled mismatch {tile_err}"

    print("KERNEL_OK")
</pallas_src>

<mosaic_0001>
module attributes {stable_mosaic.version = 11 : i64} {
  func.func @_decoder_matmul_kernel(%arg0: i32, %arg1: memref<2x640xf32, #tpu.memory_space<vmem>>, %arg2: memref<640x1664xf32, #tpu.memory_space<vmem>>, %arg3: memref<2x1664xf32, #tpu.memory_space<vmem>>) attributes {dimension_semantics = [#tpu.dimension_semantics<parallel>], iteration_bounds = array<i64: 1>, scalar_prefetch = 0 : i64, scratch_operands = 0 : i64, tpu.core_type = #tpu.core_type<tc>, window_params = [{pipeline_mode = #tpu.pipeline_mode<synchronous>, transform_indices = @transform_0, window_bounds = array<i64: 2, 640>}, {pipeline_mode = #tpu.pipeline_mode<synchronous>, transform_indices = @transform_1, window_bounds = array<i64: 640, 1664>}, {transform_indices = @transform_2, window_bounds = array<i64: 2, 1664>}]} {
    %c0 = arith.constant 0 : index
    %c0_0 = arith.constant 0 : index
    %0 = vector.load %arg1[%c0, %c0_0] : memref<2x640xf32, #tpu.memory_space<vmem>>, vector<2x640xf32>
    %c0_1 = arith.constant 0 : index
    %c0_2 = arith.constant 0 : index
    %1 = vector.load %arg2[%c0_1, %c0_2] : memref<640x1664xf32, #tpu.memory_space<vmem>>, vector<640x1664xf32>
    %cst = arith.constant dense<0.000000e+00> : vector<2x1664xf32>
    %2 = tpu.matmul %0, %1, %cst {dimension_numbers = #tpu.dot_dimension_numbers<[1], [0], [0], [1], [0, 0, 1, 1], [], []>} : vector<2x640xf32>, vector<640x1664xf32>, vector<2x1664xf32> -> vector<2x1664xf32>
    %c0_3 = arith.constant 0 : index
    %c0_4 = arith.constant 0 : index
    %3 = vector.load %arg3[%c0_3, %c0_4] : memref<2x1664xf32, #tpu.memory_space<vmem>>, vector<2x1664xf32>
    tpu.vector_store %arg3[%c0_3, %c0_4], %2 {strides = array<i32>} : memref<2x1664xf32, #tpu.memory_space<vmem>>, vector<2x1664xf32>,
    return
  }
  func.func @transform_0(%arg0: i32) -> (i32, i32) {
    %c0_i32 = arith.constant 0 : i32
    %c0_i32_0 = arith.constant 0 : i32
    %c0_i32_1 = arith.constant 0 : i32
    return %c0_i32, %c0_i32_0 : i32, i32
  }
  func.func @transform_1(%arg0: i32) -> (i32, i32) {
    %c0_i32 = arith.constant 0 : i32
    %c0_i32_0 = arith.constant 0 : i32
    return %c0_i32, %arg0 : i32, i32
  }
  func.func @transform_2(%arg0: i32) -> (i32, i32) {
    %c0_i32 = arith.constant 0 : i32
    %c0_i32_0 = arith.constant 0 : i32
    return %c0_i32, %arg0 : i32, i32
  }
}

</mosaic_0001>

<bundles_post_ra>
// kernel: tpu_custom_call.1
= control target key start
LH: loop header
LB: loop body
LE: loop exit
PB: predicated region body
PF: predicated region fallthrough
CT: control target
= control target key end

     0   :  { %7 = vsyncpa [#allocation3], 0  ;;  %s3013_s0 = inlined_call_operand.hbm [shape: f32[2,640], index: 0, kind: input, shape index: {}]   ;;  %s3014_s1 = inlined_call_operand.hbm [shape: f32[640,1664], index: 1, kind: input, shape index: {}]   ;;  %s3015_s2 = inlined_call_operand.hbm [shape: f32[2,1664], index: 2, kind: output, shape index: {}]  }
   0x1   :  { %8 = vsyncpa [#allocation6], 0 }
   0x2   :  { %9 = vsyncpa [#allocation4], 0  ;;  %s2895_s9 = smov [#allocation2]   ;;  %s2896_s11 = smov [#allocation5]  }
   0x3   :  { %s16_s10 = sshll.u32 %s2895_s9, 4  ;;  %s25_s12 = sshll.u32 %s2896_s11, 4  ;;  %s17_s10 = int_to_ptr.vmem [resolvable:$true] %s16_s10  ;;  %s26_s12 = int_to_ptr.vmem [resolvable:$true] %s25_s12 }
   0x4   :  { %s2837_s13 = scalar_lea.vmem %s17_s10, 160  ;;  %p2842_p1 = scmp.lt.s32.totalorder %s17_s10, %s17_s10 }
   0x5   :  { %p2838_p0 = scmp.ne.s32.totalorder %s17_s10, %s2837_s13  ;;  %p2843_p2 = scmp.lt.s32.totalorder %s2837_s13, %s2837_s13 }
   0x7   :  { %p2844_p3 = por %p2843_p2, %p2842_p1 }
   0x9   :  { %p2845_p4 = pnand %p2844_p3, %p2838_p0 }
   0xb   :  { %2848 = shalt.err (!%p2845_p4)
}
   0xc   :  { %19 = dma.hbm_to_vmem [thread:$0]  %s3013_s0, 160, %s17_s10, [#allocation3]  }
   0xd   :  { %s2857_s16 = scalar_lea.vmem %s26_s12, 133120  ;;  %p2862_p6 = scmp.lt.s32.totalorder %s26_s12, %s26_s12 }
   0xe   :  { %p2858_p5 = scmp.ne.s32.totalorder %s26_s12, %s2857_s16  ;;  %p2863_p7 = scmp.lt.s32.totalorder %s2857_s16, %s2857_s16 }
  0x10   :  { %p2864_p8 = por %p2863_p7, %p2862_p6 }
  0x12   :  { %p2865_p9 = pnand %p2864_p8, %p2858_p5 }
  0x14   :  { %2868 = shalt.err (!%p2865_p9)
}
  0x15   :  { %s2897_s17 = smov 1664   ;;  %s2898_s18 = smov 104  }
  0x16   :  { %31 = dma.hbm_to_vmem [thread:$0]  %s3014_s1, 133120, %s26_s12, [#allocation6], %s2897_s17, %s2897_s17, %s2898_s18  }
  0x17   :  { %2889 = dma.done.wait [#allocation3], 160  }
  0x18   :  { %2890 = vsyncadd [#allocation3], 4294967136 }
  0x19   :  { %2891 = dma.done.wait [#allocation6], 133120  }
  0x1a   :  { %2892 = vsyncadd [#allocation6], 4294834176  ;;  %v236_v0 = vld [vmem:[#allocation5 + $0x620] sm:$0xff]  ;;  %v235_v2 = vld [vmem:[#allocation5 + $0x618] sm:$0xff]  ;;  %vm2901_vm0 = vmmov 0   ;;  %s2902_s0 = smov [#allocation7]  }
  0x1b   :  { %v652_v1 = vld [vmem:[#allocation5 + $0x1320] sm:$0xff]  ;;  %1111 = vmatprep.subr.mxu0 %v236_v0  ;;  %v651_v3 = vld [vmem:[#allocation5 + $0x1318] sm:$0xff]  ;;  %v222_v6 = vld [vmem:[#allocation5 + $0x5b0] sm:$0xff]  ;;  %s2684_s1 = sshll.u32 %s2902_s0, 4  ;;  %s2685_s1 = int_to_ptr.vmem [resolvable:$true] %s2684_s1 }
  0x1c   :  { %1182 = vmatprep.subr.mxu1 %v652_v1  ;;  %v223_v4 = vld [vmem:[#allocation5 + $0x5b8] sm:$0xff]  ;;  %1112 = vmatpush1.msra.mxu0 %v235_v2  ;;  %v638_v7 = vld [vmem:[#allocation5 + $0x12b0] sm:$0xff]  ;;  %v209_v10 = vld [vmem:[#allocation5 + $0x548] sm:$0xff]  ;;  %s2869_s21 = scalar_lea.vmem %s2685_s1, 416  ;;  %p2874_p11 = scmp.lt.s32.totalorder %s2685_s1, %s2685_s1 }
  0x1d   :  { %v639_v5 = vld [vmem:[#allocation5 + $0x12b8] sm:$0xff]  ;;  %1183 = vmatpush1.msra.mxu1 %v651_v3  ;;  %v210_v8 = vld [vmem:[#allocation5 + $0x550] sm:$0xff]  ;;  %1113 = vmatprep.subr.mxu0 %v223_v4  ;;  %v625_v11 = vld [vmem:[#allocation5 + $0x1248] sm:$0xff]  ;;  %p2870_p10 = scmp.ne.s32.totalorder %s2685_s1, %s2869_s21  ;;  %p2875_p12 = scmp.lt.s32.totalorder %s2869_s21, %s2869_s21 }
  0x1e   :  { %1184 = vmatprep.subr.mxu1 %v639_v5  ;;  %v626_v9 = vld [vmem:[#allocation5 + $0x1250] sm:$0xff]  ;;  %1114 = vmatpush1.msra.mxu0 %v222_v6  ;;  %v197_v12 = vld [vmem:[#allocation5 + $0x4e8] sm:$0xff]  ;;  %v196_v14 = vld [vmem:[#allocation5 + $0x4e0] sm:$0xff] }
  0x1f   :  { %1185 = vmatpush1.msra.mxu1 %v638_v7  ;;  %v613_v13 = vld [vmem:[#allocation5 + $0x11e8] sm:$0xff]  ;;  %1115 = vmatprep.subr.mxu0 %v210_v8  ;;  %v612_v15 = vld [vmem:[#allocation5 + $0x11e0] sm:$0xff]  ;;  %v183_v18 = vld [vmem:[#allocation5 + $0x478] sm:$0xff]  ;;  %p2876_p13 = por %p2875_p12, %p2874_p11 }
  0x20   :  { %1186 = vmatprep.subr.mxu1 %v626_v9  ;;  %1116 = vmatpush1.msra.mxu0 %v209_v10  ;;  %v184_v16 = vld [vmem:[#allocation5 + $0x480] sm:$0xff]  ;;  %v599_v19 = vld [vmem:[#allocation5 + $0x1178] sm:$0xff]  ;;  %v170_v22 = vld [vmem:[#allocation5 + $0x410] sm:$0xff] }
  0x21   :  { %1187 = vmatpush1.msra.mxu1 %v625_v11  ;;  %v600_v17 = vld [vmem:[#allocation5 + $0x1180] sm:$0xff]  ;;  %1117 = vmatprep.subr.mxu0 %v197_v12  ;;  %v171_v20 = vld [vmem:[#allocation5 + $0x418] sm:$0xff]  ;;  %v586_v23 = vld [vmem:[#allocation5 + $0x1110] sm:$0xff]  ;;  %p2877_p0 = pnand %p2876_p13, %p2870_p10 }
  0x22   :  { %1188 = vmatprep.subr.mxu1 %v613_v13  ;;  %1118 = vmatpush1.msra.mxu0 %v196_v14  ;;  %v587_v21 = vld [vmem:[#allocation5 + $0x1118] sm:$0xff]  ;;  %v158_v24 = vld [vmem:[#allocation5 + $0x3b0] sm:$0xff]  ;;  %v157_v26 = vld [vmem:[#allocation5 + $0x3a8] sm:$0xff] }
  0x23   :  { %1189 = vmatpush1.msra.mxu1 %v612_v15  ;;  %1119 = vmatprep.subr.mxu0 %v184_v16  ;;  %v574_v25 = vld [vmem:[#allocation5 + $0x10b0] sm:$0xff]  ;;  %v573_v27 = vld [vmem:[#allocation5 + $0x10a8] sm:$0xff]  ;;  %v144_v30 = vld [vmem:[#allocation5 + $0x340] sm:$0xff] }
  0x24   :  { %1190 = vmatprep.subr.mxu1 %v600_v17  ;;  %1120 = vmatpush1.msra.mxu0 %v183_v18  ;;  %v145_v28 = vld [vmem:[#allocation5 + $0x348] sm:$0xff]  ;;  %v560_v31 = vld [vmem:[#allocation5 + $0x1040] sm:$0xff]  ;;  %v131_v34 = vld [vmem:[#allocation5 + $0x2d8] sm:$0xff] }
  0x25   :  { %1191 = vmatpush1.msra.mxu1 %v599_v19  ;;  %1121 = vmatprep.subr.mxu0 %v171_v20  ;;  %v561_v29 = vld [vmem:[#allocation5 + $0x1048] sm:$0xff]  ;;  %v132_v32 = vld [vmem:[#allocation5 + $0x2e0] sm:$0xff]  ;;  %v547_v35 = vld [vmem:[#allocation5 + $0xfd8] sm:$0xff] }
  0x26   :  { %1192 = vmatprep.subr.mxu1 %v587_v21  ;;  %1122 = vmatpush1.msra.mxu0 %v170_v22  ;;  %v548_v33 = vld [vmem:[#allocation5 + $0xfe0] sm:$0xff]  ;;  %v119_v36 = vld [vmem:[#allocation5 + $0x278] sm:$0xff]  ;;  %v118_v38 = vld [vmem:[#allocation5 + $0x270] sm:$0xff] }
  0x27   :  { %1193 = vmatpush1.msra.mxu1 %v586_v23  ;;  %1123 = vmatprep.subr.mxu0 %v158_v24  ;;  %v535_v37 = vld [vmem:[#allocation5 + $0xf78] sm:$0xff]  ;;  %v534_v39 = vld [vmem:[#allocation5 + $0xf70] sm:$0xff]  ;;  %v105_v42 = vld [vmem:[#allocation5 + $0x208] sm:$0xff] }
  0x28   :  { %1194 = vmatprep.subr.mxu1 %v574_v25  ;;  %1124 = vmatpush1.msra.mxu0 %v157_v26  ;;  %v106_v40 = vld [vmem:[#allocation5 + $0x210] sm:$0xff]  ;;  %v521_v43 = vld [vmem:[#allocation5 + $0xf08] sm:$0xff]  ;;  %v92_v46 = vld [vmem:[#allocation5 + $0x1a0] sm:$0xff] }
  0x29   :  { %1195 = vmatpush1.msra.mxu1 %v573_v27  ;;  %1125 = vmatprep.subr.mxu0 %v145_v28  ;;  %v522_v41 = vld [vmem:[#allocation5 + $0xf10] sm:$0xff]  ;;  %v93_v44 = vld [vmem:[#allocation5 + $0x1a8] sm:$0xff]  ;;  %v508_v47 = vld [vmem:[#allocation5 + $0xea0] sm:$0xff] }
  0x2a   :  { %1196 = vmatprep.subr.mxu1 %v561_v29  ;;  %1126 = vmatpush1.msra.mxu0 %v144_v30  ;;  %v509_v45 = vld [vmem:[#allocation5 + $0xea8] sm:$0xff]  ;;  %v80_v48 = vld [vmem:[#allocation5 + $0x140] sm:$0xff]  ;;  %v79_v50 = vld [vmem:[#allocation5 + $0x138] sm:$0xff]  ;;  %v2899_v30 = vmov 1983009808  }
  0x2b   :  { %1197 = vmatpush1.msra.mxu1 %v560_v31  ;;  %1127 = vmatprep.subr.mxu0 %v132_v32  ;;  %v496_v49 = vld [vmem:[#allocation5 + $0xe40] sm:$0xff]  ;;  %v495_v51 = vld [vmem:[#allocation5 + $0xe38] sm:$0xff]  ;;  %v66_v54 = vld [vmem:[#allocation5 + $0xd0] sm:$0xff]  ;;  %v1084_v31 = vunpack.c.l.s4 %v2899_v30  ;;  %v1086_v32 = vlaneseq }
  0x2c   :  { %1198 = vmatprep.subr.mxu1 %v548_v33  ;;  %1128 = vmatpush1.msra.mxu0 %v131_v34  ;;  %v67_v52 = vld [vmem:[#allocation5 + $0xd8] sm:$0xff]  ;;  %v482_v55 = vld [vmem:[#allocation5 + $0xdd0] sm:$0xff]  ;;  %v53_v58 = vld [vmem:[#allocation5 + $0x68] sm:$0xff] }
  0x2d   :  { %1199 = vmatpush1.msra.mxu1 %v547_v35  ;;  %1129 = vmatprep.subr.mxu0 %v119_v36  ;;  %v483_v53 = vld [vmem:[#allocation5 + $0xdd8] sm:$0xff]  ;;  %v54_v56 = vld [vmem:[#allocation5 + $0x70] sm:$0xff]  ;;  %v469_v59 = vld [vmem:[#allocation5 + $0xd68] sm:$0xff] }
  0x2e   :  { %1200 = vmatprep.subr.mxu1 %v535_v37  ;;  %1130 = vmatpush1.msra.mxu0 %v118_v38  ;;  %v470_v57 = vld [vmem:[#allocation5 + $0xd70] sm:$0xff]  ;;  %v41_v60 = vld [vmem:[#allocation5 + $0x8] sm:$0xff]  ;;  %v40_v62 = vld [vmem:[#allocation5] sm:$0xff] }
  0x2f   :  { %1201 = vmatpush1.msra.mxu1 %v534_v39  ;;  %1131 = vmatprep.subr.mxu0 %v106_v40  ;;  %v457_v61 = vld [vmem:[#allocation5 + $0xd08] sm:$0xff]  ;;  %v456_v63 = vld [vmem:[#allocation5 + $0xd00] sm:$0xff]  ;;  %v443_v2 = vld [vmem:[#allocation5 + $0xc98] sm:$0xff] }
  0x30   :  { %1202 = vmatprep.subr.mxu1 %v522_v41  ;;  %1132 = vmatpush1.msra.mxu0 %v105_v42  ;;  %v444_v0 = vld [vmem:[#allocation5 + $0xca0] sm:$0xff]  ;;  %v859_v3 = vld [vmem:[#allocation5 + $0x1998] sm:$0xff]  ;;  %v430_v6 = vld [vmem:[#allocation5 + $0xc30] sm:$0xff]  ;;  %v1085_v41 = vunpack.c.0.s8 %v1084_v31  ;;  %v1087_v42 = vshrl.u32 %v1086_v32, 7 }
  0x31   :  { %1203 = vmatpush1.msra.mxu1 %v521_v43  ;;  %1133 = vmatprep.subr.mxu0 %v93_v44  ;;  %v860_v1 = vld [vmem:[#allocation5 + $0x19a0] sm:$0xff]  ;;  %v431_v4 = vld [vmem:[#allocation5 + $0xc38] sm:$0xff]  ;;  %v846_v7 = vld [vmem:[#allocation5 + $0x1930] sm:$0xff] }
  0x32   :  { %1204 = vmatprep.subr.mxu1 %v509_v45  ;;  %1134 = vmatpush1.msra.mxu0 %v92_v46  ;;  %v847_v5 = vld [vmem:[#allocation5 + $0x1938] sm:$0xff]  ;;  %v418_v8 = vld [vmem:[#allocation5 + $0xbd0] sm:$0xff]  ;;  %v417_v10 = vld [vmem:[#allocation5 + $0xbc8] sm:$0xff] }
  0x33   :  { %1205 = vmatpush1.msra.mxu1 %v508_v47  ;;  %1135 = vmatprep.subr.mxu0 %v80_v48  ;;  %v834_v9 = vld [vmem:[#allocation5 + $0x18d0] sm:$0xff]  ;;  %v833_v11 = vld [vmem:[#allocation5 + $0x18c8] sm:$0xff]  ;;  %v404_v14 = vld [vmem:[#allocation5 + $0xb60] sm:$0xff] }
  0x34   :  { %1206 = vmatprep.subr.mxu1 %v496_v49  ;;  %1136 = vmatpush1.msra.mxu0 %v79_v50  ;;  %v405_v12 = vld [vmem:[#allocation5 + $0xb68] sm:$0xff]  ;;  %v820_v15 = vld [vmem:[#allocation5 + $0x1860] sm:$0xff]  ;;  %v391_v18 = vld [vmem:[#allocation5 + $0xaf8] sm:$0xff] }
  0x35   :  { %1207 = vmatpush1.msra.mxu1 %v495_v51  ;;  %1137 = vmatprep.subr.mxu0 %v67_v52  ;;  %v821_v13 = vld [vmem:[#allocation5 + $0x1868] sm:$0xff]  ;;  %v392_v16 = vld [vmem:[#allocation5 + $0xb00] sm:$0xff]  ;;  %v807_v19 = vld [vmem:[#allocation5 + $0x17f8] sm:$0xff]  ;;  %v2924_v52 = vsub.s32 %v1085_v41, %v1087_v42 }
  0x36   :  { %1208 = vmatprep.subr.mxu1 %v483_v53  ;;  %1138 = vmatpush1.msra.mxu0 %v66_v54  ;;  %v808_v17 = vld [vmem:[#allocation5 + $0x1800] sm:$0xff]  ;;  %v379_v20 = vld [vmem:[#allocation5 + $0xa98] sm:$0xff]  ;;  %v378_v22 = vld [vmem:[#allocation5 + $0xa90] sm:$0xff] }
  0x37   :  { %1209 = vmatpush1.msra.mxu1 %v482_v55  ;;  %1139 = vmatprep.subr.mxu0 %v54_v56  ;;  %v795_v21 = vld [vmem:[#allocation5 + $0x1798] sm:$0xff]  ;;  %v794_v23 = vld [vmem:[#allocation5 + $0x1790] sm:$0xff]  ;;  %v365_v26 = vld [vmem:[#allocation5 + $0xa28] sm:$0xff] }
  0x38   :  { %1210 = vmatprep.subr.mxu1 %v470_v57  ;;  %1140 = vmatpush1.msra.mxu0 %v53_v58  ;;  %v366_v24 = vld [vmem:[#allocation5 + $0xa30] sm:$0xff]  ;;  %v781_v27 = vld [vmem:[#allocation5 + $0x1728] sm:$0xff]  ;;  %v352_v33 = vld [vmem:[#allocation5 + $0x9c0] sm:$0xff] }
  0x39   :  { %1211 = vmatpush1.msra.mxu1 %v469_v59  ;;  %1141 = vmatprep.subr.mxu0 %v41_v60  ;;  %v782_v25 = vld [vmem:[#allocation5 + $0x1730] sm:$0xff]  ;;  %v353_v28 = vld [vmem:[#allocation5 + $0x9c8] sm:$0xff]  ;;  %v768_v34 = vld [vmem:[#allocation5 + $0x16c0] sm:$0xff] }
  0x3a   :  { %1212 = vmatprep.subr.mxu1 %v457_v61  ;;  %1142 = vmatpush1.msra.mxu0 %v40_v62  ;;  %v769_v29 = vld [vmem:[#allocation5 + $0x16c8] sm:$0xff]  ;;  %v340_v35 = vld [vmem:[#allocation5 + $0x960] sm:$0xff]  ;;  %v339_v37 = vld [vmem:[#allocation5 + $0x958] sm:$0xff] }
  0x3b   :  { %1213 = vmatpush1.msra.mxu1 %v456_v63  ;;  %1143 = vmatprep.subr.mxu0 %v444_v0  ;;  %v756_v36 = vld [vmem:[#allocation5 + $0x1660] sm:$0xff]  ;;  %v755_v38 = vld [vmem:[#allocation5 + $0x1658] sm:$0xff]  ;;  %v326_v43 = vld [vmem:[#allocation5 + $0x8f0] sm:$0xff] }
  0x3c   :  { %1214 = vmatprep.subr.mxu1 %v860_v1  ;;  %1144 = vmatpush2.msra.mxu0 %v443_v2  ;;  %v327_v39 = vld [vmem:[#allocation5 + $0x8f8] sm:$0xff]  ;;  %v742_v44 = vld [vmem:[#allocation5 + $0x15f0] sm:$0xff]  ;;  %v313_v48 = vld [vmem:[#allocation5 + $0x888] sm:$0xff] }
  0x3d   :  { %1215 = vmatpush2.msra.mxu1 %v859_v3  ;;  %1145 = vmatprep.subr.mxu0 %v431_v4  ;;  %v743_v40 = vld [vmem:[#allocation5 + $0x15f8] sm:$0xff]  ;;  %v314_v45 = vld [vmem:[#allocation5 + $0x890] sm:$0xff]  ;;  %v729_v49 = vld [vmem:[#allocation5 + $0x1588] sm:$0xff] }
  0x3e   :  { %1216 = vmatprep.subr.mxu1 %v847_v5  ;;  %1146 = vmatpush2.msra.mxu0 %v430_v6  ;;  %v730_v46 = vld [vmem:[#allocation5 + $0x1590] sm:$0xff]  ;;  %v301_v50 = vld [vmem:[#allocation5 + $0x828] sm:$0xff]  ;;  %v300_v53 = vld [vmem:[#allocation5 + $0x820] sm:$0xff] }
  0x3f   :  { %1217 = vmatpush2.msra.mxu1 %v846_v7  ;;  %1147 = vmatprep.subr.mxu0 %v418_v8  ;;  %v38_v47 = vld [vmem:[#allocation2] sm:$0xff]  ;;  %v717_v51 = vld [vmem:[#allocation5 + $0x1528] sm:$0xff]  ;;  %v716_v54 = vld [vmem:[#allocation5 + $0x1520] sm:$0xff] }
  0x40   :  { %1218 = vmatprep.subr.mxu1 %v834_v9  ;;  %1148 = vmatpush2.msra.mxu0 %v417_v10  ;;  %v1082_v55 = vcombine.high %v38_v47, %v38_v47  ;;  %v288_v56 = vld [vmem:[#allocation5 + $0x7c0] sm:$0xff]  ;;  %v287_v58 = vld [vmem:[#allocation5 + $0x7b8] sm:$0xff]  ;;  %v2927_v62 = vrot.slane %v38_v47, %v2924_v52  ;;  %v274_v63 = vld [vmem:[#allocation5 + $0x750] sm:$0xff] }
  0x41   :  { %1219 = vmatpush2.msra.mxu1 %v833_v11  ;;  %1149 = vmatprep.subr.mxu0 %v405_v12  ;;  %v704_v57 = vld [vmem:[#allocation5 + $0x14c0] sm:$0xff]  ;;  %v703_v59 = vld [vmem:[#allocation5 + $0x14b8] sm:$0xff]  ;;  %v690_v0 = vld [vmem:[#allocation5 + $0x1450] sm:$0xff] }
  0x42   :  { %1220 = vmatprep.subr.mxu1 %v821_v13  ;;  %1150 = vmatpush2.msra.mxu0 %v404_v14  ;;  %v275_v60 = vld [vmem:[#allocation5 + $0x758] sm:$0xff]  ;;  %v2930_v1 = vrot.slane %v1082_v55, %v2924_v52  ;;  %v262_v2 = vld [vmem:[#allocation5 + $0x6f0] sm:$0xff]  ;;  %v261_v4 = vld [vmem:[#allocation5 + $0x6e8] sm:$0xff]  ;;  %v2934_v8 = vcombine.high %v2927_v62, %v2927_v62 }
  0x43   :  { %1221 = vmatpush2.msra.mxu1 %v820_v15  ;;  %1151 = vmatprep.subr.mxu0 %v392_v16  ;;  %v691_v61 = vld [vmem:[#allocation5 + $0x1458] sm:$0xff]  ;;  %v678_v3 = vld [vmem:[#allocation5 + $0x13f0] sm:$0xff]  ;;  %v677_v5 = vld [vmem:[#allocation5 + $0x13e8] sm:$0xff] }
  0x44   :  { %1222 = vmatprep.subr.mxu1 %v808_v17  ;;  %1152 = vmatpush2.msra.mxu0 %v391_v18  ;;  %v249_v6 = vld [vmem:[#allocation5 + $0x688] sm:$0xff]  ;;  %v248_v9 = vld [vmem:[#allocation5 + $0x680] sm:$0xff]  ;;  %v2938_v10 = vcombine.high %v2930_v1, %v2930_v1  ;;  %v238_v13 = vld [vmem:[#allocation5 + $0x630] sm:$0xff] }
  0x45   :  { %1223 = vmatpush2.msra.mxu1 %v807_v19  ;;  %1153 = vmatprep.subr.mxu0 %v379_v20  ;;  %v665_v7 = vld [vmem:[#allocation5 + $0x1388] sm:$0xff]  ;;  %v664_v11 = vld [vmem:[#allocation5 + $0x1380] sm:$0xff]  ;;  %v1067_v14 = vld [vmem:[#allocation5 + $0x2018] sm:$0xff] }
  0x46   :  { %1224 = vmatprep.subr.mxu1 %v795_v21  ;;  %1154 = vmatpush2.msra.mxu0 %v378_v22  ;;  %v1068_v12 = vld [vmem:[#allocation5 + $0x2020] sm:$0xff]  ;;  %v237_v15 = vld [vmem:[#allocation5 + $0x628] sm:$0xff]  ;;  %v1055_v16 = vld [vmem:[#allocation5 + $0x1fb8] sm:$0xff] }
  0x47   :  { %1225 = vmatpush2.msra.mxu1 %v794_v23  ;;  %1155 = vmatprep.subr.mxu0 %v366_v24  ;;  %v225_v17 = vld [vmem:[#allocation5 + $0x5c8] sm:$0xff]  ;;  %v1054_v18 = vld [vmem:[#allocation5 + $0x1fb0] sm:$0xff]  ;;  %v224_v19 = vld [vmem:[#allocation5 + $0x5c0] sm:$0xff] }
  0x48   :  { %1226 = vmatprep.subr.mxu1 %v782_v25  ;;  %1156 = vmatpush2.msra.mxu0 %v365_v26  ;;  %v1042_v20 = vld [vmem:[#allocation5 + $0x1f50] sm:$0xff]  ;;  %v212_v21 = vld [vmem:[#allocation5 + $0x560] sm:$0xff]  ;;  %v1041_v22 = vld [vmem:[#allocation5 + $0x1f48] sm:$0xff] }
  0x49   :  { %1227 = vmatpush2.msra.mxu1 %v781_v27  ;;  %1157 = vmatprep.subr.mxu0 %v353_v28  ;;  %v211_v23 = vld [vmem:[#allocation5 + $0x558] sm:$0xff]  ;;  %v1029_v24 = vld [vmem:[#allocation5 + $0x1ee8] sm:$0xff]  ;;  %v1028_v26 = vld [vmem:[#allocation5 + $0x1ee0] sm:$0xff] }
  0x4a   :  { %1228 = vmatprep.subr.mxu1 %v769_v29  ;;  %1158 = vmatpush2.msra.mxu0 %v352_v33  ;;  %v199_v25 = vld [vmem:[#allocation5 + $0x4f8] sm:$0xff]  ;;  %v198_v27 = vld [vmem:[#allocation5 + $0x4f0] sm:$0xff]  ;;  %v1016_v28 = vld [vmem:[#allocation5 + $0x1e80] sm:$0xff] }
  0x4b   :  { %1229 = vmatpush2.msra.mxu1 %v768_v34  ;;  %1159 = vmatprep.subr.mxu0 %v340_v35  ;;  %v186_v29 = vld [vmem:[#allocation5 + $0x490] sm:$0xff]  ;;  %v1015_v30 = vld [vmem:[#allocation5 + $0x1e78] sm:$0xff]  ;;  %v185_v31 = vld [vmem:[#allocation5 + $0x488] sm:$0xff] }
  0x4c   :  { %1230 = vmatprep.subr.mxu1 %v756_v36  ;;  %1160 = vmatpush2.msra.mxu0 %v339_v37  ;;  %v1003_v32 = vld [vmem:[#allocation5 + $0x1e18] sm:$0xff]  ;;  %v173_v33 = vld [vmem:[#allocation5 + $0x428] sm:$0xff]  ;;  %v1002_v34 = vld [vmem:[#allocation5 + $0x1e10] sm:$0xff] }
  0x4d   :  { %1231 = vmatpush2.msra.mxu1 %v755_v38  ;;  %1161 = vmatprep.subr.mxu0 %v327_v39  ;;  %v172_v35 = vld [vmem:[#allocation5 + $0x420] sm:$0xff]  ;;  %v990_v36 = vld [vmem:[#allocation5 + $0x1db0] sm:$0xff]  ;;  %v989_v38 = vld [vmem:[#allocation5 + $0x1da8] sm:$0xff] }
  0x4e   :  { %1232 = vmatprep.subr.mxu1 %v743_v40  ;;  %1162 = vmatpush2.msra.mxu0 %v326_v43  ;;  %v160_v37 = vld [vmem:[#allocation5 + $0x3c0] sm:$0xff]  ;;  %v159_v39 = vld [vmem:[#allocation5 + $0x3b8] sm:$0xff]  ;;  %v977_v40 = vld [vmem:[#allocation5 + $0x1d48] sm:$0xff] }
  0x4f   :  { %1233 = vmatpush2.msra.mxu1 %v742_v44  ;;  %1163 = vmatprep.subr.mxu0 %v314_v45  ;;  %v147_v41 = vld [vmem:[#allocation5 + $0x358] sm:$0xff]  ;;  %v976_v42 = vld [vmem:[#allocation5 + $0x1d40] sm:$0xff]  ;;  %v146_v43 = vld [vmem:[#allocation5 + $0x350] sm:$0xff] }
  0x50   :  { %1234 = vmatprep.subr.mxu1 %v730_v46  ;;  %1164 = vmatpush2.msra.mxu0 %v313_v48  ;;  %v964_v44 = vld [vmem:[#allocation5 + $0x1ce0] sm:$0xff]  ;;  %v134_v45 = vld [vmem:[#allocation5 + $0x2f0] sm:$0xff]  ;;  %v963_v46 = vld [vmem:[#allocation5 + $0x1cd8] sm:$0xff] }
  0x51   :  { %1235 = vmatpush2.msra.mxu1 %v729_v49  ;;  %1165 = vmatprep.subr.mxu0 %v301_v50  ;;  %v133_v47 = vld [vmem:[#allocation5 + $0x2e8] sm:$0xff]  ;;  %v951_v48 = vld [vmem:[#allocation5 + $0x1c78] sm:$0xff]  ;;  %v950_v50 = vld [vmem:[#allocation5 + $0x1c70] sm:$0xff] }
  0x52   :  { %1236 = vmatprep.subr.mxu1 %v717_v51  ;;  %1166 = vmatpush2.msra.mxu0 %v300_v53  ;;  %v121_v49 = vld [vmem:[#allocation5 + $0x288] sm:$0xff]  ;;  %v120_v51 = vld [vmem:[#allocation5 + $0x280] sm:$0xff]  ;;  %v938_v53 = vld [vmem:[#allocation5 + $0x1c10] sm:$0xff] }
  0x53   :  { %1237 = vmatpush2.msra.mxu1 %v716_v54  ;;  %1167 = vmatprep.subr.mxu0 %v288_v56  ;;  %v108_v54 = vld [vmem:[#allocation5 + $0x220] sm:$0xff]  ;;  %v937_v55 = vld [vmem:[#allocation5 + $0x1c08] sm:$0xff]  ;;  %v107_v56 = vld [vmem:[#allocation5 + $0x218] sm:$0xff] }
  0x54   :  { %1238 = vmatprep.subr.mxu1 %v704_v57  ;;  %1168 = vmatpush2.msra.mxu0 %v287_v58  ;;  %v925_v57 = vld [vmem:[#allocation5 + $0x1ba8] sm:$0xff]  ;;  %v95_v58 = vld [vmem:[#allocation5 + $0x1b8] sm:$0xff] }
  0x55   :  { %1239 = vmatpush2.msra.mxu1 %v703_v59  ;;  %1169 = vmatprep.subr.mxu0 %v275_v60  ;;  %v924_v59 = vld [vmem:[#allocation5 + $0x1ba0] sm:$0xff]  ;;  %v94_v60 = vld [vmem:[#allocation5 + $0x1b0] sm:$0xff] }
  0x56   :  { %1240 = vmatprep.subr.mxu1 %v691_v61  ;;  %1170 = vmatpush2.msra.mxu0 %v274_v63  ;;  %v912_v61 = vld [vmem:[#allocation5 + $0x1b40] sm:$0xff]  ;;  %v82_v63 = vld [vmem:[#allocation5 + $0x150] sm:$0xff] }
  0x57   :  { %1241 = vmatpush2.msra.mxu1 %v690_v0  ;;  %1171 = vmatprep.subr.mxu0 %v262_v2  ;;  %v911_v0 = vld [vmem:[#allocation5 + $0x1b38] sm:$0xff]  ;;  %v81_v2 = vld [vmem:[#allocation5 + $0x148] sm:$0xff] }
  0x58   :  { %1242 = vmatprep.subr.mxu1 %v678_v3  ;;  %1172 = vmatpush2.msra.mxu0 %v261_v4  ;;  %v899_v3 = vld [vmem:[#allocation5 + $0x1ad8] sm:$0xff]  ;;  %v69_v4 = vld [vmem:[#allocation5 + $0xe8] sm:$0xff] }
  0x59   :  { %1243 = vmatpush2.msra.mxu1 %v677_v5  ;;  %1173 = vmatprep.subr.mxu0 %v249_v6  ;;  %v898_v5 = vld [vmem:[#allocation5 + $0x1ad0] sm:$0xff]  ;;  %v68_v6 = vld [vmem:[#allocation5 + $0xe0] sm:$0xff] }
  0x5a   :  { %1244 = vmatprep.subr.mxu1 %v665_v7  ;;  %1174 = vmatpush2.msra.mxu0 %v248_v9  ;;  %v886_v7 = vld [vmem:[#allocation5 + $0x1a70] sm:$0xff]  ;;  %v56_v9 = vld [vmem:[#allocation5 + $0x80] sm:$0xff] }
  0x5b   :  { %1175 = vmatprep.mubr.f32.mxu0 %v2934_v8  ;;  %1245 = vmatpush2.msra.mxu1 %v664_v11  ;;  %v885_v11 = vld [vmem:[#allocation5 + $0x1a68] sm:$0xff] }
  0x5c   :  { %1246 = vmatprep.mubr.f32.mxu1 %v2938_v10  ;;  %1176 = vmatmul.mubr.f32.vlgmr.msra.gmra.mxu0 %v2927_v62 }
  0x5d   :  { %1247 = vmatmul.mubr.f32.vlgmr.msra.gmra.mxu1 %v2930_v1  ;;  %1253 = vmatprep.subr.mxu0 %v1068_v12  ;;  %v55_v12 = vld [vmem:[#allocation5 + $0x78] sm:$0xff] }
  0x5e   :  { %1324 = vmatprep.subr.mxu1 %v238_v13  ;;  %1254 = vmatpush1.msra.mxu0 %v1067_v14  ;;  %v873_v13 = vld [vmem:[#allocation5 + $0x1a08] sm:$0xff]  ;;  %v43_v14 = vld [vmem:[#allocation5 + $0x18] sm:$0xff] }
  0x5f   :  { %1325 = vmatpush1.msra.mxu1 %v237_v15  ;;  %1255 = vmatprep.subr.mxu0 %v1055_v16  ;;  %v872_v15 = vld [vmem:[#allocation5 + $0x1a00] sm:$0xff]  ;;  %v42_v16 = vld [vmem:[#allocation5 + $0x10] sm:$0xff] }
  0x60   :  { %1326 = vmatprep.subr.mxu1 %v225_v17  ;;  %1256 = vmatpush1.msra.mxu0 %v1054_v18  ;;  %v2944_v17 = vld.sshfl [vmem:[#allocation2 + $0x8] sm:$0x3 pattern:$0x76325410]  ;;  %v446_v18 = vld [vmem:[#allocation5 + $0xcb0] sm:$0xff] }
  0x61   :  { %1327 = vmatpush1.msra.mxu1 %v224_v19  ;;  %1257 = vmatprep.subr.mxu0 %v1042_v20  ;;  %v654_v19 = vld [vmem:[#allocation5 + $0x1330] sm:$0xff]  ;;  %v2900_v20 = vmov 0.0  }
  0x62   :  { %1328 = vmatprep.subr.mxu1 %v212_v21  ;;  %1258 = vmatpush1.msra.mxu0 %v1041_v22  ;;  %v445_v21 = vld [vmem:[#allocation5 + $0xca8] sm:$0xff] }
  0x63   :  { %1329 = vmatpush1.msra.mxu1 %v211_v23  ;;  %1259 = vmatprep.subr.mxu0 %v1029_v24  ;;  %v653_v22 = vld [vmem:[#allocation5 + $0x1328] sm:$0xff] }
  0x64   :  { %1330 = vmatprep.subr.mxu1 %v199_v25  ;;  %1260 = vmatpush1.msra.mxu0 %v1028_v26  ;;  %v433_v23 = vld [vmem:[#allocation5 + $0xc48] sm:$0xff]  ;;  %v432_v25 = vld [vmem:[#allocation5 + $0xc40] sm:$0xff] }
  0x65   :  { %1331 = vmatpush1.msra.mxu1 %v198_v27  ;;  %1261 = vmatprep.subr.mxu0 %v1016_v28  ;;  %v641_v24 = vld [vmem:[#allocation5 + $0x12c8] sm:$0xff]  ;;  %v640_v26 = vld [vmem:[#allocation5 + $0x12c0] sm:$0xff] }
  0x66   :  { %1332 = vmatprep.subr.mxu1 %v186_v29  ;;  %1262 = vmatpush1.msra.mxu0 %v1015_v30  ;;  %v420_v27 = vld [vmem:[#allocation5 + $0xbe0] sm:$0xff]  ;;  %v419_v29 = vld [vmem:[#allocation5 + $0xbd8] sm:$0xff] }
  0x67   :  { %1333 = vmatpush1.msra.mxu1 %v185_v31  ;;  %1263 = vmatprep.subr.mxu0 %v1003_v32  ;;  %v628_v28 = vld [vmem:[#allocation5 + $0x1260] sm:$0xff]  ;;  %v627_v30 = vld [vmem:[#allocation5 + $0x1258] sm:$0xff] }
  0x68   :  { %1334 = vmatprep.subr.mxu1 %v173_v33  ;;  %1264 = vmatpush1.msra.mxu0 %v1002_v34  ;;  %v407_v31 = vld [vmem:[#allocation5 + $0xb78] sm:$0xff]  ;;  %v406_v33 = vld [vmem:[#allocation5 + $0xb70] sm:$0xff] }
  0x69   :  { %1335 = vmatpush1.msra.mxu1 %v172_v35  ;;  %1265 = vmatprep.subr.mxu0 %v990_v36  ;;  %v615_v32 = vld [vmem:[#allocation5 + $0x11f8] sm:$0xff]  ;;  %v614_v34 = vld [vmem:[#allocation5 + $0x11f0] sm:$0xff] }
  0x6a   :  { %1336 = vmatprep.subr.mxu1 %v160_v37  ;;  %1266 = vmatpush1.msra.mxu0 %v989_v38  ;;  %v394_v35 = vld [vmem:[#allocation5 + $0xb10] sm:$0xff]  ;;  %v393_v37 = vld [vmem:[#allocation5 + $0xb08] sm:$0xff] }
  0x6b   :  { %1337 = vmatpush1.msra.mxu1 %v159_v39  ;;  %1267 = vmatprep.subr.mxu0 %v977_v40  ;;  %v602_v36 = vld [vmem:[#allocation5 + $0x1190] sm:$0xff]  ;;  %v601_v38 = vld [vmem:[#allocation5 + $0x1188] sm:$0xff] }
  0x6c   :  { %1338 = vmatprep.subr.mxu1 %v147_v41  ;;  %1268 = vmatpush1.msra.mxu0 %v976_v42  ;;  %v381_v39 = vld [vmem:[#allocation5 + $0xaa8] sm:$0xff]  ;;  %v380_v41 = vld [vmem:[#allocation5 + $0xaa0] sm:$0xff] }
  0x6d   :  { %1339 = vmatpush1.msra.mxu1 %v146_v43  ;;  %1269 = vmatprep.subr.mxu0 %v964_v44  ;;  %v589_v40 = vld [vmem:[#allocation5 + $0x1128] sm:$0xff]  ;;  %v588_v42 = vld [vmem:[#allocation5 + $0x1120] sm:$0xff] }
  0x6e   :  { %1340 = vmatprep.subr.mxu1 %v134_v45  ;;  %1270 = vmatpush1.msra.mxu0 %v963_v46  ;;  %v368_v43 = vld [vmem:[#allocation5 + $0xa40] sm:$0xff]  ;;  %v367_v45 = vld [vmem:[#allocation5 + $0xa38] sm:$0xff] }
  0x6f   :  { %1341 = vmatpush1.msra.mxu1 %v133_v47  ;;  %1271 = vmatprep.subr.mxu0 %v951_v48  ;;  %v576_v44 = vld [vmem:[#allocation5 + $0x10c0] sm:$0xff]  ;;  %v575_v46 = vld [vmem:[#allocation5 + $0x10b8] sm:$0xff] }
  0x70   :  { %1342 = vmatprep.subr.mxu1 %v121_v49  ;;  %1272 = vmatpush1.msra.mxu0 %v950_v50  ;;  %v355_v47 = vld [vmem:[#allocation5 + $0x9d8] sm:$0xff]  ;;  %v354_v49 = vld [vmem:[#allocation5 + $0x9d0] sm:$0xff] }
  0x71   :  { %1343 = vmatpush1.msra.mxu1 %v120_v51  ;;  %1273 = vmatprep.subr.mxu0 %v938_v53  ;;  %v563_v48 = vld [vmem:[#allocation5 + $0x1058] sm:$0xff]  ;;  %v562_v50 = vld [vmem:[#allocation5 + $0x1050] sm:$0xff] }
  0x72   :  { %1344 = vmatprep.subr.mxu1 %v108_v54  ;;  %1274 = vmatpush1.msra.mxu0 %v937_v55  ;;  %v342_v51 = vld [vmem:[#allocation5 + $0x970] sm:$0xff]  ;;  %v341_v54 = vld [vmem:[#allocation5 + $0x968] sm:$0xff] }
  0x73   :  { %1345 = vmatpush1.msra.mxu1 %v107_v56  ;;  %1275 = vmatprep.subr.mxu0 %v925_v57  ;;  %v550_v53 = vld [vmem:[#allocation5 + $0xff0] sm:$0xff]  ;;  %v549_v55 = vld [vmem:[#allocation5 + $0xfe8] sm:$0xff] }
  0x74   :  { %1346 = vmatprep.subr.mxu1 %v95_v58  ;;  %1276 = vmatpush1.msra.mxu0 %v924_v59  ;;  %v329_v56 = vld [vmem:[#allocation5 + $0x908] sm:$0xff]  ;;  %v328_v58 = vld [vmem:[#allocation5 + $0x900] sm:$0xff] }
  0x75   :  { %1347 = vmatpush1.msra.mxu1 %v94_v60  ;;  %1277 = vmatprep.subr.mxu0 %v912_v61  ;;  %v537_v57 = vld [vmem:[#allocation5 + $0xf88] sm:$0xff]  ;;  %v536_v59 = vld [vmem:[#allocation5 + $0xf80] sm:$0xff] }
  0x76   :  { %1348 = vmatprep.subr.mxu1 %v82_v63  ;;  %1278 = vmatpush1.msra.mxu0 %v911_v0  ;;  %v316_v60 = vld [vmem:[#allocation5 + $0x8a0] sm:$0xff]  ;;  %v315_v63 = vld [vmem:[#allocation5 + $0x898] sm:$0xff] }
  0x77   :  { %1349 = vmatpush1.msra.mxu1 %v81_v2  ;;  %1279 = vmatprep.subr.mxu0 %v899_v3  ;;  %v524_v61 = vld [vmem:[#allocation5 + $0xf20] sm:$0xff]  ;;  %v523_v0 = vld [vmem:[#allocation5 + $0xf18] sm:$0xff] }
  0x78   :  { %1350 = vmatprep.subr.mxu1 %v69_v4  ;;  %1280 = vmatpush1.msra.mxu0 %v898_v5  ;;  %v303_v2 = vld [vmem:[#allocation5 + $0x838] sm:$0xff]  ;;  %v302_v4 = vld [vmem:[#allocation5 + $0x830] sm:$0xff] }
  0x79   :  { %1351 = vmatpush1.msra.mxu1 %v68_v6  ;;  %1281 = vmatprep.subr.mxu0 %v886_v7  ;;  %v511_v3 = vld [vmem:[#allocation5 + $0xeb8] sm:$0xff]  ;;  %v510_v5 = vld [vmem:[#allocation5 + $0xeb0] sm:$0xff] }
  0x7a   :  { %1352 = vmatprep.subr.mxu1 %v56_v9  ;;  %1282 = vmatpush1.msra.mxu0 %v885_v11  ;;  %v290_v6 = vld [vmem:[#allocation5 + $0x7d0] sm:$0xff]  ;;  %v289_v9 = vld [vmem:[#allocation5 + $0x7c8] sm:$0xff] }
  0x7b   :  { %1353 = vmatpush1.msra.mxu1 %v55_v12  ;;  %1283 = vmatprep.subr.mxu0 %v873_v13  ;;  %v498_v7 = vld [vmem:[#allocation5 + $0xe50] sm:$0xff]  ;;  %v497_v11 = vld [vmem:[#allocation5 + $0xe48] sm:$0xff] }
  0x7c   :  { %1354 = vmatprep.subr.mxu1 %v43_v14  ;;  %1284 = vmatpush1.msra.mxu0 %v872_v15  ;;  %v277_v12 = vld [vmem:[#allocation5 + $0x768] sm:$0xff]  ;;  %v276_v14 = vld [vmem:[#allocation5 + $0x760] sm:$0xff] }
  0x7d   :  { %1317 = vmatprep.mubr.f32.mxu0 %v2900_v20  ;;  %1355 = vmatpush1.msra.mxu1 %v42_v16  ;;  %v485_v13 = vld [vmem:[#allocation5 + $0xde8] sm:$0xff]  ;;  %v484_v15 = vld [vmem:[#allocation5 + $0xde0] sm:$0xff] }
  0x7e   :  { %1318 = vmatmul.mubr.f32.vlgmr.msra.gmra.mxu0 %v2944_v17  ;;  %1356 = vmatprep.subr.mxu1 %v446_v18  ;;  %v264_v16 = vld [vmem:[#allocation5 + $0x700] sm:$0xff] }
  0x7f   :  { %1395 = vmatprep.subr.mxu0 %v654_v19  ;;  %1357 = vmatpush2.msra.mxu1 %v445_v21  ;;  %v472_v18 = vld [vmem:[#allocation5 + $0xd80] sm:$0xff]  ;;  %v263_v19 = vld [vmem:[#allocation5 + $0x6f8] sm:$0xff] }
  0x80   :  { %1396 = vmatpush1.msra.mxu0 %v653_v22  ;;  %1358 = vmatprep.subr.mxu1 %v433_v23  ;;  %v471_v21 = vld [vmem:[#allocation5 + $0xd78] sm:$0xff] }
  0x81   :  { %1397 = vmatprep.subr.mxu0 %v641_v24  ;;  %1359 = vmatpush2.msra.mxu1 %v432_v25  ;;  %v251_v22 = vld [vmem:[#allocation5 + $0x698] sm:$0xff]  ;;  %v250_v24 = vld [vmem:[#allocation5 + $0x690] sm:$0xff] }
  0x82   :  { %1398 = vmatpush1.msra.mxu0 %v640_v26  ;;  %1360 = vmatprep.subr.mxu1 %v420_v27  ;;  %v459_v23 = vld [vmem:[#allocation5 + $0xd18] sm:$0xff]  ;;  %v458_v25 = vld [vmem:[#allocation5 + $0xd10] sm:$0xff] }
  0x83   :  { %1399 = vmatprep.subr.mxu0 %v628_v28  ;;  %1361 = vmatpush2.msra.mxu1 %v419_v29  ;;  %v862_v26 = vld [vmem:[#allocation5 + $0x19b0] sm:$0xff]  ;;  %v861_v28 = vld [vmem:[#allocation5 + $0x19a8] sm:$0xff] }
  0x84   :  { %1400 = vmatpush1.msra.mxu0 %v627_v30  ;;  %1362 = vmatprep.subr.mxu1 %v407_v31  ;;  %v1070_v27 = vld [vmem:[#allocation5 + $0x2030] sm:$0xff]  ;;  %v1069_v29 = vld [vmem:[#allocation5 + $0x2028] sm:$0xff] }
  0x85   :  { %1401 = vmatprep.subr.mxu0 %v615_v32  ;;  %1363 = vmatpush2.msra.mxu1 %v406_v33  ;;  %v849_v30 = vld [vmem:[#allocation5 + $0x1948] sm:$0xff]  ;;  %v848_v32 = vld [vmem:[#allocation5 + $0x1940] sm:$0xff] }
  0x86   :  { %1402 = vmatpush1.msra.mxu0 %v614_v34  ;;  %1364 = vmatprep.subr.mxu1 %v394_v35  ;;  %v1057_v31 = vld [vmem:[#allocation5 + $0x1fc8] sm:$0xff]  ;;  %v1056_v33 = vld [vmem:[#allocation5 + $0x1fc0] sm:$0xff] }
  0x87   :  { %1403 = vmatprep.subr.mxu0 %v602_v36  ;;  %1365 = vmatpush2.msra.mxu1 %v393_v37  ;;  %v836_v34 = vld [vmem:[#allocation5 + $0x18e0] sm:$0xff]  ;;  %v835_v36 = vld [vmem:[#allocation5 + $0x18d8] sm:$0xff] }
  0x88   :  { %1404 = vmatpush1.msra.mxu0 %v601_v38  ;;  %1366 = vmatprep.subr.mxu1 %v381_v39  ;;  %v1044_v35 = vld [vmem:[#allocation5 + $0x1f60] sm:$0xff]  ;;  %v1043_v37 = vld [vmem:[#allocation5 + $0x1f58] sm:$0xff] }
  0x89   :  { %1405 = vmatprep.subr.mxu0 %v589_v40  ;;  %1367 = vmatpush2.msra.mxu1 %v380_v41  ;;  %v823_v38 = vld [vmem:[#allocation5 + $0x1878] sm:$0xff]  ;;  %v822_v40 = vld [vmem:[#allocation5 + $0x1870] sm:$0xff] }
  0x8a   :  { %1406 = vmatpush1.msra.mxu0 %v588_v42  ;;  %1368 = vmatprep.subr.mxu1 %v368_v43  ;;  %v1031_v39 = vld [vmem:[#allocation5 + $0x1ef8] sm:$0xff]  ;;  %v1030_v41 = vld [vmem:[#allocation5 + $0x1ef0] sm:$0xff] }
  0x8b   :  { %1407 = vmatprep.subr.mxu0 %v576_v44  ;;  %1369 = vmatpush2.msra.mxu1 %v367_v45  ;;  %v810_v42 = vld [vmem:[#allocation5 + $0x1810] sm:$0xff]  ;;  %v809_v44 = vld [vmem:[#allocation5 + $0x1808] sm:$0xff] }
  0x8c   :  { %1408 = vmatpush1.msra.mxu0 %v575_v46  ;;  %1370 = vmatprep.subr.mxu1 %v355_v47  ;;  %v1018_v43 = vld [vmem:[#allocation5 + $0x1e90] sm:$0xff]  ;;  %v1017_v45 = vld [vmem:[#allocation5 + $0x1e88] sm:$0xff] }
  0x8d   :  { %1409 = vmatprep.subr.mxu0 %v563_v48  ;;  %1371 = vmatpush2.msra.mxu1 %v354_v49  ;;  %v797_v46 = vld [vmem:[#allocation5 + $0x17a8] sm:$0xff]  ;;  %v796_v48 = vld [vmem:[#allocation5 + $0x17a0] sm:$0xff] }
  0x8e   :  { %1410 = vmatpush1.msra.mxu0 %v562_v50  ;;  %1372 = vmatprep.subr.mxu1 %v342_v51  ;;  %v1005_v47 = vld [vmem:[#allocation5 + $0x1e28] sm:$0xff]  ;;  %v1004_v49 = vld [vmem:[#allocation5 + $0x1e20] sm:$0xff] }
  0x8f   :  { %1411 = vmatprep.subr.mxu0 %v550_v53  ;;  %1373 = vmatpush2.msra.mxu1 %v341_v54  ;;  %v784_v50 = vld [vmem:[#allocation5 + $0x1740] sm:$0xff]  ;;  %v783_v53 = vld [vmem:[#allocation5 + $0x1738] sm:$0xff] }
  0x90   :  { %1412 = vmatpush1.msra.mxu0 %v549_v55  ;;  %1374 = vmatprep.subr.mxu1 %v329_v56  ;;  %v992_v51 = vld [vmem:[#allocation5 + $0x1dc0] sm:$0xff]  ;;  %v991_v54 = vld [vmem:[#allocation5 + $0x1db8] sm:$0xff] }
  0x91   :  { %1413 = vmatprep.subr.mxu0 %v537_v57  ;;  %1375 = vmatpush2.msra.mxu1 %v328_v58  ;;  %v771_v55 = vld [vmem:[#allocation5 + $0x16d8] sm:$0xff]  ;;  %v770_v57 = vld [vmem:[#allocation5 + $0x16d0] sm:$0xff] }
  0x92   :  { %1414 = vmatpush1.msra.mxu0 %v536_v59  ;;  %1376 = vmatprep.subr.mxu1 %v316_v60  ;;  %v979_v56 = vld [vmem:[#allocation5 + $0x1d58] sm:$0xff]  ;;  %v978_v58 = vld [vmem:[#allocation5 + $0x1d50] sm:$0xff] }
  0x93   :  { %1415 = vmatprep.subr.mxu0 %v524_v61  ;;  %1377 = vmatpush2.msra.mxu1 %v315_v63  ;;  %v758_v59 = vld [vmem:[#allocation5 + $0x1670] sm:$0xff]  ;;  %v757_v61 = vld [vmem:[#allocation5 + $0x1668] sm:$0xff] }
  0x94   :  { %1416 = vmatpush1.msra.mxu0 %v523_v0  ;;  %1378 = vmatprep.subr.mxu1 %v303_v2  ;;  %v966_v60 = vld [vmem:[#allocation5 + $0x1cf0] sm:$0xff]  ;;  %v965_v63 = vld [vmem:[#allocation5 + $0x1ce8] sm:$0xff] }
  0x95   :  { %1417 = vmatprep.subr.mxu0 %v511_v3  ;;  %1379 = vmatpush2.msra.mxu1 %v302_v4  ;;  %v745_v0 = vld [vmem:[#allocation5 + $0x1608] sm:$0xff]  ;;  %v744_v3 = vld [vmem:[#allocation5 + $0x1600] sm:$0xff] }
  0x96   :  { %1418 = vmatpush1.msra.mxu0 %v510_v5  ;;  %1380 = vmatprep.subr.mxu1 %v290_v6  ;;  %v953_v2 = vld [vmem:[#allocation5 + $0x1c88] sm:$0xff]  ;;  %v952_v4 = vld [vmem:[#allocation5 + $0x1c80] sm:$0xff] }
  0x97   :  { %1419 = vmatprep.subr.mxu0 %v498_v7  ;;  %1381 = vmatpush2.msra.mxu1 %v289_v9  ;;  %v732_v5 = vld [vmem:[#allocation5 + $0x15a0] sm:$0xff]  ;;  %v731_v7 = vld [vmem:[#allocation5 + $0x1598] sm:$0xff] }
  0x98   :  { %1420 = vmatpush1.msra.mxu0 %v497_v11  ;;  %1382 = vmatprep.subr.mxu1 %v277_v12  ;;  %v940_v6 = vld [vmem:[#allocation5 + $0x1c20] sm:$0xff]  ;;  %v939_v9 = vld [vmem:[#allocation5 + $0x1c18] sm:$0xff] }
  0x99   :  { %1421 = vmatprep.subr.mxu0 %v485_v13  ;;  %1383 = vmatpush2.msra.mxu1 %v276_v14  ;;  %v719_v11 = vld [vmem:[#allocation5 + $0x1538] sm:$0xff]  ;;  %v718_v13 = vld [vmem:[#allocation5 + $0x1530] sm:$0xff] }
  0x9a   :  { %1422 = vmatpush1.msra.mxu0 %v484_v15  ;;  %1384 = vmatprep.subr.mxu1 %v264_v16  ;;  %v927_v12 = vld [vmem:[#allocation5 + $0x1bb8] sm:$0xff]  ;;  %v926_v14 = vld [vmem:[#allocation5 + $0x1bb0] sm:$0xff] }
  0x9b   :  { %1423 = vmatprep.subr.mxu0 %v472_v18  ;;  %1385 = vmatpush2.msra.mxu1 %v263_v19  ;;  %v706_v15 = vld [vmem:[#allocation5 + $0x14d0] sm:$0xff]  ;;  %v705_v18 = vld [vmem:[#allocation5 + $0x14c8] sm:$0xff] }
  0x9c   :  { %1424 = vmatpush1.msra.mxu0 %v471_v21  ;;  %1386 = vmatprep.subr.mxu1 %v251_v22  ;;  %v914_v16 = vld [vmem:[#allocation5 + $0x1b50] sm:$0xff]  ;;  %v913_v19 = vld [vmem:[#allocation5 + $0x1b48] sm:$0xff] }
  0x9d   :  { %1425 = vmatprep.subr.mxu0 %v459_v23  ;;  %1387 = vmatpush2.msra.mxu1 %v250_v24  ;;  %v693_v21 = vld [vmem:[#allocation5 + $0x1468] sm:$0xff]  ;;  %v692_v23 = vld [vmem:[#allocation5 + $0x1460] sm:$0xff] }
  0x9e   :  { %1426 = vmatpush1.msra.mxu0 %v458_v25  ;;  %1388 = vmatprep.mubr.f32.mxu1 %v2934_v8  ;;  %v901_v22 = vld [vmem:[#allocation5 + $0x1ae8] sm:$0xff]  ;;  %v900_v24 = vld [vmem:[#allocation5 + $0x1ae0] sm:$0xff] }
  0x9f   :  { %1427 = vmatprep.subr.mxu0 %v862_v26  ;;  %1466 = vmatprep.subr.mxu1 %v1070_v27  ;;  %v680_v25 = vld [vmem:[#allocation5 + $0x1400] sm:$0xff]  ;;  %v679_v27 = vld [vmem:[#allocation5 + $0x13f8] sm:$0xff] }
  0xa0   :  { %1389 = vmatmul.mubr.f32.vlgmr.msra.gmra.mxu1 %v2927_v62  ;;  %1428 = vmatpush2.msra.mxu0 %v861_v28  ;;  %v888_v26 = vld [vmem:[#allocation5 + $0x1a80] sm:$0xff]  ;;  %v887_v28 = vld [vmem:[#allocation5 + $0x1a78] sm:$0xff] }
  0xa1   :  { %1467 = vmatpush1.msra.mxu1 %v1069_v29  ;;  %1429 = vmatprep.subr.mxu0 %v849_v30  ;;  %v667_v29 = vld [vmem:[#allocation5 + $0x1398] sm:$0xff] }
  0xa2   :  { %1468 = vmatprep.subr.mxu1 %v1057_v31  ;;  %1430 = vmatpush2.msra.mxu0 %v848_v32  ;;  %v875_v30 = vld [vmem:[#allocation5 + $0x1a18] sm:$0xff]  ;;  %v666_v31 = vld [vmem:[#allocation5 + $0x1390] sm:$0xff] }
  0xa3   :  { %1469 = vmatpush1.msra.mxu1 %v1056_v33  ;;  %1431 = vmatprep.subr.mxu0 %v836_v34  ;;  %v874_v32 = vld [vmem:[#allocation5 + $0x1a10] sm:$0xff]  ;;  %v240_v33 = vld [vmem:[#allocation5 + $0x640] sm:$0xff] }
  0xa4   :  { %1470 = vmatprep.subr.mxu1 %v1044_v35  ;;  %1432 = vmatpush2.msra.mxu0 %v835_v36  ;;  %v656_v34 = vld [vmem:[#allocation5 + $0x1340] sm:$0xff]  ;;  %v239_v35 = vld [vmem:[#allocation5 + $0x638] sm:$0xff] }
  0xa5   :  { %1471 = vmatpush1.msra.mxu1 %v1043_v37  ;;  %1433 = vmatprep.subr.mxu0 %v823_v38  ;;  %v655_v36 = vld [vmem:[#allocation5 + $0x1338] sm:$0xff] }
  0xa6   :  { %1472 = vmatprep.subr.mxu1 %v1031_v39  ;;  %1434 = vmatpush2.msra.mxu0 %v822_v40  ;;  %v227_v37 = vld [vmem:[#allocation5 + $0x5d8] sm:$0xff]  ;;  %v226_v39 = vld [vmem:[#allocation5 + $0x5d0] sm:$0xff] }
  0xa7   :  { %1473 = vmatpush1.msra.mxu1 %v1030_v41  ;;  %1435 = vmatprep.subr.mxu0 %v810_v42  ;;  %v643_v38 = vld [vmem:[#allocation5 + $0x12d8] sm:$0xff]  ;;  %v642_v40 = vld [vmem:[#allocation5 + $0x12d0] sm:$0xff] }
  0xa8   :  { %1474 = vmatprep.subr.mxu1 %v1018_v43  ;;  %1436 = vmatpush2.msra.mxu0 %v809_v44  ;;  %v214_v41 = vld [vmem:[#allocation5 + $0x570] sm:$0xff]  ;;  %v213_v43 = vld [vmem:[#allocation5 + $0x568] sm:$0xff] }
  0xa9   :  { %1475 = vmatpush1.msra.mxu1 %v1017_v45  ;;  %1437 = vmatprep.subr.mxu0 %v797_v46  ;;  %v630_v42 = vld [vmem:[#allocation5 + $0x1270] sm:$0xff]  ;;  %v629_v44 = vld [vmem:[#allocation5 + $0x1268] sm:$0xff] }
  0xaa   :  { %1476 = vmatprep.subr.mxu1 %v1005_v47  ;;  %1438 = vmatpush2.msra.mxu0 %v796_v48  ;;  %v201_v45 = vld [vmem:[#allocation5 + $0x508] sm:$0xff]  ;;  %v200_v47 = vld [vmem:[#allocation5 + $0x500] sm:$0xff] }
  0xab   :  { %1477 = vmatpush1.msra.mxu1 %v1004_v49  ;;  %1439 = vmatprep.subr.mxu0 %v784_v50  ;;  %v617_v46 = vld [vmem:[#allocation5 + $0x1208] sm:$0xff]  ;;  %v616_v48 = vld [vmem:[#allocation5 + $0x1200] sm:$0xff]  ;;  %v187_v50 = vld [vmem:[#allocation5 + $0x498] sm:$0xff] }
  0xac   :  { %1478 = vmatprep.subr.mxu1 %v992_v51  ;;  %1440 = vmatpush2.msra.mxu0 %v783_v53  ;;  %v604_v49 = vld [vmem:[#allocation5 + $0x11a0] sm:$0xff]  ;;  %v603_v51 = vld [vmem:[#allocation5 + $0x1198] sm:$0xff] }
  0xad   :  { %1479 = vmatpush1.msra.mxu1 %v991_v54  ;;  %1441 = vmatprep.subr.mxu0 %v771_v55  ;;  %v175_v53 = vld [vmem:[#allocation5 + $0x438] sm:$0xff]  ;;  %v174_v55 = vld [vmem:[#allocation5 + $0x430] sm:$0xff] }
  0xae   :  { %1480 = vmatprep.subr.mxu1 %v979_v56  ;;  %1442 = vmatpush2.msra.mxu0 %v770_v57  ;;  %v591_v54 = vld [vmem:[#allocation5 + $0x1138] sm:$0xff]  ;;  %v590_v56 = vld [vmem:[#allocation5 + $0x1130] sm:$0xff] }
  0xaf   :  { %1481 = vmatpush1.msra.mxu1 %v978_v58  ;;  %1443 = vmatprep.subr.mxu0 %v758_v59  ;;  %v162_v57 = vld [vmem:[#allocation5 + $0x3d0] sm:$0xff]  ;;  %v161_v59 = vld [vmem:[#allocation5 + $0x3c8] sm:$0xff] }
  0xb0   :  { %1482 = vmatprep.subr.mxu1 %v966_v60  ;;  %1444 = vmatpush2.msra.mxu0 %v757_v61  ;;  %v578_v58 = vld [vmem:[#allocation5 + $0x10d0] sm:$0xff]  ;;  %v577_v60 = vld [vmem:[#allocation5 + $0x10c8] sm:$0xff] }
  0xb1   :  { %1483 = vmatpush1.msra.mxu1 %v965_v63  ;;  %1445 = vmatprep.subr.mxu0 %v745_v0  ;;  %v149_v61 = vld [vmem:[#allocation5 + $0x368] sm:$0xff]  ;;  %v148_v0 = vld [vmem:[#allocation5 + $0x360] sm:$0xff] }
  0xb2   :  { %1484 = vmatprep.subr.mxu1 %v953_v2  ;;  %1446 = vmatpush2.msra.mxu0 %v744_v3  ;;  %v565_v63 = vld [vmem:[#allocation5 + $0x1068] sm:$0xff]  ;;  %v564_v2 = vld [vmem:[#allocation5 + $0x1060] sm:$0xff] }
  0xb3   :  { %1485 = vmatpush1.msra.mxu1 %v952_v4  ;;  %1447 = vmatprep.subr.mxu0 %v732_v5  ;;  %v136_v3 = vld [vmem:[#allocation5 + $0x300] sm:$0xff]  ;;  %v135_v5 = vld [vmem:[#allocation5 + $0x2f8] sm:$0xff] }
  0xb4   :  { %1486 = vmatprep.subr.mxu1 %v940_v6  ;;  %1448 = vmatpush2.msra.mxu0 %v731_v7  ;;  %v552_v4 = vld [vmem:[#allocation5 + $0x1000] sm:$0xff]  ;;  %v551_v6 = vld [vmem:[#allocation5 + $0xff8] sm:$0xff] }
  0xb5   :  { %1487 = vmatpush1.msra.mxu1 %v939_v9  ;;  %1449 = vmatprep.subr.mxu0 %v719_v11  ;;  %v123_v7 = vld [vmem:[#allocation5 + $0x298] sm:$0xff]  ;;  %v122_v11 = vld [vmem:[#allocation5 + $0x290] sm:$0xff] }
  0xb6   :  { %1488 = vmatprep.subr.mxu1 %v927_v12  ;;  %1450 = vmatpush2.msra.mxu0 %v718_v13  ;;  %v539_v9 = vld [vmem:[#allocation5 + $0xf98] sm:$0xff]  ;;  %v538_v12 = vld [vmem:[#allocation5 + $0xf90] sm:$0xff] }
  0xb7   :  { %1489 = vmatpush1.msra.mxu1 %v926_v14  ;;  %1451 = vmatprep.subr.mxu0 %v706_v15  ;;  %v110_v13 = vld [vmem:[#allocation5 + $0x230] sm:$0xff]  ;;  %v109_v15 = vld [vmem:[#allocation5 + $0x228] sm:$0xff] }
  0xb8   :  { %1490 = vmatprep.subr.mxu1 %v914_v16  ;;  %1452 = vmatpush2.msra.mxu0 %v705_v18  ;;  %v526_v14 = vld [vmem:[#allocation5 + $0xf30] sm:$0xff]  ;;  %v525_v16 = vld [vmem:[#allocation5 + $0xf28] sm:$0xff] }
  0xb9   :  { %1491 = vmatpush1.msra.mxu1 %v913_v19  ;;  %1453 = vmatprep.subr.mxu0 %v693_v21  ;;  %v97_v18 = vld [vmem:[#allocation5 + $0x1c8] sm:$0xff]  ;;  %v96_v21 = vld [vmem:[#allocation5 + $0x1c0] sm:$0xff] }
  0xba   :  { %1492 = vmatprep.subr.mxu1 %v901_v22  ;;  %1454 = vmatpush2.msra.mxu0 %v692_v23  ;;  %v513_v19 = vld [vmem:[#allocation5 + $0xec8] sm:$0xff]  ;;  %v512_v22 = vld [vmem:[#allocation5 + $0xec0] sm:$0xff] }
  0xbb   :  { %1493 = vmatpush1.msra.mxu1 %v900_v24  ;;  %1455 = vmatprep.subr.mxu0 %v680_v25  ;;  %v84_v23 = vld [vmem:[#allocation5 + $0x160] sm:$0xff]  ;;  %v83_v25 = vld [vmem:[#allocation5 + $0x158] sm:$0xff] }
  0xbc   :  { %1494 = vmatprep.subr.mxu1 %v888_v26  ;;  %1456 = vmatpush2.msra.mxu0 %v679_v27  ;;  %v500_v24 = vld [vmem:[#allocation5 + $0xe60] sm:$0xff]  ;;  %v499_v26 = vld [vmem:[#allocation5 + $0xe58] sm:$0xff] }
  0xbd   :  { %1495 = vmatpush1.msra.mxu1 %v887_v28  ;;  %1457 = vmatprep.subr.mxu0 %v667_v29  ;;  %v71_v27 = vld [vmem:[#allocation5 + $0xf8] sm:$0xff]  ;;  %v70_v29 = vld [vmem:[#allocation5 + $0xf0] sm:$0xff] }
  0xbe   :  { %1496 = vmatprep.subr.mxu1 %v875_v30  ;;  %1458 = vmatpush2.msra.mxu0 %v666_v31  ;;  %v487_v28 = vld [vmem:[#allocation5 + $0xdf8] sm:$0xff]  ;;  %v486_v30 = vld [vmem:[#allocation5 + $0xdf0] sm:$0xff] }
  0xbf   :  { %1459 = vmatprep.mubr.f32.mxu0 %v2938_v10  ;;  %1497 = vmatpush1.msra.mxu1 %v874_v32  ;;  %v58_v31 = vld [vmem:[#allocation5 + $0x90] sm:$0xff] }
  0xc0   :  { %1460 = vmatmul.mubr.f32.vlgmr.msra.gmra.mxu0 %v2930_v1  ;;  %1530 = vmatprep.mubr.f32.mxu1 %v2900_v20  ;;  %v474_v32 = vld [vmem:[#allocation5 + $0xd90] sm:$0xff] }
  0xc1   :  { %1537 = vmatprep.subr.mxu0 %v240_v33  ;;  %1608 = vmatprep.subr.mxu1 %v656_v34  ;;  %v57_v33 = vld [vmem:[#allocation5 + $0x88] sm:$0xff] }
  0xc2   :  { %1531 = vmatmul.mubr.f32.vlgmr.msra.gmra.mxu1 %v2944_v17  ;;  %1538 = vmatpush1.msra.mxu0 %v239_v35  ;;  %v188_v17 = vld [vmem:[#allocation5 + $0x4a0] sm:$0xff]  ;;  %v473_v34 = vld [vmem:[#allocation5 + $0xd88] sm:$0xff] }
  0xc3   :  { %1609 = vmatpush1.msra.mxu1 %v655_v36  ;;  %1539 = vmatprep.subr.mxu0 %v227_v37  ;;  %v45_v35 = vld [vmem:[#allocation5 + $0x28] sm:$0xff]  ;;  %v44_v37 = vld [vmem:[#allocation5 + $0x20] sm:$0xff] }
  0xc4   :  { %1610 = vmatprep.subr.mxu1 %v643_v38  ;;  %1540 = vmatpush1.msra.mxu0 %v226_v39  ;;  %v461_v36 = vld [vmem:[#allocation5 + $0xd28] sm:$0xff]  ;;  %v460_v38 = vld [vmem:[#allocation5 + $0xd20] sm:$0xff] }
  0xc5   :  { %1611 = vmatpush1.msra.mxu1 %v642_v40  ;;  %1541 = vmatprep.subr.mxu0 %v214_v41  ;;  %v448_v39 = vld [vmem:[#allocation5 + $0xcc0] sm:$0xff]  ;;  %v447_v41 = vld [vmem:[#allocation5 + $0xcb8] sm:$0xff] }
  0xc6   :  { %1612 = vmatprep.subr.mxu1 %v630_v42  ;;  %1542 = vmatpush1.msra.mxu0 %v213_v43  ;;  %v864_v40 = vld [vmem:[#allocation5 + $0x19c0] sm:$0xff]  ;;  %v863_v42 = vld [vmem:[#allocation5 + $0x19b8] sm:$0xff] }
  0xc7   :  { %1613 = vmatpush1.msra.mxu1 %v629_v44  ;;  %1543 = vmatprep.subr.mxu0 %v201_v45  ;;  %v435_v43 = vld [vmem:[#allocation5 + $0xc58] sm:$0xff]  ;;  %v434_v45 = vld [vmem:[#allocation5 + $0xc50] sm:$0xff] }
  0xc8   :  { %1614 = vmatprep.subr.mxu1 %v617_v46  ;;  %1544 = vmatpush1.msra.mxu0 %v200_v47  ;;  %v851_v44 = vld [vmem:[#allocation5 + $0x1958] sm:$0xff]  ;;  %v850_v46 = vld [vmem:[#allocation5 + $0x1950] sm:$0xff] }
  0xc9   :  { %1615 = vmatpush1.msra.mxu1 %v616_v48  ;;  %1545 = vmatprep.subr.mxu0 %v188_v17  ;;  %v422_v47 = vld [vmem:[#allocation5 + $0xbf0] sm:$0xff]  ;;  %v421_v17 = vld [vmem:[#allocation5 + $0xbe8] sm:$0xff] }
  0xca   :  { %1616 = vmatprep.subr.mxu1 %v604_v49  ;;  %1546 = vmatpush1.msra.mxu0 %v187_v50  ;;  %v838_v48 = vld [vmem:[#allocation5 + $0x18f0] sm:$0xff]  ;;  %v837_v49 = vld [vmem:[#allocation5 + $0x18e8] sm:$0xff] }
  0xcb   :  { %1617 = vmatpush1.msra.mxu1 %v603_v51  ;;  %1547 = vmatprep.subr.mxu0 %v175_v53  ;;  %v409_v50 = vld [vmem:[#allocation5 + $0xb88] sm:$0xff]  ;;  %v408_v53 = vld [vmem:[#allocation5 + $0xb80] sm:$0xff] }
  0xcc   :  { %1618 = vmatprep.subr.mxu1 %v591_v54  ;;  %1548 = vmatpush1.msra.mxu0 %v174_v55  ;;  %v825_v51 = vld [vmem:[#allocation5 + $0x1888] sm:$0xff]  ;;  %v824_v54 = vld [vmem:[#allocation5 + $0x1880] sm:$0xff] }
  0xcd   :  { %1619 = vmatpush1.msra.mxu1 %v590_v56  ;;  %1549 = vmatprep.subr.mxu0 %v162_v57  ;;  %v396_v55 = vld [vmem:[#allocation5 + $0xb20] sm:$0xff]  ;;  %v395_v57 = vld [vmem:[#allocation5 + $0xb18] sm:$0xff] }
  0xce   :  { %1620 = vmatprep.subr.mxu1 %v578_v58  ;;  %1550 = vmatpush1.msra.mxu0 %v161_v59  ;;  %v812_v56 = vld [vmem:[#allocation5 + $0x1820] sm:$0xff]  ;;  %v811_v58 = vld [vmem:[#allocation5 + $0x1818] sm:$0xff] }
  0xcf   :  { %1621 = vmatpush1.msra.mxu1 %v577_v60  ;;  %1551 = vmatprep.subr.mxu0 %v149_v61  ;;  %v383_v59 = vld [vmem:[#allocation5 + $0xab8] sm:$0xff]  ;;  %v382_v61 = vld [vmem:[#allocation5 + $0xab0] sm:$0xff] }
  0xd0   :  { %1622 = vmatprep.subr.mxu1 %v565_v63  ;;  %1552 = vmatpush1.msra.mxu0 %v148_v0  ;;  %v799_v60 = vld [vmem:[#allocation5 + $0x17b8] sm:$0xff]  ;;  %v798_v63 = vld [vmem:[#allocation5 + $0x17b0] sm:$0xff] }
  0xd1   :  { %1623 = vmatpush1.msra.mxu1 %v564_v2  ;;  %1553 = vmatprep.subr.mxu0 %v136_v3  ;;  %v370_v0 = vld [vmem:[#allocation5 + $0xa50] sm:$0xff]  ;;  %v369_v3 = vld [vmem:[#allocation5 + $0xa48] sm:$0xff] }
  0xd2   :  { %1624 = vmatprep.subr.mxu1 %v552_v4  ;;  %1554 = vmatpush1.msra.mxu0 %v135_v5  ;;  %v786_v2 = vld [vmem:[#allocation5 + $0x1750] sm:$0xff]  ;;  %v785_v4 = vld [vmem:[#allocation5 + $0x1748] sm:$0xff] }
  0xd3   :  { %1625 = vmatpush1.msra.mxu1 %v551_v6  ;;  %1555 = vmatprep.subr.mxu0 %v123_v7  ;;  %v357_v5 = vld [vmem:[#allocation5 + $0x9e8] sm:$0xff]  ;;  %v356_v7 = vld [vmem:[#allocation5 + $0x9e0] sm:$0xff] }
  0xd4   :  { %1626 = vmatprep.subr.mxu1 %v539_v9  ;;  %1556 = vmatpush1.msra.mxu0 %v122_v11  ;;  %v773_v6 = vld [vmem:[#allocation5 + $0x16e8] sm:$0xff]  ;;  %v772_v9 = vld [vmem:[#allocation5 + $0x16e0] sm:$0xff] }
  0xd5   :  { %1627 = vmatpush1.msra.mxu1 %v538_v12  ;;  %1557 = vmatprep.subr.mxu0 %v110_v13  ;;  %v344_v11 = vld [vmem:[#allocation5 + $0x980] sm:$0xff]  ;;  %v343_v13 = vld [vmem:[#allocation5 + $0x978] sm:$0xff] }
  0xd6   :  { %1628 = vmatprep.subr.mxu1 %v526_v14  ;;  %1558 = vmatpush1.msra.mxu0 %v109_v15  ;;  %v760_v12 = vld [vmem:[#allocation5 + $0x1680] sm:$0xff]  ;;  %v759_v14 = vld [vmem:[#allocation5 + $0x1678] sm:$0xff] }
  0xd7   :  { %1629 = vmatpush1.msra.mxu1 %v525_v16  ;;  %1559 = vmatprep.subr.mxu0 %v97_v18  ;;  %v331_v15 = vld [vmem:[#allocation5 + $0x918] sm:$0xff]  ;;  %v330_v18 = vld [vmem:[#allocation5 + $0x910] sm:$0xff] }
  0xd8   :  { %1630 = vmatprep.subr.mxu1 %v513_v19  ;;  %1560 = vmatpush1.msra.mxu0 %v96_v21  ;;  %v747_v16 = vld [vmem:[#allocation5 + $0x1618] sm:$0xff]  ;;  %v746_v19 = vld [vmem:[#allocation5 + $0x1610] sm:$0xff] }
  0xd9   :  { %1631 = vmatpush1.msra.mxu1 %v512_v22  ;;  %1561 = vmatprep.subr.mxu0 %v84_v23  ;;  %v318_v21 = vld [vmem:[#allocation5 + $0x8b0] sm:$0xff]  ;;  %v317_v23 = vld [vmem:[#allocation5 + $0x8a8] sm:$0xff] }
  0xda   :  { %1632 = vmatprep.subr.mxu1 %v500_v24  ;;  %1562 = vmatpush1.msra.mxu0 %v83_v25  ;;  %v734_v22 = vld [vmem:[#allocation5 + $0x15b0] sm:$0xff]  ;;  %v733_v24 = vld [vmem:[#allocation5 + $0x15a8] sm:$0xff] }
  0xdb   :  { %1633 = vmatpush1.msra.mxu1 %v499_v26  ;;  %1563 = vmatprep.subr.mxu0 %v71_v27  ;;  %v305_v25 = vld [vmem:[#allocation5 + $0x848] sm:$0xff]  ;;  %v304_v27 = vld [vmem:[#allocation5 + $0x840] sm:$0xff] }
  0xdc   :  { %1634 = vmatprep.subr.mxu1 %v487_v28  ;;  %1564 = vmatpush1.msra.mxu0 %v70_v29  ;;  %v721_v26 = vld [vmem:[#allocation5 + $0x1548] sm:$0xff]  ;;  %v720_v28 = vld [vmem:[#allocation5 + $0x1540] sm:$0xff] }
  0xdd   :  { %1635 = vmatpush1.msra.mxu1 %v486_v30  ;;  %1565 = vmatprep.subr.mxu0 %v58_v31  ;;  %v292_v29 = vld [vmem:[#allocation5 + $0x7e0] sm:$0xff]  ;;  %v291_v31 = vld [vmem:[#allocation5 + $0x7d8] sm:$0xff] }
  0xde   :  { %1636 = vmatprep.subr.mxu1 %v474_v32  ;;  %1566 = vmatpush1.msra.mxu0 %v57_v33  ;;  %v708_v30 = vld [vmem:[#allocation5 + $0x14e0] sm:$0xff]  ;;  %v707_v32 = vld [vmem:[#allocation5 + $0x14d8] sm:$0xff] }
  0xdf   :  { %1637 = vmatpush1.msra.mxu1 %v473_v34  ;;  %1567 = vmatprep.subr.mxu0 %v45_v35  ;;  %v279_v33 = vld [vmem:[#allocation5 + $0x778] sm:$0xff]  ;;  %v278_v35 = vld [vmem:[#allocation5 + $0x770] sm:$0xff] }
  0xe0   :  { %1638 = vmatprep.subr.mxu1 %v461_v36  ;;  %1568 = vmatpush1.msra.mxu0 %v44_v37  ;;  %v695_v34 = vld [vmem:[#allocation5 + $0x1478] sm:$0xff]  ;;  %v694_v36 = vld [vmem:[#allocation5 + $0x1470] sm:$0xff] }
  0xe1   :  { %1639 = vmatpush1.msra.mxu1 %v460_v38  ;;  %1569 = vmatprep.subr.mxu0 %v448_v39  ;;  %v266_v37 = vld [vmem:[#allocation5 + $0x710] sm:$0xff]  ;;  %v265_v39 = vld [vmem:[#allocation5 + $0x708] sm:$0xff] }
  0xe2   :  { %1640 = vmatprep.subr.mxu1 %v864_v40  ;;  %1570 = vmatpush2.msra.mxu0 %v447_v41  ;;  %v682_v38 = vld [vmem:[#allocation5 + $0x1410] sm:$0xff]  ;;  %v681_v40 = vld [vmem:[#allocation5 + $0x1408] sm:$0xff] }
  0xe3   :  { %1641 = vmatpush2.msra.mxu1 %v863_v42  ;;  %1571 = vmatprep.subr.mxu0 %v435_v43  ;;  %v253_v41 = vld [vmem:[#allocation5 + $0x6a8] sm:$0xff]  ;;  %v252_v43 = vld [vmem:[#allocation5 + $0x6a0] sm:$0xff] }
  0xe4   :  { %1642 = vmatprep.subr.mxu1 %v851_v44  ;;  %1572 = vmatpush2.msra.mxu0 %v434_v45  ;;  %v669_v42 = vld [vmem:[#allocation5 + $0x13a8] sm:$0xff]  ;;  %v668_v44 = vld [vmem:[#allocation5 + $0x13a0] sm:$0xff] }
  0xe5   :  { %1643 = vmatpush2.msra.mxu1 %v850_v46  ;;  %1573 = vmatprep.subr.mxu0 %v422_v47  ;;  %v1072_v45 = vld [vmem:[#allocation5 + $0x2040] sm:$0xff]  ;;  %v242_v46 = vld [vmem:[#allocation5 + $0x650] sm:$0xff]  ;;  %v1071_v47 = vld [vmem:[#allocation5 + $0x2038] sm:$0xff] }
  0xe6   :  { %1644 = vmatprep.subr.mxu1 %v838_v48  ;;  %1574 = vmatpush2.msra.mxu0 %v421_v17  ;;  %v241_v48 = vld [vmem:[#allocation5 + $0x648] sm:$0xff]  ;;  %v1059_v17 = vld [vmem:[#allocation5 + $0x1fd8] sm:$0xff] }
  0xe7   :  { %1645 = vmatpush2.msra.mxu1 %v837_v49  ;;  %1575 = vmatprep.subr.mxu0 %v409_v50  ;;  %v229_v49 = vld [vmem:[#allocation5 + $0x5e8] sm:$0xff]  ;;  %v1058_v50 = vld [vmem:[#allocation5 + $0x1fd0] sm:$0xff] }
  0xe8   :  { %1646 = vmatprep.subr.mxu1 %v825_v51  ;;  %1576 = vmatpush2.msra.mxu0 %v408_v53  ;;  %v228_v51 = vld [vmem:[#allocation5 + $0x5e0] sm:$0xff]  ;;  %v1046_v53 = vld [vmem:[#allocation5 + $0x1f70] sm:$0xff] }
  0xe9   :  { %1647 = vmatpush2.msra.mxu1 %v824_v54  ;;  %1577 = vmatprep.subr.mxu0 %v396_v55  ;;  %v216_v54 = vld [vmem:[#allocation5 + $0x580] sm:$0xff]  ;;  %v1045_v55 = vld [vmem:[#allocation5 + $0x1f68] sm:$0xff] }
  0xea   :  { %1648 = vmatprep.subr.mxu1 %v812_v56  ;;  %1578 = vmatpush2.msra.mxu0 %v395_v57  ;;  %v215_v56 = vld [vmem:[#allocation5 + $0x578] sm:$0xff]  ;;  %v1033_v57 = vld [vmem:[#allocation5 + $0x1f08] sm:$0xff] }
  0xeb   :  { %1649 = vmatpush2.msra.mxu1 %v811_v58  ;;  %1579 = vmatprep.subr.mxu0 %v383_v59  ;;  %v203_v58 = vld [vmem:[#allocation5 + $0x518] sm:$0xff]  ;;  %v1032_v59 = vld [vmem:[#allocation5 + $0x1f00] sm:$0xff] }
  0xec   :  { %1650 = vmatprep.subr.mxu1 %v799_v60  ;;  %1580 = vmatpush2.msra.mxu0 %v382_v61  ;;  %v202_v60 = vld [vmem:[#allocation5 + $0x510] sm:$0xff]  ;;  %v1020_v61 = vld [vmem:[#allocation5 + $0x1ea0] sm:$0xff] }
  0xed   :  { %1651 = vmatpush2.msra.mxu1 %v798_v63  ;;  %1581 = vmatprep.subr.mxu0 %v370_v0  ;;  %v190_v63 = vld [vmem:[#allocation5 + $0x4b0] sm:$0xff]  ;;  %v1019_v0 = vld [vmem:[#allocation5 + $0x1e98] sm:$0xff] }
  0xee   :  { %1652 = vmatprep.subr.mxu1 %v786_v2  ;;  %1582 = vmatpush2.msra.mxu0 %v369_v3  ;;  %v189_v2 = vld [vmem:[#allocation5 + $0x4a8] sm:$0xff]  ;;  %v1007_v3 = vld [vmem:[#allocation5 + $0x1e38] sm:$0xff] }
  0xef   :  { %1653 = vmatpush2.msra.mxu1 %v785_v4  ;;  %1583 = vmatprep.subr.mxu0 %v357_v5  ;;  %v177_v4 = vld [vmem:[#allocation5 + $0x448] sm:$0xff]  ;;  %v1006_v5 = vld [vmem:[#allocation5 + $0x1e30] sm:$0xff] }
  0xf0   :  { %1654 = vmatprep.subr.mxu1 %v773_v6  ;;  %1584 = vmatpush2.msra.mxu0 %v356_v7  ;;  %v176_v6 = vld [vmem:[#allocation5 + $0x440] sm:$0xff]  ;;  %v994_v7 = vld [vmem:[#allocation5 + $0x1dd0] sm:$0xff] }
  0xf1   :  { %1655 = vmatpush2.msra.mxu1 %v772_v9  ;;  %1585 = vmatprep.subr.mxu0 %v344_v11  ;;  %v164_v9 = vld [vmem:[#allocation5 + $0x3e0] sm:$0xff]  ;;  %v993_v11 = vld [vmem:[#allocation5 + $0x1dc8] sm:$0xff] }
  0xf2   :  { %1656 = vmatprep.subr.mxu1 %v760_v12  ;;  %1586 = vmatpush2.msra.mxu0 %v343_v13  ;;  %v163_v12 = vld [vmem:[#allocation5 + $0x3d8] sm:$0xff]  ;;  %v981_v13 = vld [vmem:[#allocation5 + $0x1d68] sm:$0xff] }
  0xf3   :  { %1657 = vmatpush2.msra.mxu1 %v759_v14  ;;  %1587 = vmatprep.subr.mxu0 %v331_v15  ;;  %v151_v14 = vld [vmem:[#allocation5 + $0x378] sm:$0xff]  ;;  %v980_v15 = vld [vmem:[#allocation5 + $0x1d60] sm:$0xff] }
  0xf4   :  { %1658 = vmatprep.subr.mxu1 %v747_v16  ;;  %1588 = vmatpush2.msra.mxu0 %v330_v18  ;;  %v150_v16 = vld [vmem:[#allocation5 + $0x370] sm:$0xff]  ;;  %v968_v18 = vld [vmem:[#allocation5 + $0x1d00] sm:$0xff] }
  0xf5   :  { %1659 = vmatpush2.msra.mxu1 %v746_v19  ;;  %1589 = vmatprep.subr.mxu0 %v318_v21  ;;  %v138_v19 = vld [vmem:[#allocation5 + $0x310] sm:$0xff]  ;;  %v967_v21 = vld [vmem:[#allocation5 + $0x1cf8] sm:$0xff] }
  0xf6   :  { %1660 = vmatprep.subr.mxu1 %v734_v22  ;;  %1590 = vmatpush2.msra.mxu0 %v317_v23  ;;  %v137_v22 = vld [vmem:[#allocation5 + $0x308] sm:$0xff]  ;;  %v955_v23 = vld [vmem:[#allocation5 + $0x1c98] sm:$0xff] }
  0xf7   :  { %1661 = vmatpush2.msra.mxu1 %v733_v24  ;;  %1591 = vmatprep.subr.mxu0 %v305_v25  ;;  %v125_v24 = vld [vmem:[#allocation5 + $0x2a8] sm:$0xff]  ;;  %v954_v25 = vld [vmem:[#allocation5 + $0x1c90] sm:$0xff] }
  0xf8   :  { %1662 = vmatprep.subr.mxu1 %v721_v26  ;;  %1592 = vmatpush2.msra.mxu0 %v304_v27  ;;  %v124_v26 = vld [vmem:[#allocation5 + $0x2a0] sm:$0xff]  ;;  %v942_v27 = vld [vmem:[#allocation5 + $0x1c30] sm:$0xff] }
  0xf9   :  { %1663 = vmatpush2.msra.mxu1 %v720_v28  ;;  %1593 = vmatprep.subr.mxu0 %v292_v29  ;;  %v112_v28 = vld [vmem:[#allocation5 + $0x240] sm:$0xff]  ;;  %v941_v29 = vld [vmem:[#allocation5 + $0x1c28] sm:$0xff] }
  0xfa   :  { %1664 = vmatprep.subr.mxu1 %v708_v30  ;;  %1594 = vmatpush2.msra.mxu0 %v291_v31  ;;  %v111_v30 = vld [vmem:[#allocation5 + $0x238] sm:$0xff]  ;;  %v929_v31 = vld [vmem:[#allocation5 + $0x1bc8] sm:$0xff] }
  0xfb   :  { %1665 = vmatpush2.msra.mxu1 %v707_v32  ;;  %1595 = vmatprep.subr.mxu0 %v279_v33  ;;  %v99_v32 = vld [vmem:[#allocation5 + $0x1d8] sm:$0xff]  ;;  %v928_v33 = vld [vmem:[#allocation5 + $0x1bc0] sm:$0xff] }
  0xfc   :  { %1666 = vmatprep.subr.mxu1 %v695_v34  ;;  %1596 = vmatpush2.msra.mxu0 %v278_v35  ;;  %v98_v34 = vld [vmem:[#allocation5 + $0x1d0] sm:$0xff]  ;;  %v916_v35 = vld [vmem:[#allocation5 + $0x1b60] sm:$0xff] }
  0xfd   :  { %1667 = vmatpush2.msra.mxu1 %v694_v36  ;;  %1597 = vmatprep.subr.mxu0 %v266_v37  ;;  %v86_v36 = vld [vmem:[#allocation5 + $0x170] sm:$0xff]  ;;  %v915_v37 = vld [vmem:[#allocation5 + $0x1b58] sm:$0xff] }
  0xfe   :  { %1668 = vmatprep.subr.mxu1 %v682_v38  ;;  %1598 = vmatpush2.msra.mxu0 %v265_v39  ;;  %v85_v38 = vld [vmem:[#allocation5 + $0x168] sm:$0xff]  ;;  %v903_v39 = vld [vmem:[#allocation5 + $0x1af8] sm:$0xff] }
  0xff   :  { %1669 = vmatpush2.msra.mxu1 %v681_v40  ;;  %1599 = vmatprep.subr.mxu0 %v253_v41  ;;  %v73_v40 = vld [vmem:[#allocation5 + $0x108] sm:$0xff]  ;;  %v902_v41 = vld [vmem:[#allocation5 + $0x1af0] sm:$0xff] }
 0x100   :  { %1670 = vmatprep.subr.mxu1 %v669_v42  ;;  %1600 = vmatpush2.msra.mxu0 %v252_v43  ;;  %v72_v42 = vld [vmem:[#allocation5 + $0x100] sm:$0xff]  ;;  %v890_v43 = vld [vmem:[#allocation5 + $0x1a90] sm:$0xff] }
 0x101   :  { %1601 = vmatprep.mubr.f32.mxu0 %v2934_v8  ;;  %1671 = vmatpush2.msra.mxu1 %v668_v44  ;;  %v60_v44 = vld [vmem:[#allocation5 + $0xa0] sm:$0xff] }
 0x102   :  { %1672 = vmatprep.mubr.f32.mxu1 %v2938_v10  ;;  %1602 = vmatmul.mubr.f32.vlgmr.msra.gmra.mxu0 %v2927_v62 }
 0x103   :  { %1673 = vmatmul.mubr.f32.vlgmr.msra.gmra.mxu1 %v2930_v1  ;;  %1679 = vmatprep.subr.mxu0 %v1072_v45  ;;  %v889_v45 = vld [vmem:[#allocation5 + $0x1a88] sm:$0xff] }
 0x104   :  { %1750 = vmatprep.subr.mxu1 %v242_v46  ;;  %1680 = vmatpush1.msra.mxu0 %v1071_v47  ;;  %v59_v46 = vld [vmem:[#allocation5 + $0x98] sm:$0xff]  ;;  %v877_v47 = vld [vmem:[#allocation5 + $0x1a28] sm:$0xff] }
 0x105   :  { %1751 = vmatpush1.msra.mxu1 %v241_v48  ;;  %1681 = vmatprep.subr.mxu0 %v1059_v17  ;;  %v47_v48 = vld [vmem:[#allocation5 + $0x38] sm:$0xff]  ;;  %v876_v17 = vld [vmem:[#allocation5 + $0x1a20] sm:$0xff] }
 0x106   :  { %1752 = vmatprep.subr.mxu1 %v229_v49  ;;  %1682 = vmatpush1.msra.mxu0 %v1058_v50  ;;  %v46_v49 = vld [vmem:[#allocation5 + $0x30] sm:$0xff] }
 0x107   :  { %1753 = vmatpush1.msra.mxu1 %v228_v51  ;;  %1683 = vmatprep.subr.mxu0 %v1046_v53  ;;  %v450_v50 = vld [vmem:[#allocation5 + $0xcd0] sm:$0xff]  ;;  %v449_v53 = vld [vmem:[#allocation5 + $0xcc8] sm:$0xff] }
 0x108   :  { %1754 = vmatprep.subr.mxu1 %v216_v54  ;;  %1684 = vmatpush1.msra.mxu0 %v1045_v55  ;;  %v658_v51 = vld [vmem:[#allocation5 + $0x1350] sm:$0xff]  ;;  %v657_v54 = vld [vmem:[#allocation5 + $0x1348] sm:$0xff]  ;;  %v2959_v55 = vld.sshfl [vmem:[#allocation2 + $0x8] sm:$0x3 pattern:$0x76325410] }
 0x109   :  { %1755 = vmatpush1.msra.mxu1 %v215_v56  ;;  %1685 = vmatprep.subr.mxu0 %v1033_v57  ;;  %v437_v56 = vld [vmem:[#allocation5 + $0xc68] sm:$0xff] }
 0x10a   :  { %1756 = vmatprep.subr.mxu1 %v203_v58  ;;  %1686 = vmatpush1.msra.mxu0 %v1032_v59  ;;  %v645_v57 = vld [vmem:[#allocation5 + $0x12e8] sm:$0xff]  ;;  %v436_v58 = vld [vmem:[#allocation5 + $0xc60] sm:$0xff] }
 0x10b   :  { %1757 = vmatpush1.msra.mxu1 %v202_v60  ;;  %1687 = vmatprep.subr.mxu0 %v1020_v61  ;;  %v644_v59 = vld [vmem:[#allocation5 + $0x12e0] sm:$0xff] }
 0x10c   :  { %1758 = vmatprep.subr.mxu1 %v190_v63  ;;  %1688 = vmatpush1.msra.mxu0 %v1019_v0  ;;  %v424_v60 = vld [vmem:[#allocation5 + $0xc00] sm:$0xff]  ;;  %v423_v63 = vld [vmem:[#allocation5 + $0xbf8] sm:$0xff] }
 0x10d   :  { %1759 = vmatpush1.msra.mxu1 %v189_v2  ;;  %1689 = vmatprep.subr.mxu0 %v1007_v3  ;;  %v632_v61 = vld [vmem:[#allocation5 + $0x1280] sm:$0xff]  ;;  %v631_v0 = vld [vmem:[#allocation5 + $0x1278] sm:$0xff] }
 0x10e   :  { %1760 = vmatprep.subr.mxu1 %v177_v4  ;;  %1690 = vmatpush1.msra.mxu0 %v1006_v5  ;;  %v411_v2 = vld [vmem:[#allocation5 + $0xb98] sm:$0xff]  ;;  %v410_v4 = vld [vmem:[#allocation5 + $0xb90] sm:$0xff] }
 0x10f   :  { %1761 = vmatpush1.msra.mxu1 %v176_v6  ;;  %1691 = vmatprep.subr.mxu0 %v994_v7  ;;  %v619_v3 = vld [vmem:[#allocation5 + $0x1218] sm:$0xff]  ;;  %v618_v5 = vld [vmem:[#allocation5 + $0x1210] sm:$0xff] }
 0x110   :  { %1762 = vmatprep.subr.mxu1 %v164_v9  ;;  %1692 = vmatpush1.msra.mxu0 %v993_v11  ;;  %v398_v6 = vld [vmem:[#allocation5 + $0xb30] sm:$0xff]  ;;  %v397_v9 = vld [vmem:[#allocation5 + $0xb28] sm:$0xff] }
 0x111   :  { %1763 = vmatpush1.msra.mxu1 %v163_v12  ;;  %1693 = vmatprep.subr.mxu0 %v981_v13  ;;  %v606_v7 = vld [vmem:[#allocation5 + $0x11b0] sm:$0xff]  ;;  %v605_v11 = vld [vmem:[#allocation5 + $0x11a8] sm:$0xff] }
 0x112   :  { %1764 = vmatprep.subr.mxu1 %v151_v14  ;;  %1694 = vmatpush1.msra.mxu0 %v980_v15  ;;  %v385_v12 = vld [vmem:[#allocation5 + $0xac8] sm:$0xff]  ;;  %v384_v14 = vld [vmem:[#allocation5 + $0xac0] sm:$0xff] }
 0x113   :  { %1765 = vmatpush1.msra.mxu1 %v150_v16  ;;  %1695 = vmatprep.subr.mxu0 %v968_v18  ;;  %v593_v13 = vld [vmem:[#allocation5 + $0x1148] sm:$0xff]  ;;  %v592_v15 = vld [vmem:[#allocation5 + $0x1140] sm:$0xff] }
 0x114   :  { %1766 = vmatprep.subr.mxu1 %v138_v19  ;;  %1696 = vmatpush1.msra.mxu0 %v967_v21  ;;  %v372_v16 = vld [vmem:[#allocation5 + $0xa60] sm:$0xff]  ;;  %v371_v19 = vld [vmem:[#allocation5 + $0xa58] sm:$0xff] }
 0x115   :  { %1767 = vmatpush1.msra.mxu1 %v137_v22  ;;  %1697 = vmatprep.subr.mxu0 %v955_v23  ;;  %v580_v18 = vld [vmem:[#allocation5 + $0x10e0] sm:$0xff]  ;;  %v579_v21 = vld [vmem:[#allocation5 + $0x10d8] sm:$0xff] }
 0x116   :  { %1768 = vmatprep.subr.mxu1 %v125_v24  ;;  %1698 = vmatpush1.msra.mxu0 %v954_v25  ;;  %v359_v22 = vld [vmem:[#allocation5 + $0x9f8] sm:$0xff]  ;;  %v358_v24 = vld [vmem:[#allocation5 + $0x9f0] sm:$0xff] }
 0x117   :  { %1769 = vmatpush1.msra.mxu1 %v124_v26  ;;  %1699 = vmatprep.subr.mxu0 %v942_v27  ;;  %v567_v23 = vld [vmem:[#allocation5 + $0x1078] sm:$0xff]  ;;  %v566_v25 = vld [vmem:[#allocation5 + $0x1070] sm:$0xff] }
 0x118   :  { %1770 = vmatprep.subr.mxu1 %v112_v28  ;;  %1700 = vmatpush1.msra.mxu0 %v941_v29  ;;  %v346_v26 = vld [vmem:[#allocation5 + $0x990] sm:$0xff]  ;;  %v345_v28 = vld [vmem:[#allocation5 + $0x988] sm:$0xff] }
 0x119   :  { %1771 = vmatpush1.msra.mxu1 %v111_v30  ;;  %1701 = vmatprep.subr.mxu0 %v929_v31  ;;  %v554_v27 = vld [vmem:[#allocation5 + $0x1010] sm:$0xff]  ;;  %v553_v29 = vld [vmem:[#allocation5 + $0x1008] sm:$0xff] }
 0x11a   :  { %1772 = vmatprep.subr.mxu1 %v99_v32  ;;  %1702 = vmatpush1.msra.mxu0 %v928_v33  ;;  %v333_v30 = vld [vmem:[#allocation5 + $0x928] sm:$0xff]  ;;  %v332_v32 = vld [vmem:[#allocation5 + $0x920] sm:$0xff] }
 0x11b   :  { %1773 = vmatpush1.msra.mxu1 %v98_v34  ;;  %1703 = vmatprep.subr.mxu0 %v916_v35  ;;  %v541_v31 = vld [vmem:[#allocation5 + $0xfa8] sm:$0xff]  ;;  %v540_v33 = vld [vmem:[#allocation5 + $0xfa0] sm:$0xff] }
 0x11c   :  { %1774 = vmatprep.subr.mxu1 %v86_v36  ;;  %1704 = vmatpush1.msra.mxu0 %v915_v37  ;;  %v320_v34 = vld [vmem:[#allocation5 + $0x8c0] sm:$0xff]  ;;  %v319_v36 = vld [vmem:[#allocation5 + $0x8b8] sm:$0xff] }
 0x11d   :  { %1775 = vmatpush1.msra.mxu1 %v85_v38  ;;  %1705 = vmatprep.subr.mxu0 %v903_v39  ;;  %v528_v35 = vld [vmem:[#allocation5 + $0xf40] sm:$0xff]  ;;  %v527_v37 = vld [vmem:[#allocation5 + $0xf38] sm:$0xff] }
 0x11e   :  { %1776 = vmatprep.subr.mxu1 %v73_v40  ;;  %1706 = vmatpush1.msra.mxu0 %v902_v41  ;;  %v307_v38 = vld [vmem:[#allocation5 + $0x858] sm:$0xff]  ;;  %v306_v40 = vld [vmem:[#allocation5 + $0x850] sm:$0xff] }
 0x11f   :  { %1777 = vmatpush1.msra.mxu1 %v72_v42  ;;  %1707 = vmatprep.subr.mxu0 %v890_v43  ;;  %v515_v39 = vld [vmem:[#allocation5 + $0xed8] sm:$0xff]  ;;  %v514_v41 = vld [vmem:[#allocation5 + $0xed0] sm:$0xff] }
 0x120   :  { %1778 = vmatprep.subr.mxu1 %v60_v44  ;;  %1708 = vmatpush1.msra.mxu0 %v889_v45  ;;  %v294_v42 = vld [vmem:[#allocation5 + $0x7f0] sm:$0xff]  ;;  %v293_v44 = vld [vmem:[#allocation5 + $0x7e8] sm:$0xff] }
 0x121   :  { %1779 = vmatpush1.msra.mxu1 %v59_v46  ;;  %1709 = vmatprep.subr.mxu0 %v877_v47  ;;  %v502_v43 = vld [vmem:[#allocation5 + $0xe70] sm:$0xff]  ;;  %v501_v45 = vld [vmem:[#allocation5 + $0xe68] sm:$0xff] }
 0x122   :  { %1780 = vmatprep.subr.mxu1 %v47_v48  ;;  %1710 = vmatpush1.msra.mxu0 %v876_v17  ;;  %v281_v46 = vld [vmem:[#allocation5 + $0x788] sm:$0xff]  ;;  %v280_v48 = vld [vmem:[#allocation5 + $0x780] sm:$0xff] }
 0x123   :  { %1743 = vmatprep.mubr.f32.mxu0 %v2900_v20  ;;  %1781 = vmatpush1.msra.mxu1 %v46_v49  ;;  %v489_v47 = vld [vmem:[#allocation5 + $0xe08] sm:$0xff]  ;;  %v488_v17 = vld [vmem:[#allocation5 + $0xe00] sm:$0xff] }
 0x124   :  { %1744 = vmatmul.mubr.f32.vlgmr.msra.gmra.mxu0 %v2959_v55  ;;  %1782 = vmatprep.subr.mxu1 %v450_v50  ;;  %v268_v49 = vld [vmem:[#allocation5 + $0x720] sm:$0xff] }
 0x125   :  { %1821 = vmatprep.subr.mxu0 %v658_v51  ;;  %1783 = vmatpush2.msra.mxu1 %v449_v53  ;;  %v476_v50 = vld [vmem:[#allocation5 + $0xda0] sm:$0xff]  ;;  %v267_v51 = vld [vmem:[#allocation5 + $0x718] sm:$0xff] }
 0x126   :  { %1822 = vmatpush1.msra.mxu0 %v657_v54  ;;  %1784 = vmatprep.subr.mxu1 %v437_v56  ;;  %v475_v53 = vld [vmem:[#allocation5 + $0xd98] sm:$0xff] }
 0x127   :  { %1823 = vmatprep.subr.mxu0 %v645_v57  ;;  %1785 = vmatpush2.msra.mxu1 %v436_v58  ;;  %v255_v54 = vld [vmem:[#allocation5 + $0x6b8] sm:$0xff]  ;;  %v254_v57 = vld [vmem:[#allocation5 + $0x6b0] sm:$0xff] }
 0x128   :  { %1824 = vmatpush1.msra.mxu0 %v644_v59  ;;  %1786 = vmatprep.subr.mxu1 %v424_v60  ;;  %v463_v56 = vld [vmem:[#allocation5 + $0xd38] sm:$0xff]  ;;  %v462_v58 = vld [vmem:[#allocation5 + $0xd30] sm:$0xff] }
 0x129   :  { %1825 = vmatprep.subr.mxu0 %v632_v61  ;;  %1787 = vmatpush2.msra.mxu1 %v423_v63  ;;  %v866_v59 = vld [vmem:[#allocation5 + $0x19d0] sm:$0xff]  ;;  %v865_v61 = vld [vmem:[#allocation5 + $0x19c8] sm:$0xff] }
 0x12a   :  { %1826 = vmatpush1.msra.mxu0 %v631_v0  ;;  %1788 = vmatprep.subr.mxu1 %v411_v2  ;;  %v1074_v60 = vld [vmem:[#allocation5 + $0x2050] sm:$0xff]  ;;  %v1073_v63 = vld [vmem:[#allocation5 + $0x2048] sm:$0xff] }
 0x12b   :  { %1827 = vmatprep.subr.mxu0 %v619_v3  ;;  %1789 = vmatpush2.msra.mxu1 %v410_v4  ;;  %v853_v0 = vld [vmem:[#allocation5 + $0x1968] sm:$0xff]  ;;  %v852_v3 = vld [vmem:[#allocation5 + $0x1960] sm:$0xff] }
 0x12c   :  { %1828 = vmatpush1.msra.mxu0 %v618_v5  ;;  %1790 = vmatprep.subr.mxu1 %v398_v6  ;;  %v1061_v2 = vld [vmem:[#allocation5 + $0x1fe8] sm:$0xff]  ;;  %v1060_v4 = vld [vmem:[#allocation5 + $0x1fe0] sm:$0xff] }
 0x12d   :  { %1829 = vmatprep.subr.mxu0 %v606_v7  ;;  %1791 = vmatpush2.msra.mxu1 %v397_v9  ;;  %v840_v5 = vld [vmem:[#allocation5 + $0x1900] sm:$0xff]  ;;  %v839_v7 = vld [vmem:[#allocation5 + $0x18f8] sm:$0xff] }
 0x12e   :  { %1830 = vmatpush1.msra.mxu0 %v605_v11  ;;  %1792 = vmatprep.subr.mxu1 %v385_v12  ;;  %v1048_v6 = vld [vmem:[#allocation5 + $0x1f80] sm:$0xff]  ;;  %v1047_v9 = vld [vmem:[#allocation5 + $0x1f78] sm:$0xff] }
 0x12f   :  { %1831 = vmatprep.subr.mxu0 %v593_v13  ;;  %1793 = vmatpush2.msra.mxu1 %v384_v14  ;;  %v827_v11 = vld [vmem:[#allocation5 + $0x1898] sm:$0xff]  ;;  %v826_v13 = vld [vmem:[#allocation5 + $0x1890] sm:$0xff] }
 0x130   :  { %1832 = vmatpush1.msra.mxu0 %v592_v15  ;;  %1794 = vmatprep.subr.mxu1 %v372_v16  ;;  %v1035_v12 = vld [vmem:[#allocation5 + $0x1f18] sm:$0xff]  ;;  %v1034_v14 = vld [vmem:[#allocation5 + $0x1f10] sm:$0xff] }
 0x131   :  { %1833 = vmatprep.subr.mxu0 %v580_v18  ;;  %1795 = vmatpush2.msra.mxu1 %v371_v19  ;;  %v814_v15 = vld [vmem:[#allocation5 + $0x1830] sm:$0xff]  ;;  %v813_v18 = vld [vmem:[#allocation5 + $0x1828] sm:$0xff] }
 0x132   :  { %1834 = vmatpush1.msra.mxu0 %v579_v21  ;;  %1796 = vmatprep.subr.mxu1 %v359_v22  ;;  %v1022_v16 = vld [vmem:[#allocation5 + $0x1eb0] sm:$0xff]  ;;  %v1021_v19 = vld [vmem:[#allocation5 + $0x1ea8] sm:$0xff] }
 0x133   :  { %1835 = vmatprep.subr.mxu0 %v567_v23  ;;  %1797 = vmatpush2.msra.mxu1 %v358_v24  ;;  %v801_v21 = vld [vmem:[#allocation5 + $0x17c8] sm:$0xff]  ;;  %v800_v23 = vld [vmem:[#allocation5 + $0x17c0] sm:$0xff] }
 0x134   :  { %1836 = vmatpush1.msra.mxu0 %v566_v25  ;;  %1798 = vmatprep.subr.mxu1 %v346_v26  ;;  %v1009_v22 = vld [vmem:[#allocation5 + $0x1e48] sm:$0xff]  ;;  %v1008_v24 = vld [vmem:[#allocation5 + $0x1e40] sm:$0xff] }
 0x135   :  { %1837 = vmatprep.subr.mxu0 %v554_v27  ;;  %1799 = vmatpush2.msra.mxu1 %v345_v28  ;;  %v788_v25 = vld [vmem:[#allocation5 + $0x1760] sm:$0xff]  ;;  %v787_v27 = vld [vmem:[#allocation5 + $0x1758] sm:$0xff] }
 0x136   :  { %1838 = vmatpush1.msra.mxu0 %v553_v29  ;;  %1800 = vmatprep.subr.mxu1 %v333_v30  ;;  %v996_v26 = vld [vmem:[#allocation5 + $0x1de0] sm:$0xff]  ;;  %v995_v28 = vld [vmem:[#allocation5 + $0x1dd8] sm:$0xff] }
 0x137   :  { %1839 = vmatprep.subr.mxu0 %v541_v31  ;;  %1801 = vmatpush2.msra.mxu1 %v332_v32  ;;  %v775_v29 = vld [vmem:[#allocation5 + $0x16f8] sm:$0xff]  ;;  %v774_v31 = vld [vmem:[#allocation5 + $0x16f0] sm:$0xff] }
 0x138   :  { %1840 = vmatpush1.msra.mxu0 %v540_v33  ;;  %1802 = vmatprep.subr.mxu1 %v320_v34  ;;  %v983_v30 = vld [vmem:[#allocation5 + $0x1d78] sm:$0xff]  ;;  %v982_v32 = vld [vmem:[#allocation5 + $0x1d70] sm:$0xff] }
 0x139   :  { %1841 = vmatprep.subr.mxu0 %v528_v35  ;;  %1803 = vmatpush2.msra.mxu1 %v319_v36  ;;  %v762_v33 = vld [vmem:[#allocation5 + $0x1690] sm:$0xff]  ;;  %v761_v35 = vld [vmem:[#allocation5 + $0x1688] sm:$0xff] }
 0x13a   :  { %1842 = vmatpush1.msra.mxu0 %v527_v37  ;;  %1804 = vmatprep.subr.mxu1 %v307_v38  ;;  %v970_v34 = vld [vmem:[#allocation5 + $0x1d10] sm:$0xff]  ;;  %v969_v36 = vld [vmem:[#allocation5 + $0x1d08] sm:$0xff] }
 0x13b   :  { %1843 = vmatprep.subr.mxu0 %v515_v39  ;;  %1805 = vmatpush2.msra.mxu1 %v306_v40  ;;  %v749_v37 = vld [vmem:[#allocation5 + $0x1628] sm:$0xff]  ;;  %v748_v39 = vld [vmem:[#allocation5 + $0x1620] sm:$0xff] }
 0x13c   :  { %1844 = vmatpush1.msra.mxu0 %v514_v41  ;;  %1806 = vmatprep.subr.mxu1 %v294_v42  ;;  %v957_v38 = vld [vmem:[#allocation5 + $0x1ca8] sm:$0xff]  ;;  %v956_v40 = vld [vmem:[#allocation5 + $0x1ca0] sm:$0xff] }
 0x13d   :  { %1845 = vmatprep.subr.mxu0 %v502_v43  ;;  %1807 = vmatpush2.msra.mxu1 %v293_v44  ;;  %v736_v41 = vld [vmem:[#allocation5 + $0x15c0] sm:$0xff]  ;;  %v735_v43 = vld [vmem:[#allocation5 + $0x15b8] sm:$0xff] }
 0x13e   :  { %1846 = vmatpush1.msra.mxu0 %v501_v45  ;;  %1808 = vmatprep.subr.mxu1 %v281_v46  ;;  %v944_v42 = vld [vmem:[#allocation5 + $0x1c40] sm:$0xff]  ;;  %v943_v44 = vld [vmem:[#allocation5 + $0x1c38] sm:$0xff] }
 0x13f   :  { %1847 = vmatprep.subr.mxu0 %v489_v47  ;;  %1809 = vmatpush2.msra.mxu1 %v280_v48  ;;  %v723_v45 = vld [vmem:[#allocation5 + $0x1558] sm:$0xff]  ;;  %v722_v47 = vld [vmem:[#allocation5 + $0x1550] sm:$0xff] }
 0x140   :  { %1848 = vmatpush1.msra.mxu0 %v488_v17  ;;  %1810 = vmatprep.subr.mxu1 %v268_v49  ;;  %v931_v46 = vld [vmem:[#allocation5 + $0x1bd8] sm:$0xff]  ;;  %v930_v48 = vld [vmem:[#allocation5 + $0x1bd0] sm:$0xff] }
 0x141   :  { %1849 = vmatprep.subr.mxu0 %v476_v50  ;;  %1811 = vmatpush2.msra.mxu1 %v267_v51  ;;  %v710_v17 = vld [vmem:[#allocation5 + $0x14f0] sm:$0xff]  ;;  %v709_v50 = vld [vmem:[#allocation5 + $0x14e8] sm:$0xff] }
 0x142   :  { %1850 = vmatpush1.msra.mxu0 %v475_v53  ;;  %1812 = vmatprep.subr.mxu1 %v255_v54  ;;  %v918_v49 = vld [vmem:[#allocation5 + $0x1b70] sm:$0xff]  ;;  %v917_v51 = vld [vmem:[#allocation5 + $0x1b68] sm:$0xff] }
 0x143   :  { %1851 = vmatprep.subr.mxu0 %v463_v56  ;;  %1813 = vmatpush2.msra.mxu1 %v254_v57  ;;  %v697_v53 = vld [vmem:[#allocation5 + $0x1488] sm:$0xff]  ;;  %v696_v56 = vld [vmem:[#allocation5 + $0x1480] sm:$0xff] }
 0x144   :  { %1852 = vmatpush1.msra.mxu0 %v462_v58  ;;  %1814 = vmatprep.mubr.f32.mxu1 %v2934_v8  ;;  %v905_v54 = vld [vmem:[#allocation5 + $0x1b08] sm:$0xff]  ;;  %v904_v57 = vld [vmem:[#allocation5 + $0x1b00] sm:$0xff] }
 0x145   :  { %1853 = vmatprep.subr.mxu0 %v866_v59  ;;  %1892 = vmatprep.subr.mxu1 %v1074_v60  ;;  %v684_v58 = vld [vmem:[#allocation5 + $0x1420] sm:$0xff]  ;;  %v683_v60 = vld [vmem:[#allocation5 + $0x1418] sm:$0xff] }
 0x146   :  { %1815 = vmatmul.mubr.f32.vlgmr.msra.gmra.mxu1 %v2927_v62  ;;  %1854 = vmatpush2.msra.mxu0 %v865_v61  ;;  %v892_v59 = vld [vmem:[#allocation5 + $0x1aa0] sm:$0xff]  ;;  %v891_v61 = vld [vmem:[#allocation5 + $0x1a98] sm:$0xff] }
 0x147   :  { %1893 = vmatpush1.msra.mxu1 %v1073_v63  ;;  %1855 = vmatprep.subr.mxu0 %v853_v0  ;;  %v671_v63 = vld [vmem:[#allocation5 + $0x13b8] sm:$0xff] }
 0x148   :  { %1894 = vmatprep.subr.mxu1 %v1061_v2  ;;  %1856 = vmatpush2.msra.mxu0 %v852_v3  ;;  %v879_v0 = vld [vmem:[#allocation5 + $0x1a38] sm:$0xff]  ;;  %v670_v2 = vld [vmem:[#allocation5 + $0x13b0] sm:$0xff] }
 0x149   :  { %1895 = vmatpush1.msra.mxu1 %v1060_v4  ;;  %1857 = vmatprep.subr.mxu0 %v840_v5  ;;  %v878_v3 = vld [vmem:[#allocation5 + $0x1a30] sm:$0xff]  ;;  %v244_v4 = vld [vmem:[#allocation5 + $0x660] sm:$0xff] }
 0x14a   :  { %1896 = vmatprep.subr.mxu1 %v1048_v6  ;;  %1858 = vmatpush2.msra.mxu0 %v839_v7  ;;  %v660_v5 = vld [vmem:[#allocation5 + $0x1360] sm:$0xff]  ;;  %v243_v6 = vld [vmem:[#allocation5 + $0x658] sm:$0xff] }
 0x14b   :  { %1897 = vmatpush1.msra.mxu1 %v1047_v9  ;;  %1859 = vmatprep.subr.mxu0 %v827_v11  ;;  %v659_v7 = vld [vmem:[#allocation5 + $0x1358] sm:$0xff] }
 0x14c   :  { %1898 = vmatprep.subr.mxu1 %v1035_v12  ;;  %1860 = vmatpush2.msra.mxu0 %v826_v13  ;;  %v231_v9 = vld [vmem:[#allocation5 + $0x5f8] sm:$0xff]  ;;  %v230_v12 = vld [vmem:[#allocation5 + $0x5f0] sm:$0xff] }
 0x14d   :  { %1899 = vmatpush1.msra.mxu1 %v1034_v14  ;;  %1861 = vmatprep.subr.mxu0 %v814_v15  ;;  %v647_v11 = vld [vmem:[#allocation5 + $0x12f8] sm:$0xff]  ;;  %v646_v13 = vld [vmem:[#allocation5 + $0x12f0] sm:$0xff] }
 0x14e   :  { %1900 = vmatprep.subr.mxu1 %v1022_v16  ;;  %1862 = vmatpush2.msra.mxu0 %v813_v18  ;;  %v218_v14 = vld [vmem:[#allocation5 + $0x590] sm:$0xff]  ;;  %v217_v16 = vld [vmem:[#allocation5 + $0x588] sm:$0xff] }
 0x14f   :  { %1901 = vmatpush1.msra.mxu1 %v1021_v19  ;;  %1863 = vmatprep.subr.mxu0 %v801_v21  ;;  %v634_v15 = vld [vmem:[#allocation5 + $0x1290] sm:$0xff]  ;;  %v633_v18 = vld [vmem:[#allocation5 + $0x1288] sm:$0xff] }
 0x150   :  { %1902 = vmatprep.subr.mxu1 %v1009_v22  ;;  %1864 = vmatpush2.msra.mxu0 %v800_v23  ;;  %v205_v19 = vld [vmem:[#allocation5 + $0x528] sm:$0xff]  ;;  %v204_v22 = vld [vmem:[#allocation5 + $0x520] sm:$0xff] }
 0x151   :  { %1903 = vmatpush1.msra.mxu1 %v1008_v24  ;;  %1865 = vmatprep.subr.mxu0 %v788_v25  ;;  %v621_v21 = vld [vmem:[#allocation5 + $0x1228] sm:$0xff]  ;;  %v620_v23 = vld [vmem:[#allocation5 + $0x1220] sm:$0xff]  ;;  %v191_v25 = vld [vmem:[#allocation5 + $0x4b8] sm:$0xff] }
 0x152   :  { %1904 = vmatprep.subr.mxu1 %v996_v26  ;;  %1866 = vmatpush2.msra.mxu0 %v787_v27  ;;  %v608_v24 = vld [vmem:[#allocation5 + $0x11c0] sm:$0xff]  ;;  %v607_v26 = vld [vmem:[#allocation5 + $0x11b8] sm:$0xff] }
 0x153   :  { %1905 = vmatpush1.msra.mxu1 %v995_v28  ;;  %1867 = vmatprep.subr.mxu0 %v775_v29  ;;  %v179_v27 = vld [vmem:[#allocation5 + $0x458] sm:$0xff]  ;;  %v178_v29 = vld [vmem:[#allocation5 + $0x450] sm:$0xff] }
 0x154   :  { %1906 = vmatprep.subr.mxu1 %v983_v30  ;;  %1868 = vmatpush2.msra.mxu0 %v774_v31  ;;  %v595_v28 = vld [vmem:[#allocation5 + $0x1158] sm:$0xff]  ;;  %v594_v30 = vld [vmem:[#allocation5 + $0x1150] sm:$0xff] }
 0x155   :  { %1907 = vmatpush1.msra.mxu1 %v982_v32  ;;  %1869 = vmatprep.subr.mxu0 %v762_v33  ;;  %v166_v31 = vld [vmem:[#allocation5 + $0x3f0] sm:$0xff]  ;;  %v165_v33 = vld [vmem:[#allocation5 + $0x3e8] sm:$0xff] }
 0x156   :  { %1908 = vmatprep.subr.mxu1 %v970_v34  ;;  %1870 = vmatpush2.msra.mxu0 %v761_v35  ;;  %v582_v32 = vld [vmem:[#allocation5 + $0x10f0] sm:$0xff]  ;;  %v581_v34 = vld [vmem:[#allocation5 + $0x10e8] sm:$0xff] }
 0x157   :  { %1909 = vmatpush1.msra.mxu1 %v969_v36  ;;  %1871 = vmatprep.subr.mxu0 %v749_v37  ;;  %v153_v35 = vld [vmem:[#allocation5 + $0x388] sm:$0xff]  ;;  %v1177_v37 = vpop.f32.mrf.mxu0 }
 0x158   :  { %1910 = vmatprep.subr.mxu1 %v957_v38  ;;  %1872 = vmatpush2.msra.mxu0 %v748_v39  ;;  %v569_v36 = vld [vmem:[#allocation5 + $0x1088] sm:$0xff]  ;;  %v152_v38 = vld [vmem:[#allocation5 + $0x380] sm:$0xff] }
 0x159   :  { %1911 = vmatpush1.msra.mxu1 %v956_v40  ;;  %1873 = vmatprep.subr.mxu0 %v736_v41  ;;  %v568_v39 = vld [vmem:[#allocation5 + $0x1080] sm:$0xff] }
 0x15a   :  { %1912 = vmatprep.subr.mxu1 %v944_v42  ;;  %1874 = vmatpush2.msra.mxu0 %v735_v43  ;;  %v140_v40 = vld [vmem:[#allocation5 + $0x320] sm:$0xff]  ;;  %v1248_v42 = vpop.f32.mrf.mxu1  ;;  %v139_v43 = vld [vmem:[#allocation5 + $0x318] sm:$0xff] }
 0x15b   :  { %1913 = vmatpush1.msra.mxu1 %v943_v44  ;;  %1875 = vmatprep.subr.mxu0 %v723_v45  ;;  %v556_v41 = vld [vmem:[#allocation5 + $0x1020] sm:$0xff]  ;;  %v555_v44 = vld [vmem:[#allocation5 + $0x1018] sm:$0xff] }
 0x15c   :  { %1914 = vmatprep.subr.mxu1 %v931_v46  ;;  %1876 = vmatpush2.msra.mxu0 %v722_v47  ;;  %v127_v45 = vld [vmem:[#allocation5 + $0x2b8] sm:$0xff]  ;;  %v1179_v47 = vpop.f32.mrf.mxu0 }
 0x15d   :  { %1915 = vmatpush1.msra.mxu1 %v930_v48  ;;  %1877 = vmatprep.subr.mxu0 %v710_v17  ;;  %v543_v46 = vld [vmem:[#allocation5 + $0xfb8] sm:$0xff]  ;;  %v126_v48 = vld [vmem:[#allocation5 + $0x2b0] sm:$0xff] }
 0x15e   :  { %1916 = vmatprep.subr.mxu1 %v918_v49  ;;  %1878 = vmatpush2.msra.mxu0 %v709_v50  ;;  %v542_v17 = vld [vmem:[#allocation5 + $0xfb0] sm:$0xff] }
 0x15f   :  { %1917 = vmatpush1.msra.mxu1 %v917_v51  ;;  %1879 = vmatprep.subr.mxu0 %v697_v53  ;;  %v114_v49 = vld [vmem:[#allocation5 + $0x250] sm:$0xff]  ;;  %v1250_v51 = vpop.f32.mrf.mxu1  ;;  %v1319_v53 = vpop.f32.mrf.mxu0 }
 0x160   :  { %1918 = vmatprep.subr.mxu1 %v905_v54  ;;  %1880 = vmatpush2.msra.mxu0 %v696_v56  ;;  %v530_v50 = vld [vmem:[#allocation5 + $0xf50] sm:$0xff]  ;;  %v113_v54 = vld [vmem:[#allocation5 + $0x248] sm:$0xff] }
 0x161   :  { %1919 = vmatpush1.msra.mxu1 %v904_v57  ;;  %1881 = vmatprep.subr.mxu0 %v684_v58  ;;  %v529_v56 = vld [vmem:[#allocation5 + $0xf48] sm:$0xff] }
 0x162   :  { %1920 = vmatprep.subr.mxu1 %v892_v59  ;;  %1882 = vmatpush2.msra.mxu0 %v683_v60  ;;  %v101_v57 = vld [vmem:[#allocation5 + $0x1e8] sm:$0xff]  ;;  %v100_v59 = vld [vmem:[#allocation5 + $0x1e0] sm:$0xff] }
 0x163   :  { %1921 = vmatpush1.msra.mxu1 %v891_v61  ;;  %1883 = vmatprep.subr.mxu0 %v671_v63  ;;  %v517_v58 = vld [vmem:[#allocation5 + $0xee8] sm:$0xff]  ;;  %v516_v60 = vld [vmem:[#allocation5 + $0xee0] sm:$0xff]  ;;  %v1390_v61 = vpop.f32.mrf.mxu1 }
 0x164   :  { %1922 = vmatprep.subr.mxu1 %v879_v0  ;;  %1884 = vmatpush2.msra.mxu0 %v670_v2  ;;  %v88_v63 = vld [vmem:[#allocation5 + $0x180] sm:$0xff]  ;;  %v1321_v2 = vpop.f32.mrf.mxu0 }
 0x165   :  { %1885 = vmatprep.mubr.f32.mxu0 %v2938_v10  ;;  %1923 = vmatpush1.msra.mxu1 %v878_v3  ;;  %v504_v0 = vld [vmem:[#allocation5 + $0xe80] sm:$0xff]  ;;  %v87_v3 = vld [vmem:[#allocation5 + $0x178] sm:$0xff] }
 0x166   :  { %1886 = vmatmul.mubr.f32.vlgmr.msra.gmra.mxu0 %v2930_v1  ;;  %1956 = vmatprep.mubr.f32.mxu1 %v2900_v20 }
 0x167   :  { %1963 = vmatprep.subr.mxu0 %v244_v4  ;;  %2034 = vmatprep.subr.mxu1 %v660_v5  ;;  %v503_v4 = vld [vmem:[#allocation5 + $0xe78] sm:$0xff]  ;;  %v1251_v5 = vadd.f32 %v1250_v51, %v1179_v47  ;;  %v425_v47 = vld [vmem:[#allocation5 + $0xc08] sm:$0xff]  ;;  %v412_v51 = vld [vmem:[#allocation5 + $0xba0] sm:$0xff] }
 0x168   :  { %1957 = vmatmul.mubr.f32.vlgmr.msra.gmra.mxu1 %v2959_v55  ;;  %1964 = vmatpush1.msra.mxu0 %v243_v6  ;;  %v192_v55 = vld [vmem:[#allocation5 + $0x4c0] sm:$0xff]  ;;  %v75_v6 = vld [vmem:[#allocation5 + $0x118] sm:$0xff] }
 0x169   :  { %2035 = vmatpush1.msra.mxu1 %v659_v7  ;;  %1965 = vmatprep.subr.mxu0 %v231_v9  ;;  %v491_v7 = vld [vmem:[#allocation5 + $0xe18] sm:$0xff]  ;;  %v1392_v9 = vpop.f32.mrf.mxu1 }
 0x16a   :  { %2036 = vmatprep.subr.mxu1 %v647_v11  ;;  %1966 = vmatpush1.msra.mxu0 %v230_v12  ;;  %v74_v11 = vld [vmem:[#allocation5 + $0x110] sm:$0xff] }
 0x16b   :  { %2037 = vmatpush1.msra.mxu1 %v646_v13  ;;  %1967 = vmatprep.subr.mxu0 %v218_v14  ;;  %v490_v12 = vld [vmem:[#allocation5 + $0xe10] sm:$0xff]  ;;  %v1249_v14 = vadd.f32 %v1248_v42, %v1177_v37  ;;  %v867_v37 = vld [vmem:[#allocation5 + $0x19d8] sm:$0xff] }
 0x16c   :  { %2038 = vmatprep.subr.mxu1 %v634_v15  ;;  %1968 = vmatpush1.msra.mxu0 %v217_v16  ;;  %v1322_v15 = vadd.f32 %v1321_v2, %v1251_v5  ;;  %v62_v16 = vld [vmem:[#allocation5 + $0xb0] sm:$0xff]  ;;  %v361_v5 = vld [vmem:[#allocation5 + $0xa08] sm:$0xff] }
 0x16d   :  { %2039 = vmatpush1.msra.mxu1 %v633_v18  ;;  %1969 = vmatprep.subr.mxu0 %v205_v19  ;;  %v478_v18 = vld [vmem:[#allocation5 + $0xdb0] sm:$0xff] }
 0x16e   :  { %2040 = vmatprep.subr.mxu1 %v621_v21  ;;  %1970 = vmatpush1.msra.mxu0 %v204_v22  ;;  %v61_v21 = vld [vmem:[#allocation5 + $0xa8] sm:$0xff]  ;;  %v854_v42 = vld [vmem:[#allocation5 + $0x1970] sm:$0xff] }
 0x16f   :  { %2041 = vmatpush1.msra.mxu1 %v620_v23  ;;  %1971 = vmatprep.subr.mxu0 %v192_v55  ;;  %v477_v22 = vld [vmem:[#allocation5 + $0xda8] sm:$0xff]  ;;  %v790_v2 = vld [vmem:[#allocation5 + $0x1770] sm:$0xff] }
 0x170   :  { %2042 = vmatprep.subr.mxu1 %v608_v24  ;;  %1972 = vmatpush1.msra.mxu0 %v191_v25  ;;  %v1320_v24 = vadd.f32 %v1319_v53, %v1249_v14  ;;  %v49_v25 = vld [vmem:[#allocation5 + $0x48] sm:$0xff]  ;;  %v828_v53 = vld [vmem:[#allocation5 + $0x18a0] sm:$0xff]  ;;  %v763_v14 = vld [vmem:[#allocation5 + $0x1698] sm:$0xff] }
 0x171   :  { %2043 = vmatpush1.msra.mxu1 %v607_v26  ;;  %1973 = vmatprep.subr.mxu0 %v179_v27  ;;  %v465_v26 = vld [vmem:[#allocation5 + $0xd48] sm:$0xff] }
 0x172   :  { %2044 = vmatprep.subr.mxu1 %v595_v28  ;;  %1974 = vmatpush1.msra.mxu0 %v178_v29  ;;  %v48_v28 = vld [vmem:[#allocation5 + $0x40] sm:$0xff] }
 0x173   :  { %2045 = vmatpush1.msra.mxu1 %v594_v30  ;;  %1975 = vmatprep.subr.mxu0 %v166_v31  ;;  %v464_v29 = vld [vmem:[#allocation5 + $0xd40] sm:$0xff]  ;;  %v2612_v31 = vcombine.low %v1320_v24, %v1322_v15  ;;  %v335_v15 = vld [vmem:[#allocation5 + $0x938] sm:$0xff]  ;;  %v309_v24 = vld [vmem:[#allocation5 + $0x868] sm:$0xff] }
 0x174   :  { %2046 = vmatprep.subr.mxu1 %v582_v32  ;;  %1976 = vmatpush1.msra.mxu0 %v165_v33  ;;  %v452_v32 = vld [vmem:[#allocation5 + $0xce0] sm:$0xff] }
 0x175   :  { %2047 = vmatpush1.msra.mxu1 %v581_v34  ;;  %1977 = vmatprep.subr.mxu0 %v153_v35  ;;  %v868_v33 = vld [vmem:[#allocation5 + $0x19e0] sm:$0xff] }
 0x176   :  { %2048 = vmatprep.subr.mxu1 %v569_v36  ;;  %1978 = vmatpush1.msra.mxu0 %v152_v38  ;;  %v451_v36 = vld [vmem:[#allocation5 + $0xcd8] sm:$0xff] }
 0x177   :  { %2049 = vmatpush1.msra.mxu1 %v568_v39  ;;  %1979 = vmatprep.subr.mxu0 %v140_v40  ;;  %v439_v38 = vld [vmem:[#allocation5 + $0xc78] sm:$0xff] }
 0x178   :  { %2050 = vmatprep.subr.mxu1 %v556_v41  ;;  %1980 = vmatpush1.msra.mxu0 %v139_v43  ;;  %v855_v39 = vld [vmem:[#allocation5 + $0x1978] sm:$0xff]  ;;  %v438_v41 = vld [vmem:[#allocation5 + $0xc70] sm:$0xff]  ;;  %v2620_v43 = vrot.slane %v2612_v31, %v2924_v52 }
 0x179   :  { %2051 = vmatpush1.msra.mxu1 %v555_v44  ;;  %1981 = vmatprep.subr.mxu0 %v127_v45  ;;  %v426_v45 = vld [vmem:[#allocation5 + $0xc10] sm:$0xff]  ;;  %v711_v31 = vld [vmem:[#allocation5 + $0x14f8] sm:$0xff] }
 0x17a   :  { %2052 = vmatprep.subr.mxu1 %v543_v46  ;;  %1982 = vmatpush1.msra.mxu0 %v126_v48  ;;  %v842_v46 = vld [vmem:[#allocation5 + $0x1910] sm:$0xff]  ;;  %v841_v48 = vld [vmem:[#allocation5 + $0x1908] sm:$0xff] }
 0x17b   :  { %2053 = vmatpush1.msra.mxu1 %v542_v17  ;;  %1983 = vmatprep.subr.mxu0 %v114_v49  ;;  %v413_v49 = vld [vmem:[#allocation5 + $0xba8] sm:$0xff] }
 0x17c   :  { %2054 = vmatprep.subr.mxu1 %v530_v50  ;;  %1984 = vmatpush1.msra.mxu0 %v113_v54  ;;  %v829_v50 = vld [vmem:[#allocation5 + $0x18a8] sm:$0xff]  ;;  %v400_v54 = vld [vmem:[#allocation5 + $0xb40] sm:$0xff] }
 0x17d   :  { %2055 = vmatpush1.msra.mxu1 %v529_v56  ;;  %1985 = vmatprep.subr.mxu0 %v101_v57  ;;  %v816_v56 = vld [vmem:[#allocation5 + $0x1840] sm:$0xff]  ;;  %v399_v57 = vld [vmem:[#allocation5 + $0xb38] sm:$0xff] }
 0x17e   :  { %2056 = vmatprep.subr.mxu1 %v517_v58  ;;  %1986 = vmatpush1.msra.mxu0 %v100_v59  ;;  %v815_v58 = vld [vmem:[#allocation5 + $0x1838] sm:$0xff] }
 0x17f   :  { %2057 = vmatpush1.msra.mxu1 %v516_v60  ;;  %1987 = vmatprep.subr.mxu0 %v88_v63  ;;  %v387_v59 = vld [vmem:[#allocation5 + $0xad8] sm:$0xff]  ;;  %v802_v63 = vld [vmem:[#allocation5 + $0x17d0] sm:$0xff] }
 0x180   :  { %2058 = vmatprep.subr.mxu1 %v504_v0  ;;  %v1461_v13 = vpop.f32.mrf.mxu0  ;;  %1988 = vmatpush1.msra.mxu0 %v87_v3  ;;  %v803_v60 = vld [vmem:[#allocation5 + $0x17d8] sm:$0xff]  ;;  %v374_v0 = vld [vmem:[#allocation5 + $0xa70] sm:$0xff]  ;;  %v373_v3 = vld [vmem:[#allocation5 + $0xa68] sm:$0xff] }
 0x181   :  { %2059 = vmatpush1.msra.mxu1 %v503_v4  ;;  %v1462_v19 = vadd.f32 %v1461_v13, %v1390_v61  ;;  %1989 = vmatprep.subr.mxu0 %v75_v6  ;;  %v386_v61 = vld [vmem:[#allocation5 + $0xad0] sm:$0xff]  ;;  %v789_v4 = vld [vmem:[#allocation5 + $0x1768] sm:$0xff]  ;;  %v347_v13 = vld [vmem:[#allocation5 + $0x998] sm:$0xff] }
 0x182   :  { %2060 = vmatprep.subr.mxu1 %v491_v7  ;;  %v1463_v23 = vpop.f32.mrf.mxu0  ;;  %v1532_v55 = vpop.f32.mrf.mxu1  ;;  %1990 = vmatpush1.msra.mxu0 %v74_v11  ;;  %v777_v6 = vld [vmem:[#allocation5 + $0x1708] sm:$0xff]  ;;  %v360_v7 = vld [vmem:[#allocation5 + $0xa00] sm:$0xff] }
 0x183   :  { %2061 = vmatpush1.msra.mxu1 %v490_v12  ;;  %v1464_v27 = vadd.f32 %v1463_v23, %v1392_v9  ;;  %1991 = vmatprep.subr.mxu0 %v62_v16  ;;  %v1533_v34 = vadd.f32 %v1532_v55, %v1462_v19  ;;  %v776_v9 = vld [vmem:[#allocation5 + $0x1700] sm:$0xff]  ;;  %v751_v16 = vld [vmem:[#allocation5 + $0x1638] sm:$0xff]  ;;  %v750_v19 = vld [vmem:[#allocation5 + $0x1630] sm:$0xff] }
 0x184   :  { %2062 = vmatprep.subr.mxu1 %v478_v18  ;;  %v1534_v30 = vpop.f32.mrf.mxu1  ;;  %1992 = vmatpush1.msra.mxu0 %v61_v21  ;;  %v348_v11 = vld [vmem:[#allocation5 + $0x9a0] sm:$0xff]  ;;  %v334_v18 = vld [vmem:[#allocation5 + $0x930] sm:$0xff]  ;;  %v321_v23 = vld [vmem:[#allocation5 + $0x8c8] sm:$0xff] }
 0x185   :  { %2063 = vmatpush1.msra.mxu1 %v477_v22  ;;  %v1535_v35 = vadd.f32 %v1534_v30, %v1464_v27  ;;  %1993 = vmatprep.subr.mxu0 %v49_v25  ;;  %v764_v12 = vld [vmem:[#allocation5 + $0x16a0] sm:$0xff]  ;;  %v322_v21 = vld [vmem:[#allocation5 + $0x8d0] sm:$0xff]  ;;  %v737_v55 = vld [vmem:[#allocation5 + $0x15c8] sm:$0xff] }
 0x186   :  { %2064 = vmatprep.subr.mxu1 %v465_v26  ;;  %1994 = vmatpush1.msra.mxu0 %v48_v28  ;;  %v738_v22 = vld [vmem:[#allocation5 + $0x15d0] sm:$0xff]  ;;  %v725_v25 = vld [vmem:[#allocation5 + $0x1568] sm:$0xff]  ;;  %v308_v26 = vld [vmem:[#allocation5 + $0x860] sm:$0xff] }
 0x187   :  { %2065 = vmatpush1.msra.mxu1 %v464_v29  ;;  %v2613_v40 = vcombine.low %v1533_v34, %v1535_v35  ;;  %1995 = vmatprep.subr.mxu0 %v452_v32  ;;  %v724_v27 = vld [vmem:[#allocation5 + $0x1560] sm:$0xff]  ;;  %v295_v30 = vld [vmem:[#allocation5 + $0x7f8] sm:$0xff]  ;;  %v282_v34 = vld [vmem:[#allocation5 + $0x790] sm:$0xff] }
 0x188   :  { %2066 = vmatprep.subr.mxu1 %v868_v33  ;;  %1996 = vmatpush2.msra.mxu0 %v451_v36  ;;  %v296_v28 = vld [vmem:[#allocation5 + $0x800] sm:$0xff]  ;;  %v283_v32 = vld [vmem:[#allocation5 + $0x798] sm:$0xff]  ;;  %v698_v35 = vld [vmem:[#allocation5 + $0x1490] sm:$0xff] }
 0x189   :  { %2067 = vmatpush2.msra.mxu1 %v867_v37  ;;  %v2627_v44 = vrot.slane %v2613_v40, %v2924_v52  ;;  %1997 = vmatprep.subr.mxu0 %v439_v38  ;;  %v712_v29 = vld [vmem:[#allocation5 + $0x1500] sm:$0xff]  ;;  %v699_v33 = vld [vmem:[#allocation5 + $0x1498] sm:$0xff]  ;;  %v270_v36 = vld [vmem:[#allocation5 + $0x730] sm:$0xff] }
 0x18a   :  { %2068 = vmatprep.subr.mxu1 %v855_v39  ;;  %1998 = vmatpush2.msra.mxu0 %v438_v41  ;;  %v686_v37 = vld [vmem:[#allocation5 + $0x1430] sm:$0xff]  ;;  %v269_v38 = vld [vmem:[#allocation5 + $0x728] sm:$0xff] }
 0x18b   :  { %2069 = vmatpush2.msra.mxu1 %v854_v42  ;;  %v2628_v17 = vcombine.low %v2620_v43, %v2627_v44  ;;  %1999 = vmatprep.subr.mxu0 %v426_v45  ;;  %v685_v39 = vld [vmem:[#allocation5 + $0x1428] sm:$0xff]  ;;  %v256_v42 = vld [vmem:[#allocation5 + $0x6c0] sm:$0xff]  ;;  %v246_v45 = vld [vmem:[#allocation5 + $0x670] sm:$0xff] }
 0x18c   :  { %2070 = vmatprep.subr.mxu1 %v842_v46  ;;  %2000 = vmatpush2.msra.mxu0 %v425_v47  ;;  %v257_v40 = vld [vmem:[#allocation5 + $0x6c8] sm:$0xff]  ;;  %v672_v43 = vld [vmem:[#allocation5 + $0x13c0] sm:$0xff]  ;;  %v1075_v46 = vld [vmem:[#allocation5 + $0x2058] sm:$0xff] }
 0x18d   :  { %2674 = vst [vmem:[#allocation7] sm:$0xff] %v2628_v17  ;;  %2071 = vmatpush2.msra.mxu1 %v841_v48  ;;  %2001 = vmatprep.subr.mxu0 %v413_v49  ;;  %v673_v41 = vld [vmem:[#allocation5 + $0x13c8] sm:$0xff]  ;;  %v1076_v44 = vld [vmem:[#allocation5 + $0x2060] sm:$0xff]  ;;  %v1063_v48 = vld [vmem:[#allocation5 + $0x1ff8] sm:$0xff] }
 0x18e   :  { %2072 = vmatprep.subr.mxu1 %v829_v50  ;;  %2002 = vmatpush2.msra.mxu0 %v412_v51  ;;  %v245_v47 = vld [vmem:[#allocation5 + $0x668] sm:$0xff]  ;;  %v1062_v49 = vld [vmem:[#allocation5 + $0x1ff0] sm:$0xff]  ;;  %v232_v50 = vld [vmem:[#allocation5 + $0x600] sm:$0xff] }
 0x18f   :  { %2073 = vmatpush2.msra.mxu1 %v828_v53  ;;  %2003 = vmatprep.subr.mxu0 %v400_v54  ;;  %v233_v17 = vld [vmem:[#allocation5 + $0x608] sm:$0xff]  ;;  %v1050_v51 = vld [vmem:[#allocation5 + $0x1f90] sm:$0xff]  ;;  %v220_v53 = vld [vmem:[#allocation5 + $0x5a0] sm:$0xff] }
 0x190   :  { %2074 = vmatprep.subr.mxu1 %v816_v56  ;;  %2004 = vmatpush2.msra.mxu0 %v399_v57  ;;  %v1049_v54 = vld [vmem:[#allocation5 + $0x1f88] sm:$0xff]  ;;  %v219_v56 = vld [vmem:[#allocation5 + $0x598] sm:$0xff] }
 0x191   :  { %2075 = vmatpush2.msra.mxu1 %v815_v58  ;;  %2005 = vmatprep.subr.mxu0 %v387_v59  ;;  %v1037_v57 = vld [vmem:[#allocation5 + $0x1f28] sm:$0xff]  ;;  %v207_v58 = vld [vmem:[#allocation5 + $0x538] sm:$0xff]  ;;  %v1036_v59 = vld [vmem:[#allocation5 + $0x1f20] sm:$0xff] }
 0x192   :  { %2076 = vmatprep.subr.mxu1 %v803_v60  ;;  %2006 = vmatpush2.msra.mxu0 %v386_v61  ;;  %v206_v60 = vld [vmem:[#allocation5 + $0x530] sm:$0xff]  ;;  %v1024_v61 = vld [vmem:[#allocation5 + $0x1ec0] sm:$0xff] }
 0x193   :  { %2077 = vmatpush2.msra.mxu1 %v802_v63  ;;  %2007 = vmatprep.subr.mxu0 %v374_v0  ;;  %v194_v63 = vld [vmem:[#allocation5 + $0x4d0] sm:$0xff]  ;;  %v1023_v0 = vld [vmem:[#allocation5 + $0x1eb8] sm:$0xff] }
 0x194   :  { %2078 = vmatprep.subr.mxu1 %v790_v2  ;;  %2008 = vmatpush2.msra.mxu0 %v373_v3  ;;  %v193_v2 = vld [vmem:[#allocation5 + $0x4c8] sm:$0xff]  ;;  %v1011_v3 = vld [vmem:[#allocation5 + $0x1e58] sm:$0xff] }
 0x195   :  { %2079 = vmatpush2.msra.mxu1 %v789_v4  ;;  %2009 = vmatprep.subr.mxu0 %v361_v5  ;;  %v181_v4 = vld [vmem:[#allocation5 + $0x468] sm:$0xff]  ;;  %v1010_v5 = vld [vmem:[#allocation5 + $0x1e50] sm:$0xff] }
 0x196   :  { %2080 = vmatprep.subr.mxu1 %v777_v6  ;;  %2010 = vmatpush2.msra.mxu0 %v360_v7  ;;  %v180_v6 = vld [vmem:[#allocation5 + $0x460] sm:$0xff]  ;;  %v998_v7 = vld [vmem:[#allocation5 + $0x1df0] sm:$0xff] }
 0x197   :  { %2081 = vmatpush2.msra.mxu1 %v776_v9  ;;  %2011 = vmatprep.subr.mxu0 %v348_v11  ;;  %v168_v9 = vld [vmem:[#allocation5 + $0x400] sm:$0xff]  ;;  %v997_v11 = vld [vmem:[#allocation5 + $0x1de8] sm:$0xff] }
 0x198   :  { %2082 = vmatprep.subr.mxu1 %v764_v12  ;;  %2012 = vmatpush2.msra.mxu0 %v347_v13  ;;  %v167_v12 = vld [vmem:[#allocation5 + $0x3f8] sm:$0xff]  ;;  %v985_v13 = vld [vmem:[#allocation5 + $0x1d88] sm:$0xff] }
 0x199   :  { %2083 = vmatpush2.msra.mxu1 %v763_v14  ;;  %2013 = vmatprep.subr.mxu0 %v335_v15  ;;  %v155_v14 = vld [vmem:[#allocation5 + $0x398] sm:$0xff]  ;;  %v984_v15 = vld [vmem:[#allocation5 + $0x1d80] sm:$0xff] }
 0x19a   :  { %2084 = vmatprep.subr.mxu1 %v751_v16  ;;  %2014 = vmatpush2.msra.mxu0 %v334_v18  ;;  %v154_v16 = vld [vmem:[#allocation5 + $0x390] sm:$0xff]  ;;  %v972_v18 = vld [vmem:[#allocation5 + $0x1d20] sm:$0xff] }
 0x19b   :  { %2085 = vmatpush2.msra.mxu1 %v750_v19  ;;  %2015 = vmatprep.subr.mxu0 %v322_v21  ;;  %v142_v19 = vld [vmem:[#allocation5 + $0x330] sm:$0xff]  ;;  %v971_v21 = vld [vmem:[#allocation5 + $0x1d18] sm:$0xff] }
 0x19c   :  { %2086 = vmatprep.subr.mxu1 %v738_v22  ;;  %2016 = vmatpush2.msra.mxu0 %v321_v23  ;;  %v141_v22 = vld [vmem:[#allocation5 + $0x328] sm:$0xff]  ;;  %v959_v23 = vld [vmem:[#allocation5 + $0x1cb8] sm:$0xff] }
 0x19d   :  { %2087 = vmatpush2.msra.mxu1 %v737_v55  ;;  %2017 = vmatprep.subr.mxu0 %v309_v24  ;;  %v129_v55 = vld [vmem:[#allocation5 + $0x2c8] sm:$0xff]  ;;  %v958_v24 = vld [vmem:[#allocation5 + $0x1cb0] sm:$0xff] }
 0x19e   :  { %2088 = vmatprep.subr.mxu1 %v725_v25  ;;  %2018 = vmatpush2.msra.mxu0 %v308_v26  ;;  %v128_v25 = vld [vmem:[#allocation5 + $0x2c0] sm:$0xff]  ;;  %v946_v26 = vld [vmem:[#allocation5 + $0x1c50] sm:$0xff] }
 0x19f   :  { %2089 = vmatpush2.msra.mxu1 %v724_v27  ;;  %2019 = vmatprep.subr.mxu0 %v296_v28  ;;  %v116_v27 = vld [vmem:[#allocation5 + $0x260] sm:$0xff]  ;;  %v945_v28 = vld [vmem:[#allocation5 + $0x1c48] sm:$0xff] }
 0x1a0   :  { %2090 = vmatprep.subr.mxu1 %v712_v29  ;;  %2020 = vmatpush2.msra.mxu0 %v295_v30  ;;  %v115_v29 = vld [vmem:[#allocation5 + $0x258] sm:$0xff]  ;;  %v933_v30 = vld [vmem:[#allocation5 + $0x1be8] sm:$0xff] }
 0x1a1   :  { %2091 = vmatpush2.msra.mxu1 %v711_v31  ;;  %2021 = vmatprep.subr.mxu0 %v283_v32  ;;  %v103_v31 = vld [vmem:[#allocation5 + $0x1f8] sm:$0xff]  ;;  %v932_v32 = vld [vmem:[#allocation5 + $0x1be0] sm:$0xff] }
 0x1a2   :  { %2092 = vmatprep.subr.mxu1 %v699_v33  ;;  %2022 = vmatpush2.msra.mxu0 %v282_v34  ;;  %v102_v33 = vld [vmem:[#allocation5 + $0x1f0] sm:$0xff]  ;;  %v920_v34 = vld [vmem:[#allocation5 + $0x1b80] sm:$0xff] }
 0x1a3   :  { %2093 = vmatpush2.msra.mxu1 %v698_v35  ;;  %2023 = vmatprep.subr.mxu0 %v270_v36  ;;  %v90_v35 = vld [vmem:[#allocation5 + $0x190] sm:$0xff]  ;;  %v919_v36 = vld [vmem:[#allocation5 + $0x1b78] sm:$0xff] }
 0x1a4   :  { %2094 = vmatprep.subr.mxu1 %v686_v37  ;;  %2024 = vmatpush2.msra.mxu0 %v269_v38  ;;  %v89_v37 = vld [vmem:[#allocation5 + $0x188] sm:$0xff]  ;;  %v907_v38 = vld [vmem:[#allocation5 + $0x1b18] sm:$0xff] }
 0x1a5   :  { %2095 = vmatpush2.msra.mxu1 %v685_v39  ;;  %2025 = vmatprep.subr.mxu0 %v257_v40  ;;  %v77_v39 = vld [vmem:[#allocation5 + $0x128] sm:$0xff]  ;;  %v906_v40 = vld [vmem:[#allocation5 + $0x1b10] sm:$0xff] }
 0x1a6   :  { %2096 = vmatprep.subr.mxu1 %v673_v41  ;;  %2026 = vmatpush2.msra.mxu0 %v256_v42  ;;  %v76_v41 = vld [vmem:[#allocation5 + $0x120] sm:$0xff]  ;;  %v894_v42 = vld [vmem:[#allocation5 + $0x1ab0] sm:$0xff] }
 0x1a7   :  { %2027 = vmatprep.mubr.f32.mxu0 %v2934_v8  ;;  %2097 = vmatpush2.msra.mxu1 %v672_v43  ;;  %v64_v43 = vld [vmem:[#allocation5 + $0xc0] sm:$0xff] }
 0x1a8   :  { %2098 = vmatprep.mubr.f32.mxu1 %v2938_v10  ;;  %2028 = vmatmul.mubr.f32.vlgmr.msra.gmra.mxu0 %v2927_v62 }
 0x1a9   :  { %2099 = vmatmul.mubr.f32.vlgmr.msra.gmra.mxu1 %v2930_v1  ;;  %2105 = vmatprep.subr.mxu0 %v1076_v44  ;;  %v893_v44 = vld [vmem:[#allocation5 + $0x1aa8] sm:$0xff] }
 0x1aa   :  { %2176 = vmatprep.subr.mxu1 %v246_v45  ;;  %2106 = vmatpush1.msra.mxu0 %v1075_v46  ;;  %v63_v45 = vld [vmem:[#allocation5 + $0xb8] sm:$0xff]  ;;  %v881_v46 = vld [vmem:[#allocation5 + $0x1a48] sm:$0xff] }
 0x1ab   :  { %2177 = vmatpush1.msra.mxu1 %v245_v47  ;;  %2107 = vmatprep.subr.mxu0 %v1063_v48  ;;  %v51_v47 = vld [vmem:[#allocation5 + $0x58] sm:$0xff]  ;;  %v880_v48 = vld [vmem:[#allocation5 + $0x1a40] sm:$0xff] }
 0x1ac   :  { %2178 = vmatprep.subr.mxu1 %v233_v17  ;;  %2108 = vmatpush1.msra.mxu0 %v1062_v49  ;;  %v50_v17 = vld [vmem:[#allocation5 + $0x50] sm:$0xff] }
 0x1ad   :  { %2179 = vmatpush1.msra.mxu1 %v232_v50  ;;  %2109 = vmatprep.subr.mxu0 %v1050_v51  ;;  %v454_v49 = vld [vmem:[#allocation5 + $0xcf0] sm:$0xff]  ;;  %v453_v51 = vld [vmem:[#allocation5 + $0xce8] sm:$0xff] }
 0x1ae   :  { %2180 = vmatprep.subr.mxu1 %v220_v53  ;;  %2110 = vmatpush1.msra.mxu0 %v1049_v54  ;;  %v662_v50 = vld [vmem:[#allocation5 + $0x1370] sm:$0xff]  ;;  %v661_v53 = vld [vmem:[#allocation5 + $0x1368] sm:$0xff]  ;;  %v2975_v54 = vld.sshfl [vmem:[#allocation2 + $0x8] sm:$0x3 pattern:$0x76325410] }
 0x1af   :  { %2181 = vmatpush1.msra.mxu1 %v219_v56  ;;  %2111 = vmatprep.subr.mxu0 %v1037_v57  ;;  %v441_v56 = vld [vmem:[#allocation5 + $0xc88] sm:$0xff] }
 0x1b0   :  { %2182 = vmatprep.subr.mxu1 %v207_v58  ;;  %2112 = vmatpush1.msra.mxu0 %v1036_v59  ;;  %v649_v57 = vld [vmem:[#allocation5 + $0x1308] sm:$0xff]  ;;  %v440_v58 = vld [vmem:[#allocation5 + $0xc80] sm:$0xff] }
 0x1b1   :  { %2183 = vmatpush1.msra.mxu1 %v206_v60  ;;  %2113 = vmatprep.subr.mxu0 %v1024_v61  ;;  %v648_v59 = vld [vmem:[#allocation5 + $0x1300] sm:$0xff] }
 0x1b2   :  { %2184 = vmatprep.subr.mxu1 %v194_v63  ;;  %2114 = vmatpush1.msra.mxu0 %v1023_v0  ;;  %v428_v60 = vld [vmem:[#allocation5 + $0xc20] sm:$0xff]  ;;  %v427_v63 = vld [vmem:[#allocation5 + $0xc18] sm:$0xff] }
 0x1b3   :  { %2185 = vmatpush1.msra.mxu1 %v193_v2  ;;  %2115 = vmatprep.subr.mxu0 %v1011_v3  ;;  %v636_v61 = vld [vmem:[#allocation5 + $0x12a0] sm:$0xff]  ;;  %v635_v0 = vld [vmem:[#allocation5 + $0x1298] sm:$0xff] }
 0x1b4   :  { %2186 = vmatprep.subr.mxu1 %v181_v4  ;;  %2116 = vmatpush1.msra.mxu0 %v1010_v5  ;;  %v415_v2 = vld [vmem:[#allocation5 + $0xbb8] sm:$0xff]  ;;  %v414_v4 = vld [vmem:[#allocation5 + $0xbb0] sm:$0xff] }
 0x1b5   :  { %2187 = vmatpush1.msra.mxu1 %v180_v6  ;;  %2117 = vmatprep.subr.mxu0 %v998_v7  ;;  %v623_v3 = vld [vmem:[#allocation5 + $0x1238] sm:$0xff]  ;;  %v622_v5 = vld [vmem:[#allocation5 + $0x1230] sm:$0xff] }
 0x1b6   :  { %2188 = vmatprep.subr.mxu1 %v168_v9  ;;  %2118 = vmatpush1.msra.mxu0 %v997_v11  ;;  %v402_v6 = vld [vmem:[#allocation5 + $0xb50] sm:$0xff]  ;;  %v401_v9 = vld [vmem:[#allocation5 + $0xb48] sm:$0xff] }
 0x1b7   :  { %2189 = vmatpush1.msra.mxu1 %v167_v12  ;;  %2119 = vmatprep.subr.mxu0 %v985_v13  ;;  %v610_v7 = vld [vmem:[#allocation5 + $0x11d0] sm:$0xff]  ;;  %v609_v11 = vld [vmem:[#allocation5 + $0x11c8] sm:$0xff] }
 0x1b8   :  { %2190 = vmatprep.subr.mxu1 %v155_v14  ;;  %2120 = vmatpush1.msra.mxu0 %v984_v15  ;;  %v389_v12 = vld [vmem:[#allocation5 + $0xae8] sm:$0xff]  ;;  %v388_v14 = vld [vmem:[#allocation5 + $0xae0] sm:$0xff] }
 0x1b9   :  { %2191 = vmatpush1.msra.mxu1 %v154_v16  ;;  %2121 = vmatprep.subr.mxu0 %v972_v18  ;;  %v597_v13 = vld [vmem:[#allocation5 + $0x1168] sm:$0xff]  ;;  %v596_v15 = vld [vmem:[#allocation5 + $0x1160] sm:$0xff] }
 0x1ba   :  { %2192 = vmatprep.subr.mxu1 %v142_v19  ;;  %2122 = vmatpush1.msra.mxu0 %v971_v21  ;;  %v376_v16 = vld [vmem:[#allocation5 + $0xa80] sm:$0xff]  ;;  %v375_v19 = vld [vmem:[#allocation5 + $0xa78] sm:$0xff] }
 0x1bb   :  { %2193 = vmatpush1.msra.mxu1 %v141_v22  ;;  %2123 = vmatprep.subr.mxu0 %v959_v23  ;;  %v584_v18 = vld [vmem:[#allocation5 + $0x1100] sm:$0xff]  ;;  %v583_v21 = vld [vmem:[#allocation5 + $0x10f8] sm:$0xff] }
 0x1bc   :  { %2194 = vmatprep.subr.mxu1 %v129_v55  ;;  %2124 = vmatpush1.msra.mxu0 %v958_v24  ;;  %v363_v22 = vld [vmem:[#allocation5 + $0xa18] sm:$0xff]  ;;  %v362_v55 = vld [vmem:[#allocation5 + $0xa10] sm:$0xff] }
 0x1bd   :  { %2195 = vmatpush1.msra.mxu1 %v128_v25  ;;  %2125 = vmatprep.subr.mxu0 %v946_v26  ;;  %v571_v23 = vld [vmem:[#allocation5 + $0x1098] sm:$0xff]  ;;  %v570_v24 = vld [vmem:[#allocation5 + $0x1090] sm:$0xff] }
 0x1be   :  { %2196 = vmatprep.subr.mxu1 %v116_v27  ;;  %2126 = vmatpush1.msra.mxu0 %v945_v28  ;;  %v350_v25 = vld [vmem:[#allocation5 + $0x9b0] sm:$0xff]  ;;  %v349_v27 = vld [vmem:[#allocation5 + $0x9a8] sm:$0xff] }
 0x1bf   :  { %2197 = vmatpush1.msra.mxu1 %v115_v29  ;;  %2127 = vmatprep.subr.mxu0 %v933_v30  ;;  %v558_v26 = vld [vmem:[#allocation5 + $0x1030] sm:$0xff]  ;;  %v557_v28 = vld [vmem:[#allocation5 + $0x1028] sm:$0xff] }
 0x1c0   :  { %2198 = vmatprep.subr.mxu1 %v103_v31  ;;  %2128 = vmatpush1.msra.mxu0 %v932_v32  ;;  %v337_v29 = vld [vmem:[#allocation5 + $0x948] sm:$0xff]  ;;  %v336_v31 = vld [vmem:[#allocation5 + $0x940] sm:$0xff] }
 0x1c1   :  { %2199 = vmatpush1.msra.mxu1 %v102_v33  ;;  %2129 = vmatprep.subr.mxu0 %v920_v34  ;;  %v545_v30 = vld [vmem:[#allocation5 + $0xfc8] sm:$0xff]  ;;  %v544_v32 = vld [vmem:[#allocation5 + $0xfc0] sm:$0xff] }
 0x1c2   :  { %2200 = vmatprep.subr.mxu1 %v90_v35  ;;  %2130 = vmatpush1.msra.mxu0 %v919_v36  ;;  %v324_v33 = vld [vmem:[#allocation5 + $0x8e0] sm:$0xff]  ;;  %v323_v35 = vld [vmem:[#allocation5 + $0x8d8] sm:$0xff] }
 0x1c3   :  { %2201 = vmatpush1.msra.mxu1 %v89_v37  ;;  %2131 = vmatprep.subr.mxu0 %v907_v38  ;;  %v532_v34 = vld [vmem:[#allocation5 + $0xf60] sm:$0xff]  ;;  %v531_v36 = vld [vmem:[#allocation5 + $0xf58] sm:$0xff] }
 0x1c4   :  { %2202 = vmatprep.subr.mxu1 %v77_v39  ;;  %2132 = vmatpush1.msra.mxu0 %v906_v40  ;;  %v311_v37 = vld [vmem:[#allocation5 + $0x878] sm:$0xff]  ;;  %v310_v39 = vld [vmem:[#allocation5 + $0x870] sm:$0xff] }
 0x1c5   :  { %2203 = vmatpush1.msra.mxu1 %v76_v41  ;;  %2133 = vmatprep.subr.mxu0 %v894_v42  ;;  %v519_v38 = vld [vmem:[#allocation5 + $0xef8] sm:$0xff]  ;;  %v518_v40 = vld [vmem:[#allocation5 + $0xef0] sm:$0xff] }
 0x1c6   :  { %2204 = vmatprep.subr.mxu1 %v64_v43  ;;  %2134 = vmatpush1.msra.mxu0 %v893_v44  ;;  %v298_v41 = vld [vmem:[#allocation5 + $0x810] sm:$0xff]  ;;  %v297_v43 = vld [vmem:[#allocation5 + $0x808] sm:$0xff] }
 0x1c7   :  { %2205 = vmatpush1.msra.mxu1 %v63_v45  ;;  %2135 = vmatprep.subr.mxu0 %v881_v46  ;;  %v506_v42 = vld [vmem:[#allocation5 + $0xe90] sm:$0xff]  ;;  %v505_v44 = vld [vmem:[#allocation5 + $0xe88] sm:$0xff] }
 0x1c8   :  { %2206 = vmatprep.subr.mxu1 %v51_v47  ;;  %2136 = vmatpush1.msra.mxu0 %v880_v48  ;;  %v285_v45 = vld [vmem:[#allocation5 + $0x7a8] sm:$0xff]  ;;  %v284_v47 = vld [vmem:[#allocation5 + $0x7a0] sm:$0xff] }
 0x1c9   :  { %2169 = vmatprep.mubr.f32.mxu0 %v2900_v20  ;;  %2207 = vmatpush1.msra.mxu1 %v50_v17  ;;  %v493_v46 = vld [vmem:[#allocation5 + $0xe28] sm:$0xff]  ;;  %v492_v48 = vld [vmem:[#allocation5 + $0xe20] sm:$0xff] }
 0x1ca   :  { %2170 = vmatmul.mubr.f32.vlgmr.msra.gmra.mxu0 %v2975_v54  ;;  %2208 = vmatprep.subr.mxu1 %v454_v49  ;;  %v272_v17 = vld [vmem:[#allocation5 + $0x740] sm:$0xff] }
 0x1cb   :  { %2247 = vmatprep.subr.mxu0 %v662_v50  ;;  %2209 = vmatpush2.msra.mxu1 %v453_v51  ;;  %v480_v49 = vld [vmem:[#allocation5 + $0xdc0] sm:$0xff]  ;;  %v271_v50 = vld [vmem:[#allocation5 + $0x738] sm:$0xff] }
 0x1cc   :  { %2248 = vmatpush1.msra.mxu0 %v661_v53  ;;  %2210 = vmatprep.subr.mxu1 %v441_v56  ;;  %v479_v51 = vld [vmem:[#allocation5 + $0xdb8] sm:$0xff] }
 0x1cd   :  { %2249 = vmatprep.subr.mxu0 %v649_v57  ;;  %2211 = vmatpush2.msra.mxu1 %v440_v58  ;;  %v259_v53 = vld [vmem:[#allocation5 + $0x6d8] sm:$0xff]  ;;  %v258_v57 = vld [vmem:[#allocation5 + $0x6d0] sm:$0xff] }
 0x1ce   :  { %2250 = vmatpush1.msra.mxu0 %v648_v59  ;;  %2212 = vmatprep.subr.mxu1 %v428_v60  ;;  %v467_v56 = vld [vmem:[#allocation5 + $0xd58] sm:$0xff]  ;;  %v466_v58 = vld [vmem:[#allocation5 + $0xd50] sm:$0xff] }
 0x1cf   :  { %2251 = vmatprep.subr.mxu0 %v636_v61  ;;  %2213 = vmatpush2.msra.mxu1 %v427_v63  ;;  %v870_v59 = vld [vmem:[#allocation5 + $0x19f0] sm:$0xff]  ;;  %v869_v61 = vld [vmem:[#allocation5 + $0x19e8] sm:$0xff] }
 0x1d0   :  { %2252 = vmatpush1.msra.mxu0 %v635_v0  ;;  %2214 = vmatprep.subr.mxu1 %v415_v2  ;;  %v1078_v60 = vld [vmem:[#allocation5 + $0x2070] sm:$0xff]  ;;  %v1077_v63 = vld [vmem:[#allocation5 + $0x2068] sm:$0xff] }
 0x1d1   :  { %2253 = vmatprep.subr.mxu0 %v623_v3  ;;  %2215 = vmatpush2.msra.mxu1 %v414_v4  ;;  %v857_v0 = vld [vmem:[#allocation5 + $0x1988] sm:$0xff]  ;;  %v856_v3 = vld [vmem:[#allocation5 + $0x1980] sm:$0xff] }
 0x1d2   :  { %2254 = vmatpush1.msra.mxu0 %v622_v5  ;;  %2216 = vmatprep.subr.mxu1 %v402_v6  ;;  %v1065_v2 = vld [vmem:[#allocation5 + $0x2008] sm:$0xff]  ;;  %v1064_v4 = vld [vmem:[#allocation5 + $0x2000] sm:$0xff] }
 0x1d3   :  { %2255 = vmatprep.subr.mxu0 %v610_v7  ;;  %2217 = vmatpush2.msra.mxu1 %v401_v9  ;;  %v844_v5 = vld [vmem:[#allocation5 + $0x1920] sm:$0xff]  ;;  %v843_v7 = vld [vmem:[#allocation5 + $0x1918] sm:$0xff] }
 0x1d4   :  { %2256 = vmatpush1.msra.mxu0 %v609_v11  ;;  %2218 = vmatprep.subr.mxu1 %v389_v12  ;;  %v1052_v6 = vld [vmem:[#allocation5 + $0x1fa0] sm:$0xff]  ;;  %v1051_v9 = vld [vmem:[#allocation5 + $0x1f98] sm:$0xff] }
 0x1d5   :  { %2257 = vmatprep.subr.mxu0 %v597_v13  ;;  %2219 = vmatpush2.msra.mxu1 %v388_v14  ;;  %v831_v11 = vld [vmem:[#allocation5 + $0x18b8] sm:$0xff]  ;;  %v830_v13 = vld [vmem:[#allocation5 + $0x18b0] sm:$0xff] }
 0x1d6   :  { %2258 = vmatpush1.msra.mxu0 %v596_v15  ;;  %2220 = vmatprep.subr.mxu1 %v376_v16  ;;  %v1039_v12 = vld [vmem:[#allocation5 + $0x1f38] sm:$0xff]  ;;  %v1038_v14 = vld [vmem:[#allocation5 + $0x1f30] sm:$0xff] }
 0x1d7   :  { %2259 = vmatprep.subr.mxu0 %v584_v18  ;;  %2221 = vmatpush2.msra.mxu1 %v375_v19  ;;  %v818_v15 = vld [vmem:[#allocation5 + $0x1850] sm:$0xff]  ;;  %v817_v18 = vld [vmem:[#allocation5 + $0x1848] sm:$0xff] }
 0x1d8   :  { %2260 = vmatpush1.msra.mxu0 %v583_v21  ;;  %2222 = vmatprep.subr.mxu1 %v363_v22  ;;  %v1026_v16 = vld [vmem:[#allocation5 + $0x1ed0] sm:$0xff]  ;;  %v1025_v19 = vld [vmem:[#allocation5 + $0x1ec8] sm:$0xff] }
 0x1d9   :  { %2261 = vmatprep.subr.mxu0 %v571_v23  ;;  %2223 = vmatpush2.msra.mxu1 %v362_v55  ;;  %v805_v21 = vld [vmem:[#allocation5 + $0x17e8] sm:$0xff]  ;;  %v804_v23 = vld [vmem:[#allocation5 + $0x17e0] sm:$0xff] }
 0x1da   :  { %2262 = vmatpush1.msra.mxu0 %v570_v24  ;;  %2224 = vmatprep.subr.mxu1 %v350_v25  ;;  %v1013_v22 = vld [vmem:[#allocation5 + $0x1e68] sm:$0xff]  ;;  %v1012_v55 = vld [vmem:[#allocation5 + $0x1e60] sm:$0xff] }
 0x1db   :  { %2263 = vmatprep.subr.mxu0 %v558_v26  ;;  %2225 = vmatpush2.msra.mxu1 %v349_v27  ;;  %v792_v24 = vld [vmem:[#allocation5 + $0x1780] sm:$0xff]  ;;  %v791_v26 = vld [vmem:[#allocation5 + $0x1778] sm:$0xff] }
 0x1dc   :  { %2264 = vmatpush1.msra.mxu0 %v557_v28  ;;  %2226 = vmatprep.subr.mxu1 %v337_v29  ;;  %v1000_v25 = vld [vmem:[#allocation5 + $0x1e00] sm:$0xff]  ;;  %v999_v27 = vld [vmem:[#allocation5 + $0x1df8] sm:$0xff] }
 0x1dd   :  { %2265 = vmatprep.subr.mxu0 %v545_v30  ;;  %2227 = vmatpush2.msra.mxu1 %v336_v31  ;;  %v779_v28 = vld [vmem:[#allocation5 + $0x1718] sm:$0xff]  ;;  %v778_v30 = vld [vmem:[#allocation5 + $0x1710] sm:$0xff] }
 0x1de   :  { %2266 = vmatpush1.msra.mxu0 %v544_v32  ;;  %2228 = vmatprep.subr.mxu1 %v324_v33  ;;  %v987_v29 = vld [vmem:[#allocation5 + $0x1d98] sm:$0xff]  ;;  %v986_v31 = vld [vmem:[#allocation5 + $0x1d90] sm:$0xff] }
 0x1df   :  { %2267 = vmatprep.subr.mxu0 %v532_v34  ;;  %2229 = vmatpush2.msra.mxu1 %v323_v35  ;;  %v766_v32 = vld [vmem:[#allocation5 + $0x16b0] sm:$0xff]  ;;  %v765_v34 = vld [vmem:[#allocation5 + $0x16a8] sm:$0xff] }
 0x1e0   :  { %2268 = vmatpush1.msra.mxu0 %v531_v36  ;;  %2230 = vmatprep.subr.mxu1 %v311_v37  ;;  %v974_v33 = vld [vmem:[#allocation5 + $0x1d30] sm:$0xff]  ;;  %v973_v35 = vld [vmem:[#allocation5 + $0x1d28] sm:$0xff] }
 0x1e1   :  { %2269 = vmatprep.subr.mxu0 %v519_v38  ;;  %2231 = vmatpush2.msra.mxu1 %v310_v39  ;;  %v753_v36 = vld [vmem:[#allocation5 + $0x1648] sm:$0xff]  ;;  %v752_v38 = vld [vmem:[#allocation5 + $0x1640] sm:$0xff] }
 0x1e2   :  { %2270 = vmatpush1.msra.mxu0 %v518_v40  ;;  %2232 = vmatprep.subr.mxu1 %v298_v41  ;;  %v961_v37 = vld [vmem:[#allocation5 + $0x1cc8] sm:$0xff]  ;;  %v960_v39 = vld [vmem:[#allocation5 + $0x1cc0] sm:$0xff] }
 0x1e3   :  { %2271 = vmatprep.subr.mxu0 %v506_v42  ;;  %2233 = vmatpush2.msra.mxu1 %v297_v43  ;;  %v740_v40 = vld [vmem:[#allocation5 + $0x15e0] sm:$0xff]  ;;  %v739_v42 = vld [vmem:[#allocation5 + $0x15d8] sm:$0xff] }
 0x1e4   :  { %2272 = vmatpush1.msra.mxu0 %v505_v44  ;;  %2234 = vmatprep.subr.mxu1 %v285_v45  ;;  %v948_v41 = vld [vmem:[#allocation5 + $0x1c60] sm:$0xff]  ;;  %v947_v43 = vld [vmem:[#allocation5 + $0x1c58] sm:$0xff] }
 0x1e5   :  { %2273 = vmatprep.subr.mxu0 %v493_v46  ;;  %2235 = vmatpush2.msra.mxu1 %v284_v47  ;;  %v727_v44 = vld [vmem:[#allocation5 + $0x1578] sm:$0xff]  ;;  %v726_v46 = vld [vmem:[#allocation5 + $0x1570] sm:$0xff] }
 0x1e6   :  { %2274 = vmatpush1.msra.mxu0 %v492_v48  ;;  %2236 = vmatprep.subr.mxu1 %v272_v17  ;;  %v935_v45 = vld [vmem:[#allocation5 + $0x1bf8] sm:$0xff]  ;;  %v934_v47 = vld [vmem:[#allocation5 + $0x1bf0] sm:$0xff] }
 0x1e7   :  { %2275 = vmatprep.subr.mxu0 %v480_v49  ;;  %2237 = vmatpush2.msra.mxu1 %v271_v50  ;;  %v714_v48 = vld [vmem:[#allocation5 + $0x1510] sm:$0xff]  ;;  %v713_v49 = vld [vmem:[#allocation5 + $0x1508] sm:$0xff] }
 0x1e8   :  { %2276 = vmatpush1.msra.mxu0 %v479_v51  ;;  %2238 = vmatprep.subr.mxu1 %v259_v53  ;;  %v922_v17 = vld [vmem:[#allocation5 + $0x1b90] sm:$0xff]  ;;  %v921_v50 = vld [vmem:[#allocation5 + $0x1b88] sm:$0xff] }
 0x1e9   :  { %2277 = vmatprep.subr.mxu0 %v467_v56  ;;  %2239 = vmatpush2.msra.mxu1 %v258_v57  ;;  %v701_v51 = vld [vmem:[#allocation5 + $0x14a8] sm:$0xff]  ;;  %v700_v56 = vld [vmem:[#allocation5 + $0x14a0] sm:$0xff] }
 0x1ea   :  { %2278 = vmatpush1.msra.mxu0 %v466_v58  ;;  %2240 = vmatprep.mubr.f32.mxu1 %v2934_v8  ;;  %v909_v53 = vld [vmem:[#allocation5 + $0x1b28] sm:$0xff]  ;;  %v908_v57 = vld [vmem:[#allocation5 + $0x1b20] sm:$0xff] }
 0x1eb   :  { %2279 = vmatprep.subr.mxu0 %v870_v59  ;;  %2318 = vmatprep.subr.mxu1 %v1078_v60  ;;  %v688_v58 = vld [vmem:[#allocation5 + $0x1440] sm:$0xff]  ;;  %v687_v60 = vld [vmem:[#allocation5 + $0x1438] sm:$0xff] }
 0x1ec   :  { %2241 = vmatmul.mubr.f32.vlgmr.msra.gmra.mxu1 %v2927_v62  ;;  %2280 = vmatpush2.msra.mxu0 %v869_v61  ;;  %v896_v59 = vld [vmem:[#allocation5 + $0x1ac0] sm:$0xff]  ;;  %v895_v61 = vld [vmem:[#allocation5 + $0x1ab8] sm:$0xff] }
 0x1ed   :  { %2319 = vmatpush1.msra.mxu1 %v1077_v63  ;;  %2281 = vmatprep.subr.mxu0 %v857_v0  ;;  %v675_v63 = vld [vmem:[#allocation5 + $0x13d8] sm:$0xff] }
 0x1ee   :  { %2320 = vmatprep.subr.mxu1 %v1065_v2  ;;  %2282 = vmatpush2.msra.mxu0 %v856_v3  ;;  %v883_v0 = vld [vmem:[#allocation5 + $0x1a58] sm:$0xff]  ;;  %v674_v2 = vld [vmem:[#allocation5 + $0x13d0] sm:$0xff] }
 0x1ef   :  { %2321 = vmatpush1.msra.mxu1 %v1064_v4  ;;  %2283 = vmatprep.subr.mxu0 %v844_v5  ;;  %v882_v3 = vld [vmem:[#allocation5 + $0x1a50] sm:$0xff]  ;;  %v455_v4 = vld [vmem:[#allocation5 + $0xcf8] sm:$0xff] }
 0x1f0   :  { %2322 = vmatprep.subr.mxu1 %v1052_v6  ;;  %2284 = vmatpush2.msra.mxu0 %v843_v7  ;;  %v871_v5 = vld [vmem:[#allocation5 + $0x19f8] sm:$0xff] }
 0x1f1   :  { %2323 = vmatpush1.msra.mxu1 %v1051_v9  ;;  %2285 = vmatprep.subr.mxu0 %v831_v11  ;;  %v247_v6 = vld [vmem:[#allocation5 + $0x678] sm:$0xff]  ;;  %v442_v9 = vld [vmem:[#allocation5 + $0xc90] sm:$0xff] }
 0x1f2   :  { %2324 = vmatprep.subr.mxu1 %v1039_v12  ;;  %2286 = vmatpush2.msra.mxu0 %v830_v13  ;;  %v663_v7 = vld [vmem:[#allocation5 + $0x1378] sm:$0xff]  ;;  %v858_v11 = vld [vmem:[#allocation5 + $0x1990] sm:$0xff] }
 0x1f3   :  { %2325 = vmatpush1.msra.mxu1 %v1038_v14  ;;  %2287 = vmatprep.subr.mxu0 %v818_v15  ;;  %v234_v12 = vld [vmem:[#allocation5 + $0x610] sm:$0xff]  ;;  %v429_v14 = vld [vmem:[#allocation5 + $0xc28] sm:$0xff] }
 0x1f4   :  { %2326 = vmatprep.subr.mxu1 %v1026_v16  ;;  %2288 = vmatpush2.msra.mxu0 %v817_v18  ;;  %v650_v13 = vld [vmem:[#allocation5 + $0x1310] sm:$0xff]  ;;  %v845_v15 = vld [vmem:[#allocation5 + $0x1928] sm:$0xff] }
 0x1f5   :  { %2327 = vmatpush1.msra.mxu1 %v1025_v19  ;;  %2289 = vmatprep.subr.mxu0 %v805_v21  ;;  %v221_v16 = vld [vmem:[#allocation5 + $0x5a8] sm:$0xff]  ;;  %v416_v19 = vld [vmem:[#allocation5 + $0xbc0] sm:$0xff] }
 0x1f6   :  { %2328 = vmatprep.subr.mxu1 %v1013_v22  ;;  %2290 = vmatpush2.msra.mxu0 %v804_v23  ;;  %v637_v18 = vld [vmem:[#allocation5 + $0x12a8] sm:$0xff]  ;;  %v832_v21 = vld [vmem:[#allocation5 + $0x18c0] sm:$0xff] }
 0x1f7   :  { %2329 = vmatpush1.msra.mxu1 %v1012_v55  ;;  %2291 = vmatprep.subr.mxu0 %v792_v24  ;;  %v208_v22 = vld [vmem:[#allocation5 + $0x540] sm:$0xff]  ;;  %v403_v55 = vld [vmem:[#allocation5 + $0xb58] sm:$0xff] }
 0x1f8   :  { %2330 = vmatprep.subr.mxu1 %v1000_v25  ;;  %2292 = vmatpush2.msra.mxu0 %v791_v26  ;;  %v624_v23 = vld [vmem:[#allocation5 + $0x1240] sm:$0xff]  ;;  %v819_v24 = vld [vmem:[#allocation5 + $0x1858] sm:$0xff] }
 0x1f9   :  { %2331 = vmatpush1.msra.mxu1 %v999_v27  ;;  %2293 = vmatprep.subr.mxu0 %v779_v28  ;;  %v195_v25 = vld [vmem:[#allocation5 + $0x4d8] sm:$0xff]  ;;  %v390_v27 = vld [vmem:[#allocation5 + $0xaf0] sm:$0xff] }
 0x1fa   :  { %2332 = vmatprep.subr.mxu1 %v987_v29  ;;  %2294 = vmatpush2.msra.mxu0 %v778_v30  ;;  %v611_v26 = vld [vmem:[#allocation5 + $0x11d8] sm:$0xff]  ;;  %v806_v28 = vld [vmem:[#allocation5 + $0x17f0] sm:$0xff] }
 0x1fb   :  { %2333 = vmatpush1.msra.mxu1 %v986_v31  ;;  %2295 = vmatprep.subr.mxu0 %v766_v32  ;;  %v182_v29 = vld [vmem:[#allocation5 + $0x470] sm:$0xff]  ;;  %v377_v31 = vld [vmem:[#allocation5 + $0xa88] sm:$0xff] }
 0x1fc   :  { %2334 = vmatprep.subr.mxu1 %v974_v33  ;;  %2296 = vmatpush2.msra.mxu0 %v765_v34  ;;  %v598_v30 = vld [vmem:[#allocation5 + $0x1170] sm:$0xff]  ;;  %v793_v32 = vld [vmem:[#allocation5 + $0x1788] sm:$0xff] }
 0x1fd   :  { %2335 = vmatpush1.msra.mxu1 %v973_v35  ;;  %2297 = vmatprep.subr.mxu0 %v753_v36  ;;  %v169_v33 = vld [vmem:[#allocation5 + $0x408] sm:$0xff]  ;;  %v364_v35 = vld [vmem:[#allocation5 + $0xa20] sm:$0xff] }
 0x1fe   :  { %2336 = vmatprep.subr.mxu1 %v961_v37  ;;  %2298 = vmatpush2.msra.mxu0 %v752_v38  ;;  %v585_v34 = vld [vmem:[#allocation5 + $0x1108] sm:$0xff]  ;;  %v780_v36 = vld [vmem:[#allocation5 + $0x1720] sm:$0xff]  ;;  %v1603_v37 = vpop.f32.mrf.mxu0 }
 0x1ff   :  { %2337 = vmatpush1.msra.mxu1 %v960_v39  ;;  %2299 = vmatprep.subr.mxu0 %v740_v40  ;;  %v156_v38 = vld [vmem:[#allocation5 + $0x3a0] sm:$0xff]  ;;  %v351_v40 = vld [vmem:[#allocation5 + $0x9b8] sm:$0xff] }
 0x200   :  { %2338 = vmatprep.subr.mxu1 %v948_v41  ;;  %2300 = vmatpush2.msra.mxu0 %v739_v42  ;;  %v572_v39 = vld [vmem:[#allocation5 + $0x10a0] sm:$0xff]  ;;  %v767_v41 = vld [vmem:[#allocation5 + $0x16b8] sm:$0xff]  ;;  %v1674_v42 = vpop.f32.mrf.mxu1 }
 0x201   :  { %2339 = vmatpush1.msra.mxu1 %v947_v43  ;;  %2301 = vmatprep.subr.mxu0 %v727_v44  ;;  %v143_v43 = vld [vmem:[#allocation5 + $0x338] sm:$0xff] }
 0x202   :  { %2340 = vmatprep.subr.mxu1 %v935_v45  ;;  %2302 = vmatpush2.msra.mxu0 %v726_v46  ;;  %v559_v44 = vld [vmem:[#allocation5 + $0x1038] sm:$0xff]  ;;  %v338_v45 = vld [vmem:[#allocation5 + $0x950] sm:$0xff] }
 0x203   :  { %2341 = vmatpush1.msra.mxu1 %v934_v47  ;;  %2303 = vmatprep.subr.mxu0 %v714_v48  ;;  %v754_v46 = vld [vmem:[#allocation5 + $0x1650] sm:$0xff]  ;;  %v1605_v47 = vpop.f32.mrf.mxu0 }
 0x204   :  { %2342 = vmatprep.subr.mxu1 %v922_v17  ;;  %2304 = vmatpush2.msra.mxu0 %v713_v49  ;;  %v130_v48 = vld [vmem:[#allocation5 + $0x2d0] sm:$0xff]  ;;  %v325_v49 = vld [vmem:[#allocation5 + $0x8e8] sm:$0xff] }
 0x205   :  { %2343 = vmatpush1.msra.mxu1 %v921_v50  ;;  %2305 = vmatprep.subr.mxu0 %v701_v51  ;;  %v546_v17 = vld [vmem:[#allocation5 + $0xfd0] sm:$0xff]  ;;  %v741_v50 = vld [vmem:[#allocation5 + $0x15e8] sm:$0xff]  ;;  %v1676_v51 = vpop.f32.mrf.mxu1 }
 0x206   :  { %2344 = vmatprep.subr.mxu1 %v909_v53  ;;  %2306 = vmatpush2.msra.mxu0 %v700_v56  ;;  %v1745_v53 = vpop.f32.mrf.mxu0  ;;  %v117_v56 = vld [vmem:[#allocation5 + $0x268] sm:$0xff] }
 0x207   :  { %2345 = vmatpush1.msra.mxu1 %v908_v57  ;;  %2307 = vmatprep.subr.mxu0 %v688_v58  ;;  %v533_v57 = vld [vmem:[#allocation5 + $0xf68] sm:$0xff]  ;;  %v312_v58 = vld [vmem:[#allocation5 + $0x880] sm:$0xff] }
 0x208   :  { %2346 = vmatprep.subr.mxu1 %v896_v59  ;;  %2308 = vmatpush2.msra.mxu0 %v687_v60  ;;  %v728_v59 = vld [vmem:[#allocation5 + $0x1580] sm:$0xff] }
 0x209   :  { %2347 = vmatpush1.msra.mxu1 %v895_v61  ;;  %2309 = vmatprep.subr.mxu0 %v675_v63  ;;  %v104_v60 = vld [vmem:[#allocation5 + $0x200] sm:$0xff]  ;;  %v1816_v63 = vpop.f32.mrf.mxu1 }
 0x20a   :  { %2348 = vmatprep.subr.mxu1 %v883_v0  ;;  %2310 = vmatpush2.msra.mxu0 %v674_v2  ;;  %v520_v61 = vld [vmem:[#allocation5 + $0xf00] sm:$0xff]  ;;  %v299_v0 = vld [vmem:[#allocation5 + $0x818] sm:$0xff] }
 0x20b   :  { %2311 = vmatprep.mubr.f32.mxu0 %v2938_v10  ;;  %2349 = vmatpush1.msra.mxu1 %v882_v3  ;;  %v715_v2 = vld [vmem:[#allocation5 + $0x1518] sm:$0xff]  ;;  %v1747_v3 = vpop.f32.mrf.mxu0 }
 0x20c   :  { %2312 = vmatmul.mubr.f32.vlgmr.msra.gmra.mxu0 %v2930_v1  ;;  %2382 = vmatprep.mubr.f32.mxu1 %v2900_v20 }
 0x20d   :  { %2696 = vmatprep.subr.mxu0 %v455_v4  ;;  %2731 = vmatprep.subr.mxu1 %v871_v5  ;;  %v91_v4 = vld [vmem:[#allocation5 + $0x198] sm:$0xff] }
 0x20e   :  { %2383 = vmatmul.mubr.f32.vlgmr.msra.gmra.mxu1 %v2975_v54  ;;  %2697 = vmatpush3.msra.mxu0 %v247_v6  ;;  %v507_v5 = vld [vmem:[#allocation5 + $0xe98] sm:$0xff]  ;;  %v1677_v6 = vadd.f32 %v1676_v51, %v1605_v47 }
 0x20f   :  { %2732 = vmatpush3.msra.mxu1 %v663_v7  ;;  %2698 = vmatprep.subr.mxu0 %v442_v9  ;;  %v286_v7 = vld [vmem:[#allocation5 + $0x7b0] sm:$0xff]  ;;  %v923_v47 = vld [vmem:[#allocation5 + $0x1b98] sm:$0xff] }
 0x210   :  { %2733 = vmatprep.subr.mxu1 %v858_v11  ;;  %2699 = vmatpush3.msra.mxu0 %v234_v12  ;;  %v702_v9 = vld [vmem:[#allocation5 + $0x14b0] sm:$0xff]  ;;  %v1818_v11 = vpop.f32.mrf.mxu1 }
 0x211   :  { %2734 = vmatpush3.msra.mxu1 %v650_v13  ;;  %2700 = vmatprep.subr.mxu0 %v429_v14  ;;  %v78_v12 = vld [vmem:[#allocation5 + $0x130] sm:$0xff] }
 0x212   :  { %2735 = vmatprep.subr.mxu1 %v845_v15  ;;  %2701 = vmatpush3.msra.mxu0 %v221_v16  ;;  %v494_v13 = vld [vmem:[#allocation5 + $0xe30] sm:$0xff]  ;;  %v1675_v15 = vadd.f32 %v1674_v42, %v1603_v37  ;;  %v1748_v16 = vadd.f32 %v1747_v3, %v1677_v6  ;;  %v988_v42 = vld [vmem:[#allocation5 + $0x1da0] sm:$0xff] }
 0x213   :  { %2736 = vmatpush3.msra.mxu1 %v637_v18  ;;  %2702 = vmatprep.subr.mxu0 %v416_v19  ;;  %v273_v18 = vld [vmem:[#allocation5 + $0x748] sm:$0xff] }
 0x214   :  { %2737 = vmatprep.subr.mxu1 %v832_v21  ;;  %2703 = vmatpush3.msra.mxu0 %v208_v22  ;;  %v689_v19 = vld [vmem:[#allocation5 + $0x1448] sm:$0xff] }
 0x215   :  { %2738 = vmatpush3.msra.mxu1 %v624_v23  ;;  %2704 = vmatprep.subr.mxu0 %v403_v55  ;;  %v65_v22 = vld [vmem:[#allocation5 + $0xc8] sm:$0xff] }
 0x216   :  { %2739 = vmatprep.subr.mxu1 %v819_v24  ;;  %2705 = vmatpush3.msra.mxu0 %v195_v25  ;;  %v481_v23 = vld [vmem:[#allocation5 + $0xdc8] sm:$0xff]  ;;  %v1746_v25 = vadd.f32 %v1745_v53, %v1675_v15 }
 0x217   :  { %2740 = vmatpush3.msra.mxu1 %v611_v26  ;;  %2706 = vmatprep.subr.mxu0 %v390_v27  ;;  %v260_v26 = vld [vmem:[#allocation5 + $0x6e0] sm:$0xff] }
 0x218   :  { %2741 = vmatprep.subr.mxu1 %v806_v28  ;;  %2707 = vmatpush3.msra.mxu0 %v182_v29  ;;  %v676_v27 = vld [vmem:[#allocation5 + $0x13e0] sm:$0xff] }
 0x219   :  { %2742 = vmatpush3.msra.mxu1 %v598_v30  ;;  %2708 = vmatprep.subr.mxu0 %v377_v31  ;;  %v52_v29 = vld [vmem:[#allocation5 + $0x60] sm:$0xff]  ;;  %v2629_v31 = vcombine.low %v1746_v25, %v1748_v16 }
 0x21a   :  { %2743 = vmatprep.subr.mxu1 %v793_v32  ;;  %2709 = vmatpush3.msra.mxu0 %v169_v33  ;;  %v468_v32 = vld [vmem:[#allocation5 + $0xd60] sm:$0xff] }
 0x21b   :  { %2744 = vmatpush3.msra.mxu1 %v585_v34  ;;  %2710 = vmatprep.subr.mxu0 %v364_v35  ;;  %v2637_v37 = vrot.slane %v2629_v31, %v2924_v52 }
 0x21c   :  { %2745 = vmatprep.subr.mxu1 %v780_v36  ;;  %2711 = vmatpush3.msra.mxu0 %v156_v38  ;;  %v1079_v36 = vld [vmem:[#allocation5 + $0x2078] sm:$0xff] }
 0x21d   :  { %2746 = vmatpush3.msra.mxu1 %v572_v39  ;;  %2712 = vmatprep.subr.mxu0 %v351_v40  ;;  %v1066_v39 = vld [vmem:[#allocation5 + $0x2010] sm:$0xff] }
 0x21e   :  { %2747 = vmatprep.subr.mxu1 %v767_v41  ;;  %2713 = vmatpush3.msra.mxu0 %v143_v43  ;;  %v1014_v40 = vld [vmem:[#allocation5 + $0x1e70] sm:$0xff]  ;;  %v1001_v41 = vld [vmem:[#allocation5 + $0x1e08] sm:$0xff]  ;;  %v975_v43 = vld [vmem:[#allocation5 + $0x1d38] sm:$0xff] }
 0x21f   :  { %2748 = vmatpush3.msra.mxu1 %v559_v44  ;;  %2714 = vmatprep.subr.mxu0 %v338_v45  ;;  %v962_v44 = vld [vmem:[#allocation5 + $0x1cd0] sm:$0xff]  ;;  %v949_v45 = vld [vmem:[#allocation5 + $0x1c68] sm:$0xff] }
 0x220   :  { %2749 = vmatprep.subr.mxu1 %v754_v46  ;;  %2715 = vmatpush3.msra.mxu0 %v130_v48  ;;  %v936_v46 = vld [vmem:[#allocation5 + $0x1c00] sm:$0xff]  ;;  %v910_v48 = vld [vmem:[#allocation5 + $0x1b30] sm:$0xff] }
 0x221   :  { %2750 = vmatpush3.msra.mxu1 %v546_v17  ;;  %2716 = vmatprep.subr.mxu0 %v325_v49  ;;  %v897_v17 = vld [vmem:[#allocation5 + $0x1ac8] sm:$0xff]  ;;  %v884_v49 = vld [vmem:[#allocation5 + $0x1a60] sm:$0xff] }
 0x222   :  { %2751 = vmatprep.subr.mxu1 %v741_v50  ;;  %2717 = vmatpush3.msra.mxu0 %v117_v56 }
 0x223   :  { %2752 = vmatpush3.msra.mxu1 %v533_v57  ;;  %2718 = vmatprep.subr.mxu0 %v312_v58 }
 0x224   :  { %2753 = vmatprep.subr.mxu1 %v728_v59  ;;  %2719 = vmatpush3.msra.mxu0 %v104_v60 }
 0x225   :  { %2754 = vmatpush3.msra.mxu1 %v520_v61  ;;  %2720 = vmatprep.subr.mxu0 %v299_v0 }
 0x226   :  { %2755 = vmatprep.subr.mxu1 %v715_v2  ;;  %v1887_v14 = vpop.f32.mrf.mxu0  ;;  %2721 = vmatpush3.msra.mxu0 %v91_v4 }
 0x227   :  { %2756 = vmatpush3.msra.mxu1 %v507_v5  ;;  %v1888_v21 = vadd.f32 %v1887_v14, %v1816_v63  ;;  %2722 = vmatprep.subr.mxu0 %v286_v7 }
 0x228   :  { %2757 = vmatprep.subr.mxu1 %v702_v9  ;;  %v1889_v55 = vpop.f32.mrf.mxu0  ;;  %v1958_v24 = vpop.f32.mrf.mxu1  ;;  %2723 = vmatpush3.msra.mxu0 %v78_v12 }
 0x229   :  { %2758 = vmatpush3.msra.mxu1 %v494_v13  ;;  %v1890_v28 = vadd.f32 %v1889_v55, %v1818_v11  ;;  %2724 = vmatprep.subr.mxu0 %v273_v18  ;;  %v1959_v33 = vadd.f32 %v1958_v24, %v1888_v21 }
 0x22a   :  { %2759 = vmatprep.subr.mxu1 %v689_v19  ;;  %v1960_v30 = vpop.f32.mrf.mxu1  ;;  %2725 = vmatpush3.msra.mxu0 %v65_v22 }
 0x22b   :  { %2760 = vmatpush3.msra.mxu1 %v481_v23  ;;  %v1961_v34 = vadd.f32 %v1960_v30, %v1890_v28  ;;  %2726 = vmatprep.subr.mxu0 %v260_v26 }
 0x22c   :  { %2761 = vmatprep.subr.mxu1 %v676_v27  ;;  %2727 = vmatpush3.msra.mxu0 %v52_v29 }
 0x22d   :  { %2453 = vmatprep.mubr.f32.mxu0 %v2934_v8  ;;  %v2630_v35 = vcombine.low %v1959_v33, %v1961_v34  ;;  %2762 = vmatpush3.msra.mxu1 %v468_v32 }
 0x22e   :  { %2523 = vmatprep.mubr.f32.mxu1 %v2938_v10  ;;  %2454 = vmatmul.mubr.f32.vlgmr.msra.gmra.mxu0 %v2927_v62  ;;  %v1053_v10 = vld [vmem:[#allocation5 + $0x1fa8] sm:$0xff]  ;;  %v1040_v62 = vld [vmem:[#allocation5 + $0x1f40] sm:$0xff] }
 0x22f   :  { %2524 = vmatmul.mubr.f32.vlgmr.msra.gmra.mxu1 %v2930_v1  ;;  %v2644_v38 = vrot.slane %v2630_v35, %v2924_v52  ;;  %2783 = vmatprep.subr.mxu0 %v2900_v20  ;;  %v1027_v1 = vld [vmem:[#allocation5 + $0x1ed8] sm:$0xff] }
 0x230   :  { %2815 = vmatprep.mubr.msk.f32.mxu0 %vm2901_vm0, %v2900_v20  ;;  %2784 = vmatpush3.msra.mxu0 %v1079_v36 }
 0x231   :  { %v2645_v8 = vcombine.low %v2637_v37, %v2644_v38  ;;  %2785 = vmatprep.subr.mxu0 %v2900_v20 }
 0x232   :  { %2786 = vmatpush3.msra.mxu0 %v1066_v39 }
 0x233   :  { %2675 = vst [vmem:[#allocation7 + $0x8] sm:$0xff] %v2645_v8  ;;  %2787 = vmatprep.subr.mxu0 %v2900_v20 }
 0x234   :  { %2788 = vmatpush3.msra.mxu0 %v1053_v10 }
 0x235   :  { %2789 = vmatprep.subr.mxu0 %v2900_v20 }
 0x236   :  { %2790 = vmatpush3.msra.mxu0 %v1040_v62 }
 0x237   :  { %2791 = vmatprep.subr.mxu0 %v2900_v20 }
 0x238   :  { %2792 = vmatpush3.msra.mxu0 %v1027_v1 }
 0x239   :  { %2793 = vmatprep.subr.mxu0 %v2900_v20 }
 0x23a   :  { %2794 = vmatpush3.msra.mxu0 %v1014_v40 }
 0x23b   :  { %2795 = vmatprep.subr.mxu0 %v2900_v20 }
 0x23c   :  { %2796 = vmatpush3.msra.mxu0 %v1001_v41 }
 0x23d   :  { %2797 = vmatprep.subr.mxu0 %v2900_v20 }
 0x23e   :  { %2798 = vmatpush3.msra.mxu0 %v988_v42 }
 0x23f   :  { %2799 = vmatprep.subr.mxu0 %v2900_v20 }
 0x240   :  { %2800 = vmatpush3.msra.mxu0 %v975_v43 }
 0x241   :  { %2801 = vmatprep.subr.mxu0 %v2900_v20 }
 0x242   :  { %2802 = vmatpush3.msra.mxu0 %v962_v44 }
 0x243   :  { %2803 = vmatprep.subr.mxu0 %v2900_v20 }
 0x244   :  { %2804 = vmatpush3.msra.mxu0 %v949_v45 }
 0x245   :  { %2805 = vmatprep.subr.mxu0 %v2900_v20 }
 0x246   :  { %2806 = vmatpush3.msra.mxu0 %v936_v46 }
 0x247   :  { %2807 = vmatprep.subr.mxu0 %v2900_v20 }
 0x248   :  { %2808 = vmatpush3.msra.mxu0 %v923_v47 }
 0x249   :  { %2809 = vmatprep.subr.mxu0 %v2900_v20 }
 0x24a   :  { %2810 = vmatpush3.msra.mxu0 %v910_v48 }
 0x24b   :  { %2811 = vmatprep.subr.mxu0 %v2900_v20 }
 0x24c   :  { %2812 = vmatpush3.msra.mxu0 %v897_v17 }
 0x24d   :  { %2813 = vmatprep.subr.mxu0 %v2900_v20 }
 0x24e   :  { %2814 = vmatpush3.msra.mxu0 %v884_v49 }
 0x24f   :  { %2816 = vmatmul.mubr.f32.vlgmr.msra.gmra.mxu0 %v2975_v54 }
 0x268   :  { %v2029_v50 = vpop.f32.mrf.mxu0 }
 0x269   :  { %v2100_v51 = vpop.f32.mrf.mxu1 }
 0x26a   :  { %v2031_v53 = vpop.f32.mrf.mxu0  ;;  %v2101_v0 = vadd.f32 %v2100_v51, %v2029_v50 }
 0x26b   :  { %v2102_v56 = vpop.f32.mrf.mxu1 }
 0x26c   :  { %v2103_v60 = vadd.f32 %v2102_v56, %v2031_v53 }
 0x28a   :  { %v2171_v57 = vpop.f32.mrf.mxu0 }
 0x28b   :  { %v2172_v6 = vadd.f32 %v2171_v57, %v2101_v0 }
 0x28c   :  { %v2173_v59 = vpop.f32.mrf.mxu0 }
 0x28d   :  { %v2174_v2 = vadd.f32 %v2173_v59, %v2103_v60 }
 0x28f   :  { %v2646_v9 = vcombine.low %v2172_v6, %v2174_v2 }
 0x291   :  { %v2654_v13 = vrot.slane %v2646_v9, %v2924_v52 }
 0x2ac   :  { %v2242_v58 = vpop.f32.mrf.mxu1 }
 0x2ae   :  { %v2244_v61 = vpop.f32.mrf.mxu1 }
 0x2cc   :  { %v2313_v63 = vpop.f32.mrf.mxu0 }
 0x2cd   :  { %v2314_v3 = vadd.f32 %v2313_v63, %v2242_v58 }
 0x2ce   :  { %v2315_v4 = vpop.f32.mrf.mxu0  ;;  %v2384_v5 = vpop.f32.mrf.mxu1 }
 0x2cf   :  { %v2316_v20 = vadd.f32 %v2315_v4, %v2244_v61  ;;  %v2385_v54 = vadd.f32 %v2384_v5, %v2314_v3 }
 0x2d0   :  { %v2386_v7 = vpop.f32.mrf.mxu1 }
 0x2d1   :  { %v2387_v11 = vadd.f32 %v2386_v7, %v2316_v20 }
 0x2d3   :  { %v2647_v12 = vcombine.low %v2385_v54, %v2387_v11 }
 0x2d5   :  { %v2661_v14 = vrot.slane %v2647_v12, %v2924_v52 }
 0x2d7   :  { %v2662_v15 = vcombine.low %v2654_v13, %v2661_v14 }
 0x2d9   :  { %2676 = vst [vmem:[#allocation7 + $0x10] sm:$0xff] %v2662_v15 }
 0x2ee   :  { %v2728_v16 = vpop.f32.mrf.mxu0 }
 0x2ef   :  { %v2763_v18 = vpop.f32.mrf.mxu1 }
 0x2f0   :  { %v2729_v19 = vpop.f32.mrf.mxu0 }
 0x2f1   :  { %v2764_v21 = vpop.f32.mrf.mxu1  ;;  %v2730_v22 = vadd.f32 %v2729_v19, %v2728_v16 }
 0x2f2   :  { %v2765_v23 = vadd.f32 %v2764_v21, %v2763_v18 }
 0x2f4   :  { %v2526_v55 = vadd.f32 %v2765_v23, %v2730_v22 }
 0x30f   :  { %v2595_v24 = vpop.f32.mrf.mxu0 }
 0x310   :  { %v2596_v25 = vadd.f32 %v2595_v24, %v2526_v55 }
 0x311   :  { %v2817_v26 = vpop.f32.mrf.mxu0 }
 0x312   :  { %2695 = vst.sshfl [vmem:[#allocation7 + $0x18] sm:$0x3 pattern:$0x76325410] %v2596_v25 }
 0x313   :  { %2880 = shalt.err (!%p2877_p0)
}
 0x314   :  { %2687 = dma.vmem_to_hbm [thread:$0]  %s2685_s1, 416, %s3015_s2, [#allocation4]  }
 0x315   :  { %2893 = dma.done.wait [#allocation4], 416  }
 0x316   :  { %2894 = vsyncadd [#allocation4], 4294966880 }
 0x317   :  { %2691 = vsyncpa [#allocation3], 1 }
 0x318   :  { %2692 = vsyncpa [#allocation6], 1 }
 0x319   :  { %2693 = vsyncpa [#allocation4], 1 }

</bundles_post_ra>
